<compile_context>
chip_gen: v7x
topology: tpu7x:2x2x1
jax: 0.10.0
libtpu: 0.0.40
codegen_flags: <defaults>
</compile_context>

<pallas_src>
import functools

import jax
import jax.numpy as jnp
from jax import lax
from jax.experimental import pallas as pl
from jax.experimental.pallas import tpu as pltpu

EPS = 1e-5
LRELU_SLOPE = 0.01  # LeakyReLU slope used by the MLP head

SUBGRAPH_16 = (5, 3, 3, 3, 3, 3, 5, 5, 5, 11, 3, 3, 3, 3, 3, 12)  # sums to 73
SUBGRAPH_7 = (5, 9, 9, 25, 9, 9, 12)                               # sums to 78
# Deterministic stand-in for graphpool.feature_trans (mapping 62 channels -> 73/78).
IDX_16 = tuple(i % 62 for i in range(sum(SUBGRAPH_16)))
IDX_7 = tuple(i % 62 for i in range(sum(SUBGRAPH_7)))

_PARALLEL = pltpu.CompilerParams(dimension_semantics=("parallel",))


# ---------------------------------------------------------------------------
# 1. LocalLayer (GCN):  out = adj @ (x @ W) + b
# ---------------------------------------------------------------------------
def _local_gcn_kernel(x_ref, w_ref, adj_ref, b_ref, o_ref):
    x = x_ref[0]                                                     # (62, 5)
    wf = jnp.dot(x, w_ref[...], preferred_element_type=jnp.float32)  # (62, 5)
    out = jnp.dot(adj_ref[...], wf, preferred_element_type=jnp.float32)
    o_ref[0] = (out + b_ref[...]).astype(o_ref.dtype)


def local_gcn(x_t, w, adj, b_row):
    bsz, n, f = x_t.shape
    return pl.pallas_call(
        _local_gcn_kernel,
        out_shape=jax.ShapeDtypeStruct((bsz, n, f), jnp.float32),
        grid_spec=pltpu.PrefetchScalarGridSpec(
            num_scalar_prefetch=0,
            grid=(bsz,),
            in_specs=[pl.BlockSpec((1, n, f), lambda i: (i, 0, 0)),
                      pl.BlockSpec((f, f), lambda i: (0, 0)),
                      pl.BlockSpec((n, n), lambda i: (0, 0)),
                      pl.BlockSpec((1, f), lambda i: (0, 0))],
            out_specs=pl.BlockSpec((1, n, f), lambda i: (i, 0, 0))),
        compiler_params=_PARALLEL,
    )(x_t, w, adj, b_row)


# ---------------------------------------------------------------------------
# 2. ChannelAttentionMPL.  Kernel input is the (L, C) layout of the torch
#    (B, C, L) tensor, so pooling is a sublane reduce and the SE-MLP is two
#    small row-vector matmuls (avg/max rows stacked into one (2, C) operand).
# ---------------------------------------------------------------------------
def _channel_att_kernel(xt_ref, w1t_ref, w2t_ref, ot_ref, att_ref):
    xt = xt_ref[0]                                                   # (L, C)
    inv_l = 1.0 / xt.shape[0]
    pooled = jnp.concatenate(
        [jnp.sum(xt, axis=0, keepdims=True) * inv_l,                 # avg pool
         jnp.max(xt, axis=0, keepdims=True)], axis=0)                # max pool -> (2, C)
    h = jnp.maximum(
        jnp.dot(pooled, w1t_ref[...], preferred_element_type=jnp.float32), 0.0)
    o = jnp.dot(h, w2t_ref[...], preferred_element_type=jnp.float32)  # (2, C)
    logits = o[0:1, :] + o[1:2, :]
    att = 1.0 / (1.0 + jnp.exp(-logits))                             # sigmoid
    ot_ref[0] = (xt * (1.0 + att)).astype(ot_ref.dtype)              # x + att*x
    att_ref[0] = att.astype(att_ref.dtype)


def channel_attention(x_t, w1_t, w2_t):
    """x_t: (B, L, C) = transposed torch input (B, C, L).  Returns (out^T, att row)."""
    bsz, l, c = x_t.shape
    hidden = w1_t.shape[1]
    return pl.pallas_call(
        _channel_att_kernel,
        out_shape=(jax.ShapeDtypeStruct((bsz, l, c), jnp.float32),
                   jax.ShapeDtypeStruct((bsz, 1, c), jnp.float32)),
        grid_spec=pltpu.PrefetchScalarGridSpec(
            num_scalar_prefetch=0,
            grid=(bsz,),
            in_specs=[pl.BlockSpec((1, l, c), lambda i: (i, 0, 0)),
                      pl.BlockSpec((c, hidden), lambda i: (0, 0)),
                      pl.BlockSpec((hidden, c), lambda i: (0, 0))],
            out_specs=(pl.BlockSpec((1, l, c), lambda i: (i, 0, 0)),
                       pl.BlockSpec((1, 1, c), lambda i: (i, 0, 0)))),
        compiler_params=_PARALLEL,
    )(x_t, w1_t, w2_t)


# ---------------------------------------------------------------------------
# 3. MesoLayer attention coarsening (per-subgraph masked softmax pooling).
# ---------------------------------------------------------------------------
def _meso_kernel(f_ref, m_ref, w_ref, o_ref, *, batch):
    w = w_ref[...]                                                   # (5, 10)
    mask = m_ref[0]                                                  # (Lmax, 1)
    for b in range(batch):                                           # static unroll
        f2 = f_ref[0, b]                                             # (Lmax, 5)
        fww = jnp.dot(f2, w, preferred_element_type=jnp.float32)     # (Lmax, 10)
        att_m = lax.dot_general(fww, fww, (((1,), (1,)), ((), ())),
                                preferred_element_type=jnp.float32)  # (Lmax, Lmax)
        logits = jnp.sum(att_m, axis=1, keepdims=True)               # (Lmax, 1)
        logits = jnp.where(mask > 0.0, logits, jnp.float32(-1e30))
        mmax = jnp.max(logits, axis=0, keepdims=True)
        e = jnp.exp(logits - mmax) * mask
        att = e / jnp.sum(e, axis=0, keepdims=True)                  # (Lmax, 1)
        o_ref[0, b:b + 1, :] = jnp.sum(att * f2, axis=0, keepdims=True)


def _pack_subgraphs(ft, lengths):
    n_sub, lmax = len(lengths), max(lengths)
    feats, masks, off = [], [], 0
    for ln in lengths:
        seg = ft[:, off:off + ln, :]
        feats.append(jnp.pad(seg, ((0, 0), (0, lmax - ln), (0, 0))))
        masks.append(jnp.concatenate(
            [jnp.ones((ln, 1), jnp.float32), jnp.zeros((lmax - ln, 1), jnp.float32)],
            axis=0))
        off += ln
    return jnp.stack(feats, 0), jnp.stack(masks, 0)   # (n_sub,B,Lmax,5), (n_sub,Lmax,1)


def meso_layer(residual, idx, lengths, w):
    bsz = residual.shape[0]
    ft = residual[:, jnp.asarray(idx, jnp.int32), :]                 # (B, total, 5)
    feats, mask = _pack_subgraphs(ft, lengths)
    n_sub, _, lmax, f = feats.shape
    out = pl.pallas_call(
        functools.partial(_meso_kernel, batch=bsz),
        out_shape=jax.ShapeDtypeStruct((n_sub, bsz, f), jnp.float32),
        grid_spec=pltpu.PrefetchScalarGridSpec(
            num_scalar_prefetch=0,
            grid=(n_sub,),
            in_specs=[pl.BlockSpec((1, bsz, lmax, f), lambda g: (g, 0, 0, 0)),
                      pl.BlockSpec((1, lmax, 1), lambda g: (g, 0, 0)),
                      pl.BlockSpec((f, 10), lambda g: (0, 0))],
            out_specs=pl.BlockSpec((1, bsz, f), lambda g: (g, 0, 0))),
        compiler_params=_PARALLEL,
    )(feats, mask, w)
    return jnp.swapaxes(out, 0, 1)                                   # (B, n_sub, 5)


# ---------------------------------------------------------------------------
# 4. MLP head: fused [Linear (no bias) -> BatchNorm(batch stats) -> LeakyReLU] x3
# ---------------------------------------------------------------------------
def _pick_batch_tile(n):
    for t in (512, 256, 128):
        if n % t == 0:
            return t
    return n


def _mm_stats_kernel(x_ref, w_ref, y_ref, stat_ref):
    # Linear WITHOUT bias: cancelled exactly by the training-mode BN mean.
    y = jnp.dot(x_ref[...], w_ref[...], preferred_element_type=jnp.float32)
    y_ref[...] = y
    stat_ref[0] = jnp.concatenate(
        [jnp.sum(y, axis=0, keepdims=True),
         jnp.sum(y * y, axis=0, keepdims=True)], axis=0)


def _norm_lrelu_mm_stats_kernel(y_ref, ss_ref, w_ref, o_ref, stat_ref):
    # BN of the previous layer (gamma folded into scale) + LeakyReLU, fused with
    # the next Linear and its per-tile BN partial statistics.
    z = y_ref[...] * ss_ref[0:1, :] + ss_ref[1:2, :]
    a = jnp.where(z >= 0, z, LRELU_SLOPE * z)
    y2 = jnp.dot(a, w_ref[...], preferred_element_type=jnp.float32)
    o_ref[...] = y2
    stat_ref[0] = jnp.concatenate(
        [jnp.sum(y2, axis=0, keepdims=True),
         jnp.sum(y2 * y2, axis=0, keepdims=True)], axis=0)


def _norm_lrelu_kernel(y_ref, ss_ref, o_ref):
    z = y_ref[...] * ss_ref[0:1, :] + ss_ref[1:2, :]
    o_ref[...] = jnp.where(z >= 0, z, LRELU_SLOPE * z).astype(o_ref.dtype)


def _mm_stats(x, w_t, tile):
    n, k = x.shape
    f = w_t.shape[1]
    nt = n // tile
    return pl.pallas_call(
        _mm_stats_kernel,
        out_shape=(jax.ShapeDtypeStruct((n, f), jnp.float32),
                   jax.ShapeDtypeStruct((nt, 2, f), jnp.float32)),
        grid_spec=pltpu.PrefetchScalarGridSpec(
            num_scalar_prefetch=0,
            grid=(nt,),
            in_specs=[pl.BlockSpec((tile, k), lambda i: (i, 0)),
                      pl.BlockSpec((k, f), lambda i: (0, 0))],
            out_specs=(pl.BlockSpec((tile, f), lambda i: (i, 0)),
                       pl.BlockSpec((1, 2, f), lambda i: (i, 0, 0)))),
        compiler_params=_PARALLEL,
    )(x, w_t)


def _norm_lrelu_mm_stats(y, ss, w_t, tile):
    n, k = y.shape
    f = w_t.shape[1]
    nt = n // tile
    return pl.pallas_call(
        _norm_lrelu_mm_stats_kernel,
        out_shape=(jax.ShapeDtypeStruct((n, f), jnp.float32),
                   jax.ShapeDtypeStruct((nt, 2, f), jnp.float32)),
        grid_spec=pltpu.PrefetchScalarGridSpec(
            num_scalar_prefetch=0,
            grid=(nt,),
            in_specs=[pl.BlockSpec((tile, k), lambda i: (i, 0)),
                      pl.BlockSpec((2, k), lambda i: (0, 0)),
                      pl.BlockSpec((k, f), lambda i: (0, 0))],
            out_specs=(pl.BlockSpec((tile, f), lambda i: (i, 0)),
                       pl.BlockSpec((1, 2, f), lambda i: (i, 0, 0)))),
        compiler_params=_PARALLEL,
    )(y, ss, w_t)


def _norm_lrelu(y, ss, tile):
    n, f = y.shape
    nt = n // tile
    return pl.pallas_call(
        _norm_lrelu_kernel,
        out_shape=jax.ShapeDtypeStruct((n, f), jnp.float32),
        grid_spec=pltpu.PrefetchScalarGridSpec(
            num_scalar_prefetch=0,
            grid=(nt,),
            in_specs=[pl.BlockSpec((tile, f), lambda i: (i, 0)),
                      pl.BlockSpec((2, f), lambda i: (0, 0))],
            out_specs=pl.BlockSpec((tile, f), lambda i: (i, 0))),
        compiler_params=_PARALLEL,
    )(y, ss)


def _bn_scale_shift(partials, gamma, beta, n):
    """Reduce per-tile (sum, sumsq) partials -> fused (scale, shift) rows (2, F)."""
    s = jnp.sum(partials, axis=0)
    mean = s[0] / n
    var = jnp.maximum(s[1] / n - mean * mean, 0.0)       # biased batch variance
    scale = gamma * lax.rsqrt(var + EPS)                  # gamma folded in
    return jnp.stack([scale, beta - mean * scale], axis=0)


def mlp_head(x, weights_t, gammas, betas):
    n = x.shape[0]
    tile = _pick_batch_tile(n)
    y, part = _mm_stats(x, weights_t[0], tile)
    ss = _bn_scale_shift(part, gammas[0], betas[0], n)
    for i in range(1, len(weights_t)):
        y, part = _norm_lrelu_mm_stats(y, ss, weights_t[i], tile)
        ss = _bn_scale_shift(part, gammas[i], betas[i], n)
    return _norm_lrelu(y, ss, tile)


# ---------------------------------------------------------------------------
# Full forward
# ---------------------------------------------------------------------------
def emotion_attention_forward(x, params):
    b = x.shape[0]
    xt = jnp.swapaxes(x.reshape(b, 5, 62), 1, 2)                       # (B,62,5)
    gcn = local_gcn(xt, params["gcn_w"], params["adj"], params["gcn_b"])
    x_flat = jnp.swapaxes(gcn, 1, 2).reshape(b, -1)                    # (B,310)

    # frequency_mix: torch input (B,5,62); its (L,C) layout is exactly `gcn`.
    out1_t, att1 = channel_attention(gcn, params["fm_w1t"], params["fm_w2t"])
    # channel_mix: torch input (B,62,5); its (L,C) layout is swapaxes(out1_t).
    out2_t, att2 = channel_attention(jnp.swapaxes(out1_t, 1, 2),
                                     params["cm_w1t"], params["cm_w2t"])
    out_flat = out2_t.reshape(b, -1)                                   # (B,310)

    c1 = meso_layer(gcn, IDX_16, SUBGRAPH_16, params["meso1_w"])       # (B,16,5)
    c2 = meso_layer(gcn, IDX_7, SUBGRAPH_7, params["meso2_w"])         # (B, 7,5)
    x1_flat = jnp.swapaxes(c1, 1, 2).reshape(b, -1)
    x3_flat = jnp.swapaxes(c2, 1, 2).reshape(b, -1)

    cat = jnp.concatenate([x_flat, out_flat, x1_flat, x3_flat], axis=1)  # (B,735)
    out = mlp_head(cat, params["mlp_w_t"], params["mlp_gamma"], params["mlp_beta"])
    return out, (jnp.swapaxes(att1, 1, 2), jnp.swapaxes(att2, 1, 2))


# ---------------------------------------------------------------------------
# Pure-JAX reference (mirrors the PyTorch forward, including the Linear biases
# that the kernel drops because training-mode BN cancels them exactly).
# ---------------------------------------------------------------------------
def reference_forward(x, p):
    b = x.shape[0]
    xt = jnp.swapaxes(x.reshape(b, 5, 62), 1, 2)
    wf = jnp.einsum("bij,jd->bid", xt, p["gcn_w"])
    gcn = jnp.einsum("ij,bjd->bid", p["adj"], wf) + p["gcn_b"]
    x_flat = jnp.swapaxes(gcn, 1, 2).reshape(b, -1)

    def chan_att(xc, w1, w2):
        avg, mx = jnp.mean(xc, axis=2), jnp.max(xc, axis=2)
        mlp = lambda v: jnp.maximum(v @ w1.T, 0.0) @ w2.T
        att = 1.0 / (1.0 + jnp.exp(-(mlp(avg) + mlp(mx))))
        return xc + att[:, :, None] * xc, att[:, :, None]

    out1, att1 = chan_att(jnp.swapaxes(gcn, 1, 2), p["fm_w1"], p["fm_w2"])
    out2, att2 = chan_att(jnp.swapaxes(out1, 1, 2), p["cm_w1"], p["cm_w2"])
    out_flat = jnp.swapaxes(out2, 1, 2).reshape(b, -1)

    def meso(res, idx, lengths, w):
        ft = res[:, jnp.asarray(idx, jnp.int32), :]
        pieces, off = [], 0
        for ln in lengths:
            sub = ft[:, off:off + ln, :]
            fww = jnp.einsum("bjg,gh->bjh", sub, w)
            attm = jnp.einsum("bjh,bkh->bjk", fww, fww)
            av = jax.nn.softmax(jnp.sum(attm, axis=2), axis=1)
            pieces.append(jnp.einsum("bj,bjg->bg", av, sub)[:, None, :])
            off += ln
        return jnp.concatenate(pieces, axis=1)

    c1 = meso(gcn, IDX_16, SUBGRAPH_16, p["meso1_w"])
    c2 = meso(gcn, IDX_7, SUBGRAPH_7, p["meso2_w"])
    x1_flat = jnp.swapaxes(c1, 1, 2).reshape(b, -1)
    x3_flat = jnp.swapaxes(c2, 1, 2).reshape(b, -1)

    h = jnp.concatenate([x_flat, out_flat, x1_flat, x3_flat], axis=1)
    for w, bb, g, be in zip(p["mlp_w"], p["mlp_b"], p["mlp_gamma"], p["mlp_beta"]):
        y = h @ w.T + bb
        mean = jnp.mean(y, axis=0, keepdims=True)
        var = jnp.mean((y - mean) ** 2, axis=0, keepdims=True)
        z = g * (y - mean) / jnp.sqrt(var + EPS) + be
        h = jnp.where(z >= 0, z, LRELU_SLOPE * z)   # Dropout treated as identity
    return h, (att1, att2)


if __name__ == "__main__":
    key = jax.random.PRNGKey(0)
    keys = jax.random.split(key, 16)
    B = 8
    x = jax.random.normal(keys[0], (B, 310), jnp.float32)

    def uni(k, shape, fan):
        bound = float(fan) ** -0.5
        return jax.random.uniform(k, shape, jnp.float32, -bound, bound)

    p = {
        "gcn_w": uni(keys[1], (5, 5), 5),
        "gcn_b": uni(keys[2], (5,), 5),
        # TODO(synk): stand-in for convert_dis_m(get_ini_dis_m(), 9).
        "adj": jax.random.uniform(keys[3], (62, 62), jnp.float32, 0.0, 1.0) / 62.0,
        "fm_w1": uni(keys[4], (32, 5), 5),     # Conv1d(5, 32, 1, bias=False)
        "fm_w2": uni(keys[5], (5, 32), 32),    # Conv1d(32, 5, 1, bias=False)
        "cm_w1": uni(keys[6], (32, 62), 62),
        "cm_w2": uni(keys[7], (62, 32), 32),
        "meso1_w": uni(keys[8], (5, 10), 78),
        "meso2_w": uni(keys[9], (5, 10), 78),
        "mlp_w": [uni(keys[10], (256, 735), 735),
                  uni(keys[11], (128, 256), 256),
                  uni(keys[12], (64, 128), 128)],
        "mlp_b": [uni(keys[13], (256,), 735),
                  uni(keys[14], (128,), 256),
                  uni(keys[15], (64,), 128)],
        "mlp_gamma": [jnp.ones((256,), jnp.float32), jnp.ones((128,), jnp.float32),
                      jnp.ones((64,), jnp.float32)],
        "mlp_beta": [jnp.zeros((256,), jnp.float32), jnp.zeros((128,), jnp.float32),
                     jnp.zeros((64,), jnp.float32)],
    }

    pk = {
        "gcn_w": p["gcn_w"], "gcn_b": p["gcn_b"].reshape(1, 5), "adj": p["adj"],
        "fm_w1t": p["fm_w1"].T, "fm_w2t": p["fm_w2"].T,
        "cm_w1t": p["cm_w1"].T, "cm_w2t": p["cm_w2"].T,
        "meso1_w": p["meso1_w"], "meso2_w": p["meso2_w"],
        "mlp_w_t": [w.T for w in p["mlp_w"]],
        "mlp_gamma": p["mlp_gamma"], "mlp_beta": p["mlp_beta"],
    }

    fwd = jax.jit(emotion_attention_forward)
    out, (att1, att2) = fwd(x, pk)
    jax.block_until_ready(out)

    ref_out, (ref_att1, ref_att2) = reference_forward(x, p)

    assert out.shape == (B, 64) and att1.shape == (B, 5, 1) and att2.shape == (B, 62, 1)
    # Loose tolerance accounts for MXU vs XLA default f32-matmul precision only.
    assert jnp.allclose(att1, ref_att1, atol=2e-2, rtol=2e-2), "att1 mismatch"
    assert jnp.allclose(att2, ref_att2, atol=2e-2, rtol=2e-2), "att2 mismatch"
    assert jnp.allclose(out, ref_out, atol=2e-2, rtol=2e-2), "output mismatch"
    print("KERNEL_OK")
</pallas_src>

<mosaic_0001>
module attributes {stable_mosaic.version = 11 : i64} {
  func.func @_local_gcn_kernel(%arg0: i32, %arg1: memref<1x62x5xf32, #tpu.memory_space<vmem>>, %arg2: memref<5x5xf32, #tpu.memory_space<vmem>>, %arg3: memref<62x62xf32, #tpu.memory_space<vmem>>, %arg4: memref<1x5xf32, #tpu.memory_space<vmem>>, %arg5: memref<1x62x5xf32, #tpu.memory_space<vmem>>) attributes {dimension_semantics = [#tpu.dimension_semantics<parallel>], iteration_bounds = array<i64: 8>, scalar_prefetch = 0 : i64, scratch_operands = 0 : i64, tpu.core_type = #tpu.core_type<tc>, window_params = [{transform_indices = @transform_0, window_bounds = array<i64: 1, 62, 5>}, {pipeline_mode = #tpu.pipeline_mode<synchronous>, transform_indices = @transform_1, window_bounds = array<i64: 5, 5>}, {pipeline_mode = #tpu.pipeline_mode<synchronous>, transform_indices = @transform_2, window_bounds = array<i64: 62, 62>}, {pipeline_mode = #tpu.pipeline_mode<synchronous>, transform_indices = @transform_3, window_bounds = array<i64: 1, 5>}, {transform_indices = @transform_4, window_bounds = array<i64: 1, 62, 5>}]} {
    %c0 = arith.constant 0 : index
    %c0_0 = arith.constant 0 : index
    %c0_1 = arith.constant 0 : index
    %0 = vector.load %arg1[%c0, %c0_0, %c0_1] : memref<1x62x5xf32, #tpu.memory_space<vmem>>, vector<1x62x5xf32>
    %1 = vector.shape_cast %0 : vector<1x62x5xf32> to vector<62x5xf32>
    %c0_2 = arith.constant 0 : index
    %c0_3 = arith.constant 0 : index
    %2 = vector.load %arg2[%c0_2, %c0_3] : memref<5x5xf32, #tpu.memory_space<vmem>>, vector<5x5xf32>
    %cst = arith.constant dense<0.000000e+00> : vector<62x5xf32>
    %3 = tpu.matmul %1, %2, %cst {dimension_numbers = #tpu.dot_dimension_numbers<[1], [0], [0], [1], [0, 0, 1, 1], [], []>} : vector<62x5xf32>, vector<5x5xf32>, vector<62x5xf32> -> vector<62x5xf32>
    %c0_4 = arith.constant 0 : index
    %c0_5 = arith.constant 0 : index
    %4 = vector.load %arg3[%c0_4, %c0_5] : memref<62x62xf32, #tpu.memory_space<vmem>>, vector<62x62xf32>
    %cst_6 = arith.constant dense<0.000000e+00> : vector<62x5xf32>
    %5 = tpu.matmul %4, %3, %cst_6 {dimension_numbers = #tpu.dot_dimension_numbers<[1], [0], [0], [1], [0, 0, 1, 1], [], []>} : vector<62x62xf32>, vector<62x5xf32>, vector<62x5xf32> -> vector<62x5xf32>
    %c0_7 = arith.constant 0 : index
    %c0_8 = arith.constant 0 : index
    %6 = vector.load %arg4[%c0_7, %c0_8] : memref<1x5xf32, #tpu.memory_space<vmem>>, vector<1x5xf32>
    %7 = vector.broadcast %6 : vector<1x5xf32> to vector<62x5xf32>
    %8 = arith.addf %5, %7 : vector<62x5xf32>
    %c0_9 = arith.constant 0 : index
    %c0_10 = arith.constant 0 : index
    %c0_11 = arith.constant 0 : index
    %9 = vector.load %arg5[%c0_9, %c0_10, %c0_11] : memref<1x62x5xf32, #tpu.memory_space<vmem>>, vector<1x62x5xf32>
    %10 = vector.shape_cast %9 : vector<1x62x5xf32> to vector<62x5xf32>
    %11 = vector.shape_cast %8 : vector<62x5xf32> to vector<1x62x5xf32>
    tpu.vector_store %arg5[%c0_9, %c0_10, %c0_11], %11 {strides = array<i32>} : memref<1x62x5xf32, #tpu.memory_space<vmem>>, vector<1x62x5xf32>,
    return
  }
  func.func @transform_0(%arg0: i32) -> (i32, i32, i32) {
    %c0_i32 = arith.constant 0 : i32
    %c0_i32_0 = arith.constant 0 : i32
    %c0_i32_1 = arith.constant 0 : i32
    return %arg0, %c0_i32, %c0_i32_0 : i32, i32, i32
  }
  func.func @transform_1(%arg0: i32) -> (i32, i32) {
    %c0_i32 = arith.constant 0 : i32
    %c0_i32_0 = arith.constant 0 : i32
    %c0_i32_1 = arith.constant 0 : i32
    return %c0_i32, %c0_i32_0 : i32, i32
  }
  func.func @transform_2(%arg0: i32) -> (i32, i32) {
    %c0_i32 = arith.constant 0 : i32
    %c0_i32_0 = arith.constant 0 : i32
    %c0_i32_1 = arith.constant 0 : i32
    return %c0_i32, %c0_i32_0 : i32, i32
  }
  func.func @transform_3(%arg0: i32) -> (i32, i32) {
    %c0_i32 = arith.constant 0 : i32
    %c0_i32_0 = arith.constant 0 : i32
    %c0_i32_1 = arith.constant 0 : i32
    return %c0_i32, %c0_i32_0 : i32, i32
  }
  func.func @transform_4(%arg0: i32) -> (i32, i32, i32) {
    %c0_i32 = arith.constant 0 : i32
    %c0_i32_0 = arith.constant 0 : i32
    %c0_i32_1 = arith.constant 0 : i32
    return %arg0, %c0_i32, %c0_i32_0 : i32, i32, i32
  }
}

module attributes {stable_mosaic.version = 11 : i64} {
  func.func @_meso_kernel(%arg0: i32, %arg1: memref<1x8x25x5xf32, #tpu.memory_space<vmem>>, %arg2: memref<1x25x1xf32, #tpu.memory_space<vmem>>, %arg3: memref<5x10xf32, #tpu.memory_space<vmem>>, %arg4: memref<1x8x5xf32, #tpu.memory_space<vmem>>) attributes {dimension_semantics = [#tpu.dimension_semantics<parallel>], iteration_bounds = array<i64: 7>, scalar_prefetch = 0 : i64, scratch_operands = 0 : i64, tpu.core_type = #tpu.core_type<tc>, window_params = [{transform_indices = @transform_0, window_bounds = array<i64: 1, 8, 25, 5>}, {transform_indices = @transform_1, window_bounds = array<i64: 1, 25, 1>}, {pipeline_mode = #tpu.pipeline_mode<synchronous>, transform_indices = @transform_2, window_bounds = array<i64: 5, 10>}, {transform_indices = @transform_3, window_bounds = array<i64: 1, 8, 5>}]} {
    %c0 = arith.constant 0 : index
    %c0_0 = arith.constant 0 : index
    %0 = vector.load %arg3[%c0, %c0_0] : memref<5x10xf32, #tpu.memory_space<vmem>>, vector<5x10xf32>
    %c0_1 = arith.constant 0 : index
    %c0_2 = arith.constant 0 : index
    %c0_3 = arith.constant 0 : index
    %1 = vector.load %arg2[%c0_1, %c0_2, %c0_3] : memref<1x25x1xf32, #tpu.memory_space<vmem>>, vector<1x25x1xf32>
    %2 = vector.shape_cast %1 : vector<1x25x1xf32> to vector<25x1xf32>
    %c0_4 = arith.constant 0 : index
    %c0_5 = arith.constant 0 : index
    %c0_6 = arith.constant 0 : index
    %c0_7 = arith.constant 0 : index
    %3 = vector.load %arg1[%c0_4, %c0_5, %c0_6, %c0_7] : memref<1x8x25x5xf32, #tpu.memory_space<vmem>>, vector<1x1x25x5xf32>
    %4 = vector.shape_cast %3 : vector<1x1x25x5xf32> to vector<25x5xf32>
    %cst = arith.constant dense<0.000000e+00> : vector<25x10xf32>
    %5 = tpu.matmul %4, %0, %cst {dimension_numbers = #tpu.dot_dimension_numbers<[1], [0], [0], [1], [0, 0, 1, 1], [], []>} : vector<25x5xf32>, vector<5x10xf32>, vector<25x10xf32> -> vector<25x10xf32>
    %cst_8 = arith.constant dense<0.000000e+00> : vector<25x25xf32>
    %6 = tpu.matmul %5, %5, %cst_8 {dimension_numbers = #tpu.dot_dimension_numbers<[1], [1], [0], [0], [0, 0, 1, 0], [], []>} : vector<25x10xf32>, vector<25x10xf32>, vector<25x25xf32> -> vector<25x25xf32>
    %cst_9 = arith.constant dense<0.000000e+00> : vector<25xf32>
    %7 = vector.multi_reduction <add>, %6, %cst_9 [1] : vector<25x25xf32> to vector<25xf32>
    %8 = vector.shape_cast %7 : vector<25xf32> to vector<25x1xf32>
    %cst_10 = arith.constant 0.000000e+00 : f32
    %9 = vector.broadcast %cst_10 : f32 to vector<25x1xf32>
    %10 = arith.cmpf ogt, %2, %9 : vector<25x1xf32>
    %cst_11 = arith.constant -1.000000e+30 : f32
    %11 = vector.broadcast %cst_11 : f32 to vector<25x1xf32>
    %12 = arith.select %10, %8, %11 : vector<25x1xi1>, vector<25x1xf32>
    %cst_12 = arith.constant dense<0xFF800000> : vector<1xf32>
    %13 = vector.multi_reduction <maximumf>, %12, %cst_12 [0] : vector<25x1xf32> to vector<1xf32>
    %14 = vector.shape_cast %13 : vector<1xf32> to vector<1x1xf32>
    %15 = vector.broadcast %14 : vector<1x1xf32> to vector<25x1xf32>
    %16 = arith.subf %12, %15 : vector<25x1xf32>
    %17 = math.exp %16 : vector<25x1xf32>
    %18 = arith.mulf %17, %2 : vector<25x1xf32>
    %cst_13 = arith.constant dense<0.000000e+00> : vector<1xf32>
    %19 = vector.multi_reduction <add>, %18, %cst_13 [0] : vector<25x1xf32> to vector<1xf32>
    %20 = vector.shape_cast %19 : vector<1xf32> to vector<1x1xf32>
    %21 = vector.broadcast %20 : vector<1x1xf32> to vector<25x1xf32>
    %22 = arith.divf %18, %21 : vector<25x1xf32>
    %23 = vector.broadcast %22 : vector<25x1xf32> to vector<25x5xf32>
    %24 = arith.mulf %23, %4 : vector<25x5xf32>
    %cst_14 = arith.constant dense<0.000000e+00> : vector<5xf32>
    %25 = vector.multi_reduction <add>, %24, %cst_14 [0] : vector<25x5xf32> to vector<5xf32>
    %26 = vector.shape_cast %25 : vector<5xf32> to vector<1x5xf32>
    %c0_15 = arith.constant 0 : index
    %c0_16 = arith.constant 0 : index
    %c0_17 = arith.constant 0 : index
    %27 = vector.load %arg4[%c0_15, %c0_16, %c0_17] : memref<1x8x5xf32, #tpu.memory_space<vmem>>, vector<1x1x5xf32>
    %28 = vector.shape_cast %27 : vector<1x1x5xf32> to vector<1x5xf32>
    %29 = vector.shape_cast %26 : vector<1x5xf32> to vector<1x1x5xf32>
    tpu.vector_store %arg4[%c0_15, %c0_16, %c0_17], %29 {strides = array<i32>} : memref<1x8x5xf32, #tpu.memory_space<vmem>>, vector<1x1x5xf32>,
    %c0_18 = arith.constant 0 : index
    %c1 = arith.constant 1 : index
    %c0_19 = arith.constant 0 : index
    %c0_20 = arith.constant 0 : index
    %30 = vector.load %arg1[%c0_18, %c1, %c0_19, %c0_20] : memref<1x8x25x5xf32, #tpu.memory_space<vmem>>, vector<1x1x25x5xf32>
    %31 = vector.shape_cast %30 : vector<1x1x25x5xf32> to vector<25x5xf32>
    %cst_21 = arith.constant dense<0.000000e+00> : vector<25x10xf32>
    %32 = tpu.matmul %31, %0, %cst_21 {dimension_numbers = #tpu.dot_dimension_numbers<[1], [0], [0], [1], [0, 0, 1, 1], [], []>} : vector<25x5xf32>, vector<5x10xf32>, vector<25x10xf32> -> vector<25x10xf32>
    %cst_22 = arith.constant dense<0.000000e+00> : vector<25x25xf32>
    %33 = tpu.matmul %32, %32, %cst_22 {dimension_numbers = #tpu.dot_dimension_numbers<[1], [1], [0], [0], [0, 0, 1, 0], [], []>} : vector<25x10xf32>, vector<25x10xf32>, vector<25x25xf32> -> vector<25x25xf32>
    %cst_23 = arith.constant dense<0.000000e+00> : vector<25xf32>
    %34 = vector.multi_reduction <add>, %33, %cst_23 [1] : vector<25x25xf32> to vector<25xf32>
    %35 = vector.shape_cast %34 : vector<25xf32> to vector<25x1xf32>
    %cst_24 = arith.constant 0.000000e+00 : f32
    %36 = vector.broadcast %cst_24 : f32 to vector<25x1xf32>
    %37 = arith.cmpf ogt, %2, %36 : vector<25x1xf32>
    %cst_25 = arith.constant -1.000000e+30 : f32
    %38 = vector.broadcast %cst_25 : f32 to vector<25x1xf32>
    %39 = arith.select %37, %35, %38 : vector<25x1xi1>, vector<25x1xf32>
    %cst_26 = arith.constant dense<0xFF800000> : vector<1xf32>
    %40 = vector.multi_reduction <maximumf>, %39, %cst_26 [0] : vector<25x1xf32> to vector<1xf32>
    %41 = vector.shape_cast %40 : vector<1xf32> to vector<1x1xf32>
    %42 = vector.broadcast %41 : vector<1x1xf32> to vector<25x1xf32>
    %43 = arith.subf %39, %42 : vector<25x1xf32>
    %44 = math.exp %43 : vector<25x1xf32>
    %45 = arith.mulf %44, %2 : vector<25x1xf32>
    %cst_27 = arith.constant dense<0.000000e+00> : vector<1xf32>
    %46 = vector.multi_reduction <add>, %45, %cst_27 [0] : vector<25x1xf32> to vector<1xf32>
    %47 = vector.shape_cast %46 : vector<1xf32> to vector<1x1xf32>
    %48 = vector.broadcast %47 : vector<1x1xf32> to vector<25x1xf32>
    %49 = arith.divf %45, %48 : vector<25x1xf32>
    %50 = vector.broadcast %49 : vector<25x1xf32> to vector<25x5xf32>
    %51 = arith.mulf %50, %31 : vector<25x5xf32>
    %cst_28 = arith.constant dense<0.000000e+00> : vector<5xf32>
    %52 = vector.multi_reduction <add>, %51, %cst_28 [0] : vector<25x5xf32> to vector<5xf32>
    %53 = vector.shape_cast %52 : vector<5xf32> to vector<1x5xf32>
    %c0_29 = arith.constant 0 : index
    %c1_30 = arith.constant 1 : index
    %c0_31 = arith.constant 0 : index
    %54 = vector.load %arg4[%c0_29, %c1_30, %c0_31] : memref<1x8x5xf32, #tpu.memory_space<vmem>>, vector<1x1x5xf32>
    %55 = vector.shape_cast %54 : vector<1x1x5xf32> to vector<1x5xf32>
    %56 = vector.shape_cast %53 : vector<1x5xf32> to vector<1x1x5xf32>
    tpu.vector_store %arg4[%c0_29, %c1_30, %c0_31], %56 {strides = array<i32>} : memref<1x8x5xf32, #tpu.memory_space<vmem>>, vector<1x1x5xf32>,
    %c0_32 = arith.constant 0 : index
    %c2 = arith.constant 2 : index
    %c0_33 = arith.constant 0 : index
    %c0_34 = arith.constant 0 : index
    %57 = vector.load %arg1[%c0_32, %c2, %c0_33, %c0_34] : memref<1x8x25x5xf32, #tpu.memory_space<vmem>>, vector<1x1x25x5xf32>
    %58 = vector.shape_cast %57 : vector<1x1x25x5xf32> to vector<25x5xf32>
    %cst_35 = arith.constant dense<0.000000e+00> : vector<25x10xf32>
    %59 = tpu.matmul %58, %0, %cst_35 {dimension_numbers = #tpu.dot_dimension_numbers<[1], [0], [0], [1], [0, 0, 1, 1], [], []>} : vector<25x5xf32>, vector<5x10xf32>, vector<25x10xf32> -> vector<25x10xf32>
    %cst_36 = arith.constant dense<0.000000e+00> : vector<25x25xf32>
    %60 = tpu.matmul %59, %59, %cst_36 {dimension_numbers = #tpu.dot_dimension_numbers<[1], [1], [0], [0], [0, 0, 1, 0], [], []>} : vector<25x10xf32>, vector<25x10xf32>, vector<25x25xf32> -> vector<25x25xf32>
    %cst_37 = arith.constant dense<0.000000e+00> : vector<25xf32>
    %61 = vector.multi_reduction <add>, %60, %cst_37 [1] : vector<25x25xf32> to vector<25xf32>
    %62 = vector.shape_cast %61 : vector<25xf32> to vector<25x1xf32>
    %cst_38 = arith.constant 0.000000e+00 : f32
    %63 = vector.broadcast %cst_38 : f32 to vector<25x1xf32>
    %64 = arith.cmpf ogt, %2, %63 : vector<25x1xf32>
    %cst_39 = arith.constant -1.000000e+30 : f32
    %65 = vector.broadcast %cst_39 : f32 to vector<25x1xf32>
    %66 = arith.select %64, %62, %65 : vector<25x1xi1>, vector<25x1xf32>
    %cst_40 = arith.constant dense<0xFF800000> : vector<1xf32>
    %67 = vector.multi_reduction <maximumf>, %66, %cst_40 [0] : vector<25x1xf32> to vector<1xf32>
    %68 = vector.shape_cast %67 : vector<1xf32> to vector<1x1xf32>
    %69 = vector.broadcast %68 : vector<1x1xf32> to vector<25x1xf32>
    %70 = arith.subf %66, %69 : vector<25x1xf32>
    %71 = math.exp %70 : vector<25x1xf32>
    %72 = arith.mulf %71, %2 : vector<25x1xf32>
    %cst_41 = arith.constant dense<0.000000e+00> : vector<1xf32>
    %73 = vector.multi_reduction <add>, %72, %cst_41 [0] : vector<25x1xf32> to vector<1xf32>
    %74 = vector.shape_cast %73 : vector<1xf32> to vector<1x1xf32>
    %75 = vector.broadcast %74 : vector<1x1xf32> to vector<25x1xf32>
    %76 = arith.divf %72, %75 : vector<25x1xf32>
    %77 = vector.broadcast %76 : vector<25x1xf32> to vector<25x5xf32>
    %78 = arith.mulf %77, %58 : vector<25x5xf32>
    %cst_42 = arith.constant dense<0.000000e+00> : vector<5xf32>
    %79 = vector.multi_reduction <add>, %78, %cst_42 [0] : vector<25x5xf32> to vector<5xf32>
    %80 = vector.shape_cast %79 : vector<5xf32> to vector<1x5xf32>
    %c0_43 = arith.constant 0 : index
    %c2_44 = arith.constant 2 : index
    %c0_45 = arith.constant 0 : index
    %81 = vector.load %arg4[%c0_43, %c2_44, %c0_45] : memref<1x8x5xf32, #tpu.memory_space<vmem>>, vector<1x1x5xf32>
    %82 = vector.shape_cast %81 : vector<1x1x5xf32> to vector<1x5xf32>
    %83 = vector.shape_cast %80 : vector<1x5xf32> to vector<1x1x5xf32>
    tpu.vector_store %arg4[%c0_43, %c2_44, %c0_45], %83 {strides = array<i32>} : memref<1x8x5xf32, #tpu.memory_space<vmem>>, vector<1x1x5xf32>,
    %c0_46 = arith.constant 0 : index
    %c3 = arith.constant 3 : index
    %c0_47 = arith.constant 0 : index
    %c0_48 = arith.constant 0 : index
    %84 = vector.load %arg1[%c0_46, %c3, %c0_47, %c0_48] : memref<1x8x25x5xf32, #tpu.memory_space<vmem>>, vector<1x1x25x5xf32>
    %85 = vector.shape_cast %84 : vector<1x1x25x5xf32> to vector<25x5xf32>
    %cst_49 = arith.constant dense<0.000000e+00> : vector<25x10xf32>
    %86 = tpu.matmul %85, %0, %cst_49 {dimension_numbers = #tpu.dot_dimension_numbers<[1], [0], [0], [1], [0, 0, 1, 1], [], []>} : vector<25x5xf32>, vector<5x10xf32>, vector<25x10xf32> -> vector<25x10xf32>
    %cst_50 = arith.constant dense<0.000000e+00> : vector<25x25xf32>
    %87 = tpu.matmul %86, %86, %cst_50 {dimension_numbers = #tpu.dot_dimension_numbers<[1], [1], [0], [0], [0, 0, 1, 0], [], []>} : vector<25x10xf32>, vector<25x10xf32>, vector<25x25xf32> -> vector<25x25xf32>
    %cst_51 = arith.constant dense<0.000000e+00> : vector<25xf32>
    %88 = vector.multi_reduction <add>, %87, %cst_51 [1] : vector<25x25xf32> to vector<25xf32>
    %89 = vector.shape_cast %88 : vector<25xf32> to vector<25x1xf32>
    %cst_52 = arith.constant 0.000000e+00 : f32
    %90 = vector.broadcast %cst_52 : f32 to vector<25x1xf32>
    %91 = arith.cmpf ogt, %2, %90 : vector<25x1xf32>
    %cst_53 = arith.constant -1.000000e+30 : f32
    %92 = vector.broadcast %cst_53 : f32 to vector<25x1xf32>
    %93 = arith.select %91, %89, %92 : vector<25x1xi1>, vector<25x1xf32>
    %cst_54 = arith.constant dense<0xFF800000> : vector<1xf32>
    %94 = vector.multi_reduction <maximumf>, %93, %cst_54 [0] : vector<25x1xf32> to vector<1xf32>
    %95 = vector.shape_cast %94 : vector<1xf32> to vector<1x1xf32>
    %96 = vector.broadcast %95 : vector<1x1xf32> to vector<25x1xf32>
    %97 = arith.subf %93, %96 : vector<25x1xf32>
    %98 = math.exp %97 : vector<25x1xf32>
    %99 = arith.mulf %98, %2 : vector<25x1xf32>
    %cst_55 = arith.constant dense<0.000000e+00> : vector<1xf32>
    %100 = vector.multi_reduction <add>, %99, %cst_55 [0] : vector<25x1xf32> to vector<1xf32>
    %101 = vector.shape_cast %100 : vector<1xf32> to vector<1x1xf32>
    %102 = vector.broadcast %101 : vector<1x1xf32> to vector<25x1xf32>
    %103 = arith.divf %99, %102 : vector<25x1xf32>
    %104 = vector.broadcast %103 : vector<25x1xf32> to vector<25x5xf32>
    %105 = arith.mulf %104, %85 : vector<25x5xf32>
    %cst_56 = arith.constant dense<0.000000e+00> : vector<5xf32>
    %106 = vector.multi_reduction <add>, %105, %cst_56 [0] : vector<25x5xf32> to vector<5xf32>
    %107 = vector.shape_cast %106 : vector<5xf32> to vector<1x5xf32>
    %c0_57 = arith.constant 0 : index
    %c3_58 = arith.constant 3 : index
    %c0_59 = arith.constant 0 : index
    %108 = vector.load %arg4[%c0_57, %c3_58, %c0_59] : memref<1x8x5xf32, #tpu.memory_space<vmem>>, vector<1x1x5xf32>
    %109 = vector.shape_cast %108 : vector<1x1x5xf32> to vector<1x5xf32>
    %110 = vector.shape_cast %107 : vector<1x5xf32> to vector<1x1x5xf32>
    tpu.vector_store %arg4[%c0_57, %c3_58, %c0_59], %110 {strides = array<i32>} : memref<1x8x5xf32, #tpu.memory_space<vmem>>, vector<1x1x5xf32>,
    %c0_60 = arith.constant 0 : index
    %c4 = arith.constant 4 : index
    %c0_61 = arith.constant 0 : index
    %c0_62 = arith.constant 0 : index
    %111 = vector.load %arg1[%c0_60, %c4, %c0_61, %c0_62] : memref<1x8x25x5xf32, #tpu.memory_space<vmem>>, vector<1x1x25x5xf32>
    %112 = vector.shape_cast %111 : vector<1x1x25x5xf32> to vector<25x5xf32>
    %cst_63 = arith.constant dense<0.000000e+00> : vector<25x10xf32>
    %113 = tpu.matmul %112, %0, %cst_63 {dimension_numbers = #tpu.dot_dimension_numbers<[1], [0], [0], [1], [0, 0, 1, 1], [], []>} : vector<25x5xf32>, vector<5x10xf32>, vector<25x10xf32> -> vector<25x10xf32>
    %cst_64 = arith.constant dense<0.000000e+00> : vector<25x25xf32>
    %114 = tpu.matmul %113, %113, %cst_64 {dimension_numbers = #tpu.dot_dimension_numbers<[1], [1], [0], [0], [0, 0, 1, 0], [], []>} : vector<25x10xf32>, vector<25x10xf32>, vector<25x25xf32> -> vector<25x25xf32>
    %cst_65 = arith.constant dense<0.000000e+00> : vector<25xf32>
    %115 = vector.multi_reduction <add>, %114, %cst_65 [1] : vector<25x25xf32> to vector<25xf32>
    %116 = vector.shape_cast %115 : vector<25xf32> to vector<25x1xf32>
    %cst_66 = arith.constant 0.000000e+00 : f32
    %117 = vector.broadcast %cst_66 : f32 to vector<25x1xf32>
    %118 = arith.cmpf ogt, %2, %117 : vector<25x1xf32>
    %cst_67 = arith.constant -1.000000e+30 : f32
    %119 = vector.broadcast %cst_67 : f32 to vector<25x1xf32>
    %120 = arith.select %118, %116, %119 : vector<25x1xi1>, vector<25x1xf32>
    %cst_68 = arith.constant dense<0xFF800000> : vector<1xf32>
    %121 = vector.multi_reduction <maximumf>, %120, %cst_68 [0] : vector<25x1xf32> to vector<1xf32>
    %122 = vector.shape_cast %121 : vector<1xf32> to vector<1x1xf32>
    %123 = vector.broadcast %122 : vector<1x1xf32> to vector<25x1xf32>
    %124 = arith.subf %120, %123 : vector<25x1xf32>
    %125 = math.exp %124 : vector<25x1xf32>
    %126 = arith.mulf %125, %2 : vector<25x1xf32>
    %cst_69 = arith.constant dense<0.000000e+00> : vector<1xf32>
    %127 = vector.multi_reduction <add>, %126, %cst_69 [0] : vector<25x1xf32> to vector<1xf32>
    %128 = vector.shape_cast %127 : vector<1xf32> to vector<1x1xf32>
    %129 = vector.broadcast %128 : vector<1x1xf32> to vector<25x1xf32>
    %130 = arith.divf %126, %129 : vector<25x1xf32>
    %131 = vector.broadcast %130 : vector<25x1xf32> to vector<25x5xf32>
    %132 = arith.mulf %131, %112 : vector<25x5xf32>
    %cst_70 = arith.constant dense<0.000000e+00> : vector<5xf32>
    %133 = vector.multi_reduction <add>, %132, %cst_70 [0] : vector<25x5xf32> to vector<5xf32>
    %134 = vector.shape_cast %133 : vector<5xf32> to vector<1x5xf32>
    %c0_71 = arith.constant 0 : index
    %c4_72 = arith.constant 4 : index
    %c0_73 = arith.constant 0 : index
    %135 = vector.load %arg4[%c0_71, %c4_72, %c0_73] : memref<1x8x5xf32, #tpu.memory_space<vmem>>, vector<1x1x5xf32>
    %136 = vector.shape_cast %135 : vector<1x1x5xf32> to vector<1x5xf32>
    %137 = vector.shape_cast %134 : vector<1x5xf32> to vector<1x1x5xf32>
    tpu.vector_store %arg4[%c0_71, %c4_72, %c0_73], %137 {strides = array<i32>} : memref<1x8x5xf32, #tpu.memory_space<vmem>>, vector<1x1x5xf32>,
    %c0_74 = arith.constant 0 : index
    %c5 = arith.constant 5 : index
    %c0_75 = arith.constant 0 : index
    %c0_76 = arith.constant 0 : index
    %138 = vector.load %arg1[%c0_74, %c5, %c0_75, %c0_76] : memref<1x8x25x5xf32, #tpu.memory_space<vmem>>, vector<1x1x25x5xf32>
    %139 = vector.shape_cast %138 : vector<1x1x25x5xf32> to vector<25x5xf32>
    %cst_77 = arith.constant dense<0.000000e+00> : vector<25x10xf32>
    %140 = tpu.matmul %139, %0, %cst_77 {dimension_numbers = #tpu.dot_dimension_numbers<[1], [0], [0], [1], [0, 0, 1, 1], [], []>} : vector<25x5xf32>, vector<5x10xf32>, vector<25x10xf32> -> vector<25x10xf32>
    %cst_78 = arith.constant dense<0.000000e+00> : vector<25x25xf32>
    %141 = tpu.matmul %140, %140, %cst_78 {dimension_numbers = #tpu.dot_dimension_numbers<[1], [1], [0], [0], [0, 0, 1, 0], [], []>} : vector<25x10xf32>, vector<25x10xf32>, vector<25x25xf32> -> vector<25x25xf32>
    %cst_79 = arith.constant dense<0.000000e+00> : vector<25xf32>
    %142 = vector.multi_reduction <add>, %141, %cst_79 [1] : vector<25x25xf32> to vector<25xf32>
    %143 = vector.shape_cast %142 : vector<25xf32> to vector<25x1xf32>
    %cst_80 = arith.constant 0.000000e+00 : f32
    %144 = vector.broadcast %cst_80 : f32 to vector<25x1xf32>
    %145 = arith.cmpf ogt, %2, %144 : vector<25x1xf32>
    %cst_81 = arith.constant -1.000000e+30 : f32
    %146 = vector.broadcast %cst_81 : f32 to vector<25x1xf32>
    %147 = arith.select %145, %143, %146 : vector<25x1xi1>, vector<25x1xf32>
    %cst_82 = arith.constant dense<0xFF800000> : vector<1xf32>
    %148 = vector.multi_reduction <maximumf>, %147, %cst_82 [0] : vector<25x1xf32> to vector<1xf32>
    %149 = vector.shape_cast %148 : vector<1xf32> to vector<1x1xf32>
    %150 = vector.broadcast %149 : vector<1x1xf32> to vector<25x1xf32>
    %151 = arith.subf %147, %150 : vector<25x1xf32>
    %152 = math.exp %151 : vector<25x1xf32>
    %153 = arith.mulf %152, %2 : vector<25x1xf32>
    %cst_83 = arith.constant dense<0.000000e+00> : vector<1xf32>
    %154 = vector.multi_reduction <add>, %153, %cst_83 [0] : vector<25x1xf32> to vector<1xf32>
    %155 = vector.shape_cast %154 : vector<1xf32> to vector<1x1xf32>
    %156 = vector.broadcast %155 : vector<1x1xf32> to vector<25x1xf32>
    %157 = arith.divf %153, %156 : vector<25x1xf32>
    %158 = vector.broadcast %157 : vector<25x1xf32> to vector<25x5xf32>
    %159 = arith.mulf %158, %139 : vector<25x5xf32>
    %cst_84 = arith.constant dense<0.000000e+00> : vector<5xf32>
    %160 = vector.multi_reduction <add>, %159, %cst_84 [0] : vector<25x5xf32> to vector<5xf32>
    %161 = vector.shape_cast %160 : vector<5xf32> to vector<1x5xf32>
    %c0_85 = arith.constant 0 : index
    %c5_86 = arith.constant 5 : index
    %c0_87 = arith.constant 0 : index
    %162 = vector.load %arg4[%c0_85, %c5_86, %c0_87] : memref<1x8x5xf32, #tpu.memory_space<vmem>>, vector<1x1x5xf32>
    %163 = vector.shape_cast %162 : vector<1x1x5xf32> to vector<1x5xf32>
    %164 = vector.shape_cast %161 : vector<1x5xf32> to vector<1x1x5xf32>
    tpu.vector_store %arg4[%c0_85, %c5_86, %c0_87], %164 {strides = array<i32>} : memref<1x8x5xf32, #tpu.memory_space<vmem>>, vector<1x1x5xf32>,
    %c0_88 = arith.constant 0 : index
    %c6 = arith.constant 6 : index
    %c0_89 = arith.constant 0 : index
    %c0_90 = arith.constant 0 : index
    %165 = vector.load %arg1[%c0_88, %c6, %c0_89, %c0_90] : memref<1x8x25x5xf32, #tpu.memory_space<vmem>>, vector<1x1x25x5xf32>
    %166 = vector.shape_cast %165 : vector<1x1x25x5xf32> to vector<25x5xf32>
    %cst_91 = arith.constant dense<0.000000e+00> : vector<25x10xf32>
    %167 = tpu.matmul %166, %0, %cst_91 {dimension_numbers = #tpu.dot_dimension_numbers<[1], [0], [0], [1], [0, 0, 1, 1], [], []>} : vector<25x5xf32>, vector<5x10xf32>, vector<25x10xf32> -> vector<25x10xf32>
    %cst_92 = arith.constant dense<0.000000e+00> : vector<25x25xf32>
    %168 = tpu.matmul %167, %167, %cst_92 {dimension_numbers = #tpu.dot_dimension_numbers<[1], [1], [0], [0], [0, 0, 1, 0], [], []>} : vector<25x10xf32>, vector<25x10xf32>, vector<25x25xf32> -> vector<25x25xf32>
    %cst_93 = arith.constant dense<0.000000e+00> : vector<25xf32>
    %169 = vector.multi_reduction <add>, %168, %cst_93 [1] : vector<25x25xf32> to vector<25xf32>
    %170 = vector.shape_cast %169 : vector<25xf32> to vector<25x1xf32>
    %cst_94 = arith.constant 0.000000e+00 : f32
    %171 = vector.broadcast %cst_94 : f32 to vector<25x1xf32>
    %172 = arith.cmpf ogt, %2, %171 : vector<25x1xf32>
    %cst_95 = arith.constant -1.000000e+30 : f32
    %173 = vector.broadcast %cst_95 : f32 to vector<25x1xf32>
    %174 = arith.select %172, %170, %173 : vector<25x1xi1>, vector<25x1xf32>
    %cst_96 = arith.constant dense<0xFF800000> : vector<1xf32>
    %175 = vector.multi_reduction <maximumf>, %174, %cst_96 [0] : vector<25x1xf32> to vector<1xf32>
    %176 = vector.shape_cast %175 : vector<1xf32> to vector<1x1xf32>
    %177 = vector.broadcast %176 : vector<1x1xf32> to vector<25x1xf32>
    %178 = arith.subf %174, %177 : vector<25x1xf32>
    %179 = math.exp %178 : vector<25x1xf32>
    %180 = arith.mulf %179, %2 : vector<25x1xf32>
    %cst_97 = arith.constant dense<0.000000e+00> : vector<1xf32>
    %181 = vector.multi_reduction <add>, %180, %cst_97 [0] : vector<25x1xf32> to vector<1xf32>
    %182 = vector.shape_cast %181 : vector<1xf32> to vector<1x1xf32>
    %183 = vector.broadcast %182 : vector<1x1xf32> to vector<25x1xf32>
    %184 = arith.divf %180, %183 : vector<25x1xf32>
    %185 = vector.broadcast %184 : vector<25x1xf32> to vector<25x5xf32>
    %186 = arith.mulf %185, %166 : vector<25x5xf32>
    %cst_98 = arith.constant dense<0.000000e+00> : vector<5xf32>
    %187 = vector.multi_reduction <add>, %186, %cst_98 [0] : vector<25x5xf32> to vector<5xf32>
    %188 = vector.shape_cast %187 : vector<5xf32> to vector<1x5xf32>
    %c0_99 = arith.constant 0 : index
    %c6_100 = arith.constant 6 : index
    %c0_101 = arith.constant 0 : index
    %189 = vector.load %arg4[%c0_99, %c6_100, %c0_101] : memref<1x8x5xf32, #tpu.memory_space<vmem>>, vector<1x1x5xf32>
    %190 = vector.shape_cast %189 : vector<1x1x5xf32> to vector<1x5xf32>
    %191 = vector.shape_cast %188 : vector<1x5xf32> to vector<1x1x5xf32>
    tpu.vector_store %arg4[%c0_99, %c6_100, %c0_101], %191 {strides = array<i32>} : memref<1x8x5xf32, #tpu.memory_space<vmem>>, vector<1x1x5xf32>,
    %c0_102 = arith.constant 0 : index
    %c7 = arith.constant 7 : index
    %c0_103 = arith.constant 0 : index
    %c0_104 = arith.constant 0 : index
    %192 = vector.load %arg1[%c0_102, %c7, %c0_103, %c0_104] : memref<1x8x25x5xf32, #tpu.memory_space<vmem>>, vector<1x1x25x5xf32>
    %193 = vector.shape_cast %192 : vector<1x1x25x5xf32> to vector<25x5xf32>
    %cst_105 = arith.constant dense<0.000000e+00> : vector<25x10xf32>
    %194 = tpu.matmul %193, %0, %cst_105 {dimension_numbers = #tpu.dot_dimension_numbers<[1], [0], [0], [1], [0, 0, 1, 1], [], []>} : vector<25x5xf32>, vector<5x10xf32>, vector<25x10xf32> -> vector<25x10xf32>
    %cst_106 = arith.constant dense<0.000000e+00> : vector<25x25xf32>
    %195 = tpu.matmul %194, %194, %cst_106 {dimension_numbers = #tpu.dot_dimension_numbers<[1], [1], [0], [0], [0, 0, 1, 0], [], []>} : vector<25x10xf32>, vector<25x10xf32>, vector<25x25xf32> -> vector<25x25xf32>
    %cst_107 = arith.constant dense<0.000000e+00> : vector<25xf32>
    %196 = vector.multi_reduction <add>, %195, %cst_107 [1] : vector<25x25xf32> to vector<25xf32>
    %197 = vector.shape_cast %196 : vector<25xf32> to vector<25x1xf32>
    %cst_108 = arith.constant 0.000000e+00 : f32
    %198 = vector.broadcast %cst_108 : f32 to vector<25x1xf32>
    %199 = arith.cmpf ogt, %2, %198 : vector<25x1xf32>
    %cst_109 = arith.constant -1.000000e+30 : f32
    %200 = vector.broadcast %cst_109 : f32 to vector<25x1xf32>
    %201 = arith.select %199, %197, %200 : vector<25x1xi1>, vector<25x1xf32>
    %cst_110 = arith.constant dense<0xFF800000> : vector<1xf32>
    %202 = vector.multi_reduction <maximumf>, %201, %cst_110 [0] : vector<25x1xf32> to vector<1xf32>
    %203 = vector.shape_cast %202 : vector<1xf32> to vector<1x1xf32>
    %204 = vector.broadcast %203 : vector<1x1xf32> to vector<25x1xf32>
    %205 = arith.subf %201, %204 : vector<25x1xf32>
    %206 = math.exp %205 : vector<25x1xf32>
    %207 = arith.mulf %206, %2 : vector<25x1xf32>
    %cst_111 = arith.constant dense<0.000000e+00> : vector<1xf32>
    %208 = vector.multi_reduction <add>, %207, %cst_111 [0] : vector<25x1xf32> to vector<1xf32>
    %209 = vector.shape_cast %208 : vector<1xf32> to vector<1x1xf32>
    %210 = vector.broadcast %209 : vector<1x1xf32> to vector<25x1xf32>
    %211 = arith.divf %207, %210 : vector<25x1xf32>
    %212 = vector.broadcast %211 : vector<25x1xf32> to vector<25x5xf32>
    %213 = arith.mulf %212, %193 : vector<25x5xf32>
    %cst_112 = arith.constant dense<0.000000e+00> : vector<5xf32>
    %214 = vector.multi_reduction <add>, %213, %cst_112 [0] : vector<25x5xf32> to vector<5xf32>
    %215 = vector.shape_cast %214 : vector<5xf32> to vector<1x5xf32>
    %c0_113 = arith.constant 0 : index
    %c7_114 = arith.constant 7 : index
    %c0_115 = arith.constant 0 : index
    %216 = vector.load %arg4[%c0_113, %c7_114, %c0_115] : memref<1x8x5xf32, #tpu.memory_space<vmem>>, vector<1x1x5xf32>
    %217 = vector.shape_cast %216 : vector<1x1x5xf32> to vector<1x5xf32>
    %218 = vector.shape_cast %215 : vector<1x5xf32> to vector<1x1x5xf32>
    tpu.vector_store %arg4[%c0_113, %c7_114, %c0_115], %218 {strides = array<i32>} : memref<1x8x5xf32, #tpu.memory_space<vmem>>, vector<1x1x5xf32>,
    return
  }
  func.func @transform_0(%arg0: i32) -> (i32, i32, i32, i32) {
    %c0_i32 = arith.constant 0 : i32
    %c0_i32_0 = arith.constant 0 : i32
    %c0_i32_1 = arith.constant 0 : i32
    %c0_i32_2 = arith.constant 0 : i32
    return %arg0, %c0_i32, %c0_i32_0, %c0_i32_1 : i32, i32, i32, i32
  }
  func.func @transform_1(%arg0: i32) -> (i32, i32, i32) {
    %c0_i32 = arith.constant 0 : i32
    %c0_i32_0 = arith.constant 0 : i32
    %c0_i32_1 = arith.constant 0 : i32
    return %arg0, %c0_i32, %c0_i32_0 : i32, i32, i32
  }
  func.func @transform_2(%arg0: i32) -> (i32, i32) {
    %c0_i32 = arith.constant 0 : i32
    %c0_i32_0 = arith.constant 0 : i32
    %c0_i32_1 = arith.constant 0 : i32
    return %c0_i32, %c0_i32_0 : i32, i32
  }
  func.func @transform_3(%arg0: i32) -> (i32, i32, i32) {
    %c0_i32 = arith.constant 0 : i32
    %c0_i32_0 = arith.constant 0 : i32
    %c0_i32_1 = arith.constant 0 : i32
    return %arg0, %c0_i32, %c0_i32_0 : i32, i32, i32
  }
}

module attributes {stable_mosaic.version = 11 : i64} {
  func.func @_meso_kernel(%arg0: i32, %arg1: memref<1x8x12x5xf32, #tpu.memory_space<vmem>>, %arg2: memref<1x12x1xf32, #tpu.memory_space<vmem>>, %arg3: memref<5x10xf32, #tpu.memory_space<vmem>>, %arg4: memref<1x8x5xf32, #tpu.memory_space<vmem>>) attributes {dimension_semantics = [#tpu.dimension_semantics<parallel>], iteration_bounds = array<i64: 16>, scalar_prefetch = 0 : i64, scratch_operands = 0 : i64, tpu.core_type = #tpu.core_type<tc>, window_params = [{transform_indices = @transform_0, window_bounds = array<i64: 1, 8, 12, 5>}, {transform_indices = @transform_1, window_bounds = array<i64: 1, 12, 1>}, {pipeline_mode = #tpu.pipeline_mode<synchronous>, transform_indices = @transform_2, window_bounds = array<i64: 5, 10>}, {transform_indices = @transform_3, window_bounds = array<i64: 1, 8, 5>}]} {
    %c0 = arith.constant 0 : index
    %c0_0 = arith.constant 0 : index
    %0 = vector.load %arg3[%c0, %c0_0] : memref<5x10xf32, #tpu.memory_space<vmem>>, vector<5x10xf32>
    %c0_1 = arith.constant 0 : index
    %c0_2 = arith.constant 0 : index
    %c0_3 = arith.constant 0 : index
    %1 = vector.load %arg2[%c0_1, %c0_2, %c0_3] : memref<1x12x1xf32, #tpu.memory_space<vmem>>, vector<1x12x1xf32>
    %2 = vector.shape_cast %1 : vector<1x12x1xf32> to vector<12x1xf32>
    %c0_4 = arith.constant 0 : index
    %c0_5 = arith.constant 0 : index
    %c0_6 = arith.constant 0 : index
    %c0_7 = arith.constant 0 : index
    %3 = vector.load %arg1[%c0_4, %c0_5, %c0_6, %c0_7] : memref<1x8x12x5xf32, #tpu.memory_space<vmem>>, vector<1x1x12x5xf32>
    %4 = vector.shape_cast %3 : vector<1x1x12x5xf32> to vector<12x5xf32>
    %cst = arith.constant dense<0.000000e+00> : vector<12x10xf32>
    %5 = tpu.matmul %4, %0, %cst {dimension_numbers = #tpu.dot_dimension_numbers<[1], [0], [0], [1], [0, 0, 1, 1], [], []>} : vector<12x5xf32>, vector<5x10xf32>, vector<12x10xf32> -> vector<12x10xf32>
    %cst_8 = arith.constant dense<0.000000e+00> : vector<12x12xf32>
    %6 = tpu.matmul %5, %5, %cst_8 {dimension_numbers = #tpu.dot_dimension_numbers<[1], [1], [0], [0], [0, 0, 1, 0], [], []>} : vector<12x10xf32>, vector<12x10xf32>, vector<12x12xf32> -> vector<12x12xf32>
    %cst_9 = arith.constant dense<0.000000e+00> : vector<12xf32>
    %7 = vector.multi_reduction <add>, %6, %cst_9 [1] : vector<12x12xf32> to vector<12xf32>
    %8 = vector.shape_cast %7 : vector<12xf32> to vector<12x1xf32>
    %cst_10 = arith.constant 0.000000e+00 : f32
    %9 = vector.broadcast %cst_10 : f32 to vector<12x1xf32>
    %10 = arith.cmpf ogt, %2, %9 : vector<12x1xf32>
    %cst_11 = arith.constant -1.000000e+30 : f32
    %11 = vector.broadcast %cst_11 : f32 to vector<12x1xf32>
    %12 = arith.select %10, %8, %11 : vector<12x1xi1>, vector<12x1xf32>
    %cst_12 = arith.constant dense<0xFF800000> : vector<1xf32>
    %13 = vector.multi_reduction <maximumf>, %12, %cst_12 [0] : vector<12x1xf32> to vector<1xf32>
    %14 = vector.shape_cast %13 : vector<1xf32> to vector<1x1xf32>
    %15 = vector.broadcast %14 : vector<1x1xf32> to vector<12x1xf32>
    %16 = arith.subf %12, %15 : vector<12x1xf32>
    %17 = math.exp %16 : vector<12x1xf32>
    %18 = arith.mulf %17, %2 : vector<12x1xf32>
    %cst_13 = arith.constant dense<0.000000e+00> : vector<1xf32>
    %19 = vector.multi_reduction <add>, %18, %cst_13 [0] : vector<12x1xf32> to vector<1xf32>
    %20 = vector.shape_cast %19 : vector<1xf32> to vector<1x1xf32>
    %21 = vector.broadcast %20 : vector<1x1xf32> to vector<12x1xf32>
    %22 = arith.divf %18, %21 : vector<12x1xf32>
    %23 = vector.broadcast %22 : vector<12x1xf32> to vector<12x5xf32>
    %24 = arith.mulf %23, %4 : vector<12x5xf32>
    %cst_14 = arith.constant dense<0.000000e+00> : vector<5xf32>
    %25 = vector.multi_reduction <add>, %24, %cst_14 [0] : vector<12x5xf32> to vector<5xf32>
    %26 = vector.shape_cast %25 : vector<5xf32> to vector<1x5xf32>
    %c0_15 = arith.constant 0 : index
    %c0_16 = arith.constant 0 : index
    %c0_17 = arith.constant 0 : index
    %27 = vector.load %arg4[%c0_15, %c0_16, %c0_17] : memref<1x8x5xf32, #tpu.memory_space<vmem>>, vector<1x1x5xf32>
    %28 = vector.shape_cast %27 : vector<1x1x5xf32> to vector<1x5xf32>
    %29 = vector.shape_cast %26 : vector<1x5xf32> to vector<1x1x5xf32>
    tpu.vector_store %arg4[%c0_15, %c0_16, %c0_17], %29 {strides = array<i32>} : memref<1x8x5xf32, #tpu.memory_space<vmem>>, vector<1x1x5xf32>,
    %c0_18 = arith.constant 0 : index
    %c1 = arith.constant 1 : index
    %c0_19 = arith.constant 0 : index
    %c0_20 = arith.constant 0 : index
    %30 = vector.load %arg1[%c0_18, %c1, %c0_19, %c0_20] : memref<1x8x12x5xf32, #tpu.memory_space<vmem>>, vector<1x1x12x5xf32>
    %31 = vector.shape_cast %30 : vector<1x1x12x5xf32> to vector<12x5xf32>
    %cst_21 = arith.constant dense<0.000000e+00> : vector<12x10xf32>
    %32 = tpu.matmul %31, %0, %cst_21 {dimension_numbers = #tpu.dot_dimension_numbers<[1], [0], [0], [1], [0, 0, 1, 1], [], []>} : vector<12x5xf32>, vector<5x10xf32>, vector<12x10xf32> -> vector<12x10xf32>
    %cst_22 = arith.constant dense<0.000000e+00> : vector<12x12xf32>
    %33 = tpu.matmul %32, %32, %cst_22 {dimension_numbers = #tpu.dot_dimension_numbers<[1], [1], [0], [0], [0, 0, 1, 0], [], []>} : vector<12x10xf32>, vector<12x10xf32>, vector<12x12xf32> -> vector<12x12xf32>
    %cst_23 = arith.constant dense<0.000000e+00> : vector<12xf32>
    %34 = vector.multi_reduction <add>, %33, %cst_23 [1] : vector<12x12xf32> to vector<12xf32>
    %35 = vector.shape_cast %34 : vector<12xf32> to vector<12x1xf32>
    %cst_24 = arith.constant 0.000000e+00 : f32
    %36 = vector.broadcast %cst_24 : f32 to vector<12x1xf32>
    %37 = arith.cmpf ogt, %2, %36 : vector<12x1xf32>
    %cst_25 = arith.constant -1.000000e+30 : f32
    %38 = vector.broadcast %cst_25 : f32 to vector<12x1xf32>
    %39 = arith.select %37, %35, %38 : vector<12x1xi1>, vector<12x1xf32>
    %cst_26 = arith.constant dense<0xFF800000> : vector<1xf32>
    %40 = vector.multi_reduction <maximumf>, %39, %cst_26 [0] : vector<12x1xf32> to vector<1xf32>
    %41 = vector.shape_cast %40 : vector<1xf32> to vector<1x1xf32>
    %42 = vector.broadcast %41 : vector<1x1xf32> to vector<12x1xf32>
    %43 = arith.subf %39, %42 : vector<12x1xf32>
    %44 = math.exp %43 : vector<12x1xf32>
    %45 = arith.mulf %44, %2 : vector<12x1xf32>
    %cst_27 = arith.constant dense<0.000000e+00> : vector<1xf32>
    %46 = vector.multi_reduction <add>, %45, %cst_27 [0] : vector<12x1xf32> to vector<1xf32>
    %47 = vector.shape_cast %46 : vector<1xf32> to vector<1x1xf32>
    %48 = vector.broadcast %47 : vector<1x1xf32> to vector<12x1xf32>
    %49 = arith.divf %45, %48 : vector<12x1xf32>
    %50 = vector.broadcast %49 : vector<12x1xf32> to vector<12x5xf32>
    %51 = arith.mulf %50, %31 : vector<12x5xf32>
    %cst_28 = arith.constant dense<0.000000e+00> : vector<5xf32>
    %52 = vector.multi_reduction <add>, %51, %cst_28 [0] : vector<12x5xf32> to vector<5xf32>
    %53 = vector.shape_cast %52 : vector<5xf32> to vector<1x5xf32>
    %c0_29 = arith.constant 0 : index
    %c1_30 = arith.constant 1 : index
    %c0_31 = arith.constant 0 : index
    %54 = vector.load %arg4[%c0_29, %c1_30, %c0_31] : memref<1x8x5xf32, #tpu.memory_space<vmem>>, vector<1x1x5xf32>
    %55 = vector.shape_cast %54 : vector<1x1x5xf32> to vector<1x5xf32>
    %56 = vector.shape_cast %53 : vector<1x5xf32> to vector<1x1x5xf32>
    tpu.vector_store %arg4[%c0_29, %c1_30, %c0_31], %56 {strides = array<i32>} : memref<1x8x5xf32, #tpu.memory_space<vmem>>, vector<1x1x5xf32>,
    %c0_32 = arith.constant 0 : index
    %c2 = arith.constant 2 : index
    %c0_33 = arith.constant 0 : index
    %c0_34 = arith.constant 0 : index
    %57 = vector.load %arg1[%c0_32, %c2, %c0_33, %c0_34] : memref<1x8x12x5xf32, #tpu.memory_space<vmem>>, vector<1x1x12x5xf32>
    %58 = vector.shape_cast %57 : vector<1x1x12x5xf32> to vector<12x5xf32>
    %cst_35 = arith.constant dense<0.000000e+00> : vector<12x10xf32>
    %59 = tpu.matmul %58, %0, %cst_35 {dimension_numbers = #tpu.dot_dimension_numbers<[1], [0], [0], [1], [0, 0, 1, 1], [], []>} : vector<12x5xf32>, vector<5x10xf32>, vector<12x10xf32> -> vector<12x10xf32>
    %cst_36 = arith.constant dense<0.000000e+00> : vector<12x12xf32>
    %60 = tpu.matmul %59, %59, %cst_36 {dimension_numbers = #tpu.dot_dimension_numbers<[1], [1], [0], [0], [0, 0, 1, 0], [], []>} : vector<12x10xf32>, vector<12x10xf32>, vector<12x12xf32> -> vector<12x12xf32>
    %cst_37 = arith.constant dense<0.000000e+00> : vector<12xf32>
    %61 = vector.multi_reduction <add>, %60, %cst_37 [1] : vector<12x12xf32> to vector<12xf32>
    %62 = vector.shape_cast %61 : vector<12xf32> to vector<12x1xf32>
    %cst_38 = arith.constant 0.000000e+00 : f32
    %63 = vector.broadcast %cst_38 : f32 to vector<12x1xf32>
    %64 = arith.cmpf ogt, %2, %63 : vector<12x1xf32>
    %cst_39 = arith.constant -1.000000e+30 : f32
    %65 = vector.broadcast %cst_39 : f32 to vector<12x1xf32>
    %66 = arith.select %64, %62, %65 : vector<12x1xi1>, vector<12x1xf32>
    %cst_40 = arith.constant dense<0xFF800000> : vector<1xf32>
    %67 = vector.multi_reduction <maximumf>, %66, %cst_40 [0] : vector<12x1xf32> to vector<1xf32>
    %68 = vector.shape_cast %67 : vector<1xf32> to vector<1x1xf32>
    %69 = vector.broadcast %68 : vector<1x1xf32> to vector<12x1xf32>
    %70 = arith.subf %66, %69 : vector<12x1xf32>
    %71 = math.exp %70 : vector<12x1xf32>
    %72 = arith.mulf %71, %2 : vector<12x1xf32>
    %cst_41 = arith.constant dense<0.000000e+00> : vector<1xf32>
    %73 = vector.multi_reduction <add>, %72, %cst_41 [0] : vector<12x1xf32> to vector<1xf32>
    %74 = vector.shape_cast %73 : vector<1xf32> to vector<1x1xf32>
    %75 = vector.broadcast %74 : vector<1x1xf32> to vector<12x1xf32>
    %76 = arith.divf %72, %75 : vector<12x1xf32>
    %77 = vector.broadcast %76 : vector<12x1xf32> to vector<12x5xf32>
    %78 = arith.mulf %77, %58 : vector<12x5xf32>
    %cst_42 = arith.constant dense<0.000000e+00> : vector<5xf32>
    %79 = vector.multi_reduction <add>, %78, %cst_42 [0] : vector<12x5xf32> to vector<5xf32>
    %80 = vector.shape_cast %79 : vector<5xf32> to vector<1x5xf32>
    %c0_43 = arith.constant 0 : index
    %c2_44 = arith.constant 2 : index
    %c0_45 = arith.constant 0 : index
    %81 = vector.load %arg4[%c0_43, %c2_44, %c0_45] : memref<1x8x5xf32, #tpu.memory_space<vmem>>, vector<1x1x5xf32>
    %82 = vector.shape_cast %81 : vector<1x1x5xf32> to vector<1x5xf32>
    %83 = vector.shape_cast %80 : vector<1x5xf32> to vector<1x1x5xf32>
    tpu.vector_store %arg4[%c0_43, %c2_44, %c0_45], %83 {strides = array<i32>} : memref<1x8x5xf32, #tpu.memory_space<vmem>>, vector<1x1x5xf32>,
    %c0_46 = arith.constant 0 : index
    %c3 = arith.constant 3 : index
    %c0_47 = arith.constant 0 : index
    %c0_48 = arith.constant 0 : index
    %84 = vector.load %arg1[%c0_46, %c3, %c0_47, %c0_48] : memref<1x8x12x5xf32, #tpu.memory_space<vmem>>, vector<1x1x12x5xf32>
    %85 = vector.shape_cast %84 : vector<1x1x12x5xf32> to vector<12x5xf32>
    %cst_49 = arith.constant dense<0.000000e+00> : vector<12x10xf32>
    %86 = tpu.matmul %85, %0, %cst_49 {dimension_numbers = #tpu.dot_dimension_numbers<[1], [0], [0], [1], [0, 0, 1, 1], [], []>} : vector<12x5xf32>, vector<5x10xf32>, vector<12x10xf32> -> vector<12x10xf32>
    %cst_50 = arith.constant dense<0.000000e+00> : vector<12x12xf32>
    %87 = tpu.matmul %86, %86, %cst_50 {dimension_numbers = #tpu.dot_dimension_numbers<[1], [1], [0], [0], [0, 0, 1, 0], [], []>} : vector<12x10xf32>, vector<12x10xf32>, vector<12x12xf32> -> vector<12x12xf32>
    %cst_51 = arith.constant dense<0.000000e+00> : vector<12xf32>
    %88 = vector.multi_reduction <add>, %87, %cst_51 [1] : vector<12x12xf32> to vector<12xf32>
    %89 = vector.shape_cast %88 : vector<12xf32> to vector<12x1xf32>
    %cst_52 = arith.constant 0.000000e+00 : f32
    %90 = vector.broadcast %cst_52 : f32 to vector<12x1xf32>
    %91 = arith.cmpf ogt, %2, %90 : vector<12x1xf32>
    %cst_53 = arith.constant -1.000000e+30 : f32
    %92 = vector.broadcast %cst_53 : f32 to vector<12x1xf32>
    %93 = arith.select %91, %89, %92 : vector<12x1xi1>, vector<12x1xf32>
    %cst_54 = arith.constant dense<0xFF800000> : vector<1xf32>
    %94 = vector.multi_reduction <maximumf>, %93, %cst_54 [0] : vector<12x1xf32> to vector<1xf32>
    %95 = vector.shape_cast %94 : vector<1xf32> to vector<1x1xf32>
    %96 = vector.broadcast %95 : vector<1x1xf32> to vector<12x1xf32>
    %97 = arith.subf %93, %96 : vector<12x1xf32>
    %98 = math.exp %97 : vector<12x1xf32>
    %99 = arith.mulf %98, %2 : vector<12x1xf32>
    %cst_55 = arith.constant dense<0.000000e+00> : vector<1xf32>
    %100 = vector.multi_reduction <add>, %99, %cst_55 [0] : vector<12x1xf32> to vector<1xf32>
    %101 = vector.shape_cast %100 : vector<1xf32> to vector<1x1xf32>
    %102 = vector.broadcast %101 : vector<1x1xf32> to vector<12x1xf32>
    %103 = arith.divf %99, %102 : vector<12x1xf32>
    %104 = vector.broadcast %103 : vector<12x1xf32> to vector<12x5xf32>
    %105 = arith.mulf %104, %85 : vector<12x5xf32>
    %cst_56 = arith.constant dense<0.000000e+00> : vector<5xf32>
    %106 = vector.multi_reduction <add>, %105, %cst_56 [0] : vector<12x5xf32> to vector<5xf32>
    %107 = vector.shape_cast %106 : vector<5xf32> to vector<1x5xf32>
    %c0_57 = arith.constant 0 : index
    %c3_58 = arith.constant 3 : index
    %c0_59 = arith.constant 0 : index
    %108 = vector.load %arg4[%c0_57, %c3_58, %c0_59] : memref<1x8x5xf32, #tpu.memory_space<vmem>>, vector<1x1x5xf32>
    %109 = vector.shape_cast %108 : vector<1x1x5xf32> to vector<1x5xf32>
    %110 = vector.shape_cast %107 : vector<1x5xf32> to vector<1x1x5xf32>
    tpu.vector_store %arg4[%c0_57, %c3_58, %c0_59], %110 {strides = array<i32>} : memref<1x8x5xf32, #tpu.memory_space<vmem>>, vector<1x1x5xf32>,
    %c0_60 = arith.constant 0 : index
    %c4 = arith.constant 4 : index
    %c0_61 = arith.constant 0 : index
    %c0_62 = arith.constant 0 : index
    %111 = vector.load %arg1[%c0_60, %c4, %c0_61, %c0_62] : memref<1x8x12x5xf32, #tpu.memory_space<vmem>>, vector<1x1x12x5xf32>
    %112 = vector.shape_cast %111 : vector<1x1x12x5xf32> to vector<12x5xf32>
    %cst_63 = arith.constant dense<0.000000e+00> : vector<12x10xf32>
    %113 = tpu.matmul %112, %0, %cst_63 {dimension_numbers = #tpu.dot_dimension_numbers<[1], [0], [0], [1], [0, 0, 1, 1], [], []>} : vector<12x5xf32>, vector<5x10xf32>, vector<12x10xf32> -> vector<12x10xf32>
    %cst_64 = arith.constant dense<0.000000e+00> : vector<12x12xf32>
    %114 = tpu.matmul %113, %113, %cst_64 {dimension_numbers = #tpu.dot_dimension_numbers<[1], [1], [0], [0], [0, 0, 1, 0], [], []>} : vector<12x10xf32>, vector<12x10xf32>, vector<12x12xf32> -> vector<12x12xf32>
    %cst_65 = arith.constant dense<0.000000e+00> : vector<12xf32>
    %115 = vector.multi_reduction <add>, %114, %cst_65 [1] : vector<12x12xf32> to vector<12xf32>
    %116 = vector.shape_cast %115 : vector<12xf32> to vector<12x1xf32>
    %cst_66 = arith.constant 0.000000e+00 : f32
    %117 = vector.broadcast %cst_66 : f32 to vector<12x1xf32>
    %118 = arith.cmpf ogt, %2, %117 : vector<12x1xf32>
    %cst_67 = arith.constant -1.000000e+30 : f32
    %119 = vector.broadcast %cst_67 : f32 to vector<12x1xf32>
    %120 = arith.select %118, %116, %119 : vector<12x1xi1>, vector<12x1xf32>
    %cst_68 = arith.constant dense<0xFF800000> : vector<1xf32>
    %121 = vector.multi_reduction <maximumf>, %120, %cst_68 [0] : vector<12x1xf32> to vector<1xf32>
    %122 = vector.shape_cast %121 : vector<1xf32> to vector<1x1xf32>
    %123 = vector.broadcast %122 : vector<1x1xf32> to vector<12x1xf32>
    %124 = arith.subf %120, %123 : vector<12x1xf32>
    %125 = math.exp %124 : vector<12x1xf32>
    %126 = arith.mulf %125, %2 : vector<12x1xf32>
    %cst_69 = arith.constant dense<0.000000e+00> : vector<1xf32>
    %127 = vector.multi_reduction <add>, %126, %cst_69 [0] : vector<12x1xf32> to vector<1xf32>
    %128 = vector.shape_cast %127 : vector<1xf32> to vector<1x1xf32>
    %129 = vector.broadcast %128 : vector<1x1xf32> to vector<12x1xf32>
    %130 = arith.divf %126, %129 : vector<12x1xf32>
    %131 = vector.broadcast %130 : vector<12x1xf32> to vector<12x5xf32>
    %132 = arith.mulf %131, %112 : vector<12x5xf32>
    %cst_70 = arith.constant dense<0.000000e+00> : vector<5xf32>
    %133 = vector.multi_reduction <add>, %132, %cst_70 [0] : vector<12x5xf32> to vector<5xf32>
    %134 = vector.shape_cast %133 : vector<5xf32> to vector<1x5xf32>
    %c0_71 = arith.constant 0 : index
    %c4_72 = arith.constant 4 : index
    %c0_73 = arith.constant 0 : index
    %135 = vector.load %arg4[%c0_71, %c4_72, %c0_73] : memref<1x8x5xf32, #tpu.memory_space<vmem>>, vector<1x1x5xf32>
    %136 = vector.shape_cast %135 : vector<1x1x5xf32> to vector<1x5xf32>
    %137 = vector.shape_cast %134 : vector<1x5xf32> to vector<1x1x5xf32>
    tpu.vector_store %arg4[%c0_71, %c4_72, %c0_73], %137 {strides = array<i32>} : memref<1x8x5xf32, #tpu.memory_space<vmem>>, vector<1x1x5xf32>,
    %c0_74 = arith.constant 0 : index
    %c5 = arith.constant 5 : index
    %c0_75 = arith.constant 0 : index
    %c0_76 = arith.constant 0 : index
    %138 = vector.load %arg1[%c0_74, %c5, %c0_75, %c0_76] : memref<1x8x12x5xf32, #tpu.memory_space<vmem>>, vector<1x1x12x5xf32>
    %139 = vector.shape_cast %138 : vector<1x1x12x5xf32> to vector<12x5xf32>
    %cst_77 = arith.constant dense<0.000000e+00> : vector<12x10xf32>
    %140 = tpu.matmul %139, %0, %cst_77 {dimension_numbers = #tpu.dot_dimension_numbers<[1], [0], [0], [1], [0, 0, 1, 1], [], []>} : vector<12x5xf32>, vector<5x10xf32>, vector<12x10xf32> -> vector<12x10xf32>
    %cst_78 = arith.constant dense<0.000000e+00> : vector<12x12xf32>
    %141 = tpu.matmul %140, %140, %cst_78 {dimension_numbers = #tpu.dot_dimension_numbers<[1], [1], [0], [0], [0, 0, 1, 0], [], []>} : vector<12x10xf32>, vector<12x10xf32>, vector<12x12xf32> -> vector<12x12xf32>
    %cst_79 = arith.constant dense<0.000000e+00> : vector<12xf32>
    %142 = vector.multi_reduction <add>, %141, %cst_79 [1] : vector<12x12xf32> to vector<12xf32>
    %143 = vector.shape_cast %142 : vector<12xf32> to vector<12x1xf32>
    %cst_80 = arith.constant 0.000000e+00 : f32
    %144 = vector.broadcast %cst_80 : f32 to vector<12x1xf32>
    %145 = arith.cmpf ogt, %2, %144 : vector<12x1xf32>
    %cst_81 = arith.constant -1.000000e+30 : f32
    %146 = vector.broadcast %cst_81 : f32 to vector<12x1xf32>
    %147 = arith.select %145, %143, %146 : vector<12x1xi1>, vector<12x1xf32>
    %cst_82 = arith.constant dense<0xFF800000> : vector<1xf32>
    %148 = vector.multi_reduction <maximumf>, %147, %cst_82 [0] : vector<12x1xf32> to vector<1xf32>
    %149 = vector.shape_cast %148 : vector<1xf32> to vector<1x1xf32>
    %150 = vector.broadcast %149 : vector<1x1xf32> to vector<12x1xf32>
    %151 = arith.subf %147, %150 : vector<12x1xf32>
    %152 = math.exp %151 : vector<12x1xf32>
    %153 = arith.mulf %152, %2 : vector<12x1xf32>
    %cst_83 = arith.constant dense<0.000000e+00> : vector<1xf32>
    %154 = vector.multi_reduction <add>, %153, %cst_83 [0] : vector<12x1xf32> to vector<1xf32>
    %155 = vector.shape_cast %154 : vector<1xf32> to vector<1x1xf32>
    %156 = vector.broadcast %155 : vector<1x1xf32> to vector<12x1xf32>
    %157 = arith.divf %153, %156 : vector<12x1xf32>
    %158 = vector.broadcast %157 : vector<12x1xf32> to vector<12x5xf32>
    %159 = arith.mulf %158, %139 : vector<12x5xf32>
    %cst_84 = arith.constant dense<0.000000e+00> : vector<5xf32>
    %160 = vector.multi_reduction <add>, %159, %cst_84 [0] : vector<12x5xf32> to vector<5xf32>
    %161 = vector.shape_cast %160 : vector<5xf32> to vector<1x5xf32>
    %c0_85 = arith.constant 0 : index
    %c5_86 = arith.constant 5 : index
    %c0_87 = arith.constant 0 : index
    %162 = vector.load %arg4[%c0_85, %c5_86, %c0_87] : memref<1x8x5xf32, #tpu.memory_space<vmem>>, vector<1x1x5xf32>
    %163 = vector.shape_cast %162 : vector<1x1x5xf32> to vector<1x5xf32>
    %164 = vector.shape_cast %161 : vector<1x5xf32> to vector<1x1x5xf32>
    tpu.vector_store %arg4[%c0_85, %c5_86, %c0_87], %164 {strides = array<i32>} : memref<1x8x5xf32, #tpu.memory_space<vmem>>, vector<1x1x5xf32>,
    %c0_88 = arith.constant 0 : index
    %c6 = arith.constant 6 : index
    %c0_89 = arith.constant 0 : index
    %c0_90 = arith.constant 0 : index
    %165 = vector.load %arg1[%c0_88, %c6, %c0_89, %c0_90] : memref<1x8x12x5xf32, #tpu.memory_space<vmem>>, vector<1x1x12x5xf32>
    %166 = vector.shape_cast %165 : vector<1x1x12x5xf32> to vector<12x5xf32>
    %cst_91 = arith.constant dense<0.000000e+00> : vector<12x10xf32>
    %167 = tpu.matmul %166, %0, %cst_91 {dimension_numbers = #tpu.dot_dimension_numbers<[1], [0], [0], [1], [0, 0, 1, 1], [], []>} : vector<12x5xf32>, vector<5x10xf32>, vector<12x10xf32> -> vector<12x10xf32>
    %cst_92 = arith.constant dense<0.000000e+00> : vector<12x12xf32>
    %168 = tpu.matmul %167, %167, %cst_92 {dimension_numbers = #tpu.dot_dimension_numbers<[1], [1], [0], [0], [0, 0, 1, 0], [], []>} : vector<12x10xf32>, vector<12x10xf32>, vector<12x12xf32> -> vector<12x12xf32>
    %cst_93 = arith.constant dense<0.000000e+00> : vector<12xf32>
    %169 = vector.multi_reduction <add>, %168, %cst_93 [1] : vector<12x12xf32> to vector<12xf32>
    %170 = vector.shape_cast %169 : vector<12xf32> to vector<12x1xf32>
    %cst_94 = arith.constant 0.000000e+00 : f32
    %171 = vector.broadcast %cst_94 : f32 to vector<12x1xf32>
    %172 = arith.cmpf ogt, %2, %171 : vector<12x1xf32>
    %cst_95 = arith.constant -1.000000e+30 : f32
    %173 = vector.broadcast %cst_95 : f32 to vector<12x1xf32>
    %174 = arith.select %172, %170, %173 : vector<12x1xi1>, vector<12x1xf32>
    %cst_96 = arith.constant dense<0xFF800000> : vector<1xf32>
    %175 = vector.multi_reduction <maximumf>, %174, %cst_96 [0] : vector<12x1xf32> to vector<1xf32>
    %176 = vector.shape_cast %175 : vector<1xf32> to vector<1x1xf32>
    %177 = vector.broadcast %176 : vector<1x1xf32> to vector<12x1xf32>
    %178 = arith.subf %174, %177 : vector<12x1xf32>
    %179 = math.exp %178 : vector<12x1xf32>
    %180 = arith.mulf %179, %2 : vector<12x1xf32>
    %cst_97 = arith.constant dense<0.000000e+00> : vector<1xf32>
    %181 = vector.multi_reduction <add>, %180, %cst_97 [0] : vector<12x1xf32> to vector<1xf32>
    %182 = vector.shape_cast %181 : vector<1xf32> to vector<1x1xf32>
    %183 = vector.broadcast %182 : vector<1x1xf32> to vector<12x1xf32>
    %184 = arith.divf %180, %183 : vector<12x1xf32>
    %185 = vector.broadcast %184 : vector<12x1xf32> to vector<12x5xf32>
    %186 = arith.mulf %185, %166 : vector<12x5xf32>
    %cst_98 = arith.constant dense<0.000000e+00> : vector<5xf32>
    %187 = vector.multi_reduction <add>, %186, %cst_98 [0] : vector<12x5xf32> to vector<5xf32>
    %188 = vector.shape_cast %187 : vector<5xf32> to vector<1x5xf32>
    %c0_99 = arith.constant 0 : index
    %c6_100 = arith.constant 6 : index
    %c0_101 = arith.constant 0 : index
    %189 = vector.load %arg4[%c0_99, %c6_100, %c0_101] : memref<1x8x5xf32, #tpu.memory_space<vmem>>, vector<1x1x5xf32>
    %190 = vector.shape_cast %189 : vector<1x1x5xf32> to vector<1x5xf32>
    %191 = vector.shape_cast %188 : vector<1x5xf32> to vector<1x1x5xf32>
    tpu.vector_store %arg4[%c0_99, %c6_100, %c0_101], %191 {strides = array<i32>} : memref<1x8x5xf32, #tpu.memory_space<vmem>>, vector<1x1x5xf32>,
    %c0_102 = arith.constant 0 : index
    %c7 = arith.constant 7 : index
    %c0_103 = arith.constant 0 : index
    %c0_104 = arith.constant 0 : index
    %192 = vector.load %arg1[%c0_102, %c7, %c0_103, %c0_104] : memref<1x8x12x5xf32, #tpu.memory_space<vmem>>, vector<1x1x12x5xf32>
    %193 = vector.shape_cast %192 : vector<1x1x12x5xf32> to vector<12x5xf32>
    %cst_105 = arith.constant dense<0.000000e+00> : vector<12x10xf32>
    %194 = tpu.matmul %193, %0, %cst_105 {dimension_numbers = #tpu.dot_dimension_numbers<[1], [0], [0], [1], [0, 0, 1, 1], [], []>} : vector<12x5xf32>, vector<5x10xf32>, vector<12x10xf32> -> vector<12x10xf32>
    %cst_106 = arith.constant dense<0.000000e+00> : vector<12x12xf32>
    %195 = tpu.matmul %194, %194, %cst_106 {dimension_numbers = #tpu.dot_dimension_numbers<[1], [1], [0], [0], [0, 0, 1, 0], [], []>} : vector<12x10xf32>, vector<12x10xf32>, vector<12x12xf32> -> vector<12x12xf32>
    %cst_107 = arith.constant dense<0.000000e+00> : vector<12xf32>
    %196 = vector.multi_reduction <add>, %195, %cst_107 [1] : vector<12x12xf32> to vector<12xf32>
    %197 = vector.shape_cast %196 : vector<12xf32> to vector<12x1xf32>
    %cst_108 = arith.constant 0.000000e+00 : f32
    %198 = vector.broadcast %cst_108 : f32 to vector<12x1xf32>
    %199 = arith.cmpf ogt, %2, %198 : vector<12x1xf32>
    %cst_109 = arith.constant -1.000000e+30 : f32
    %200 = vector.broadcast %cst_109 : f32 to vector<12x1xf32>
    %201 = arith.select %199, %197, %200 : vector<12x1xi1>, vector<12x1xf32>
    %cst_110 = arith.constant dense<0xFF800000> : vector<1xf32>
    %202 = vector.multi_reduction <maximumf>, %201, %cst_110 [0] : vector<12x1xf32> to vector<1xf32>
    %203 = vector.shape_cast %202 : vector<1xf32> to vector<1x1xf32>
    %204 = vector.broadcast %203 : vector<1x1xf32> to vector<12x1xf32>
    %205 = arith.subf %201, %204 : vector<12x1xf32>
    %206 = math.exp %205 : vector<12x1xf32>
    %207 = arith.mulf %206, %2 : vector<12x1xf32>
    %cst_111 = arith.constant dense<0.000000e+00> : vector<1xf32>
    %208 = vector.multi_reduction <add>, %207, %cst_111 [0] : vector<12x1xf32> to vector<1xf32>
    %209 = vector.shape_cast %208 : vector<1xf32> to vector<1x1xf32>
    %210 = vector.broadcast %209 : vector<1x1xf32> to vector<12x1xf32>
    %211 = arith.divf %207, %210 : vector<12x1xf32>
    %212 = vector.broadcast %211 : vector<12x1xf32> to vector<12x5xf32>
    %213 = arith.mulf %212, %193 : vector<12x5xf32>
    %cst_112 = arith.constant dense<0.000000e+00> : vector<5xf32>
    %214 = vector.multi_reduction <add>, %213, %cst_112 [0] : vector<12x5xf32> to vector<5xf32>
    %215 = vector.shape_cast %214 : vector<5xf32> to vector<1x5xf32>
    %c0_113 = arith.constant 0 : index
    %c7_114 = arith.constant 7 : index
    %c0_115 = arith.constant 0 : index
    %216 = vector.load %arg4[%c0_113, %c7_114, %c0_115] : memref<1x8x5xf32, #tpu.memory_space<vmem>>, vector<1x1x5xf32>
    %217 = vector.shape_cast %216 : vector<1x1x5xf32> to vector<1x5xf32>
    %218 = vector.shape_cast %215 : vector<1x5xf32> to vector<1x1x5xf32>
    tpu.vector_store %arg4[%c0_113, %c7_114, %c0_115], %218 {strides = array<i32>} : memref<1x8x5xf32, #tpu.memory_space<vmem>>, vector<1x1x5xf32>,
    return
  }
  func.func @transform_0(%arg0: i32) -> (i32, i32, i32, i32) {
    %c0_i32 = arith.constant 0 : i32
    %c0_i32_0 = arith.constant 0 : i32
    %c0_i32_1 = arith.constant 0 : i32
    %c0_i32_2 = arith.constant 0 : i32
    return %arg0, %c0_i32, %c0_i32_0, %c0_i32_1 : i32, i32, i32, i32
  }
  func.func @transform_1(%arg0: i32) -> (i32, i32, i32) {
    %c0_i32 = arith.constant 0 : i32
    %c0_i32_0 = arith.constant 0 : i32
    %c0_i32_1 = arith.constant 0 : i32
    return %arg0, %c0_i32, %c0_i32_0 : i32, i32, i32
  }
  func.func @transform_2(%arg0: i32) -> (i32, i32) {
    %c0_i32 = arith.constant 0 : i32
    %c0_i32_0 = arith.constant 0 : i32
    %c0_i32_1 = arith.constant 0 : i32
    return %c0_i32, %c0_i32_0 : i32, i32
  }
  func.func @transform_3(%arg0: i32) -> (i32, i32, i32) {
    %c0_i32 = arith.constant 0 : i32
    %c0_i32_0 = arith.constant 0 : i32
    %c0_i32_1 = arith.constant 0 : i32
    return %arg0, %c0_i32, %c0_i32_0 : i32, i32, i32
  }
}

module attributes {stable_mosaic.version = 11 : i64} {
  func.func @_channel_att_kernel(%arg0: i32, %arg1: memref<1x62x5xf32, #tpu.memory_space<vmem>>, %arg2: memref<5x32xf32, #tpu.memory_space<vmem>>, %arg3: memref<32x5xf32, #tpu.memory_space<vmem>>, %arg4: memref<1x62x5xf32, #tpu.memory_space<vmem>>, %arg5: memref<1x1x5xf32, #tpu.memory_space<vmem>>) attributes {dimension_semantics = [#tpu.dimension_semantics<parallel>], iteration_bounds = array<i64: 8>, scalar_prefetch = 0 : i64, scratch_operands = 0 : i64, tpu.core_type = #tpu.core_type<tc>, window_params = [{transform_indices = @transform_0, window_bounds = array<i64: 1, 62, 5>}, {pipeline_mode = #tpu.pipeline_mode<synchronous>, transform_indices = @transform_1, window_bounds = array<i64: 5, 32>}, {pipeline_mode = #tpu.pipeline_mode<synchronous>, transform_indices = @transform_2, window_bounds = array<i64: 32, 5>}, {transform_indices = @transform_3, window_bounds = array<i64: 1, 62, 5>}, {transform_indices = @transform_4, window_bounds = array<i64: 1, 1, 5>}]} {
    %c0 = arith.constant 0 : index
    %c0_0 = arith.constant 0 : index
    %c0_1 = arith.constant 0 : index
    %0 = vector.load %arg1[%c0, %c0_0, %c0_1] : memref<1x62x5xf32, #tpu.memory_space<vmem>>, vector<1x62x5xf32>
    %1 = vector.shape_cast %0 : vector<1x62x5xf32> to vector<62x5xf32>
    %cst = arith.constant dense<0.000000e+00> : vector<5xf32>
    %2 = vector.multi_reduction <add>, %1, %cst [0] : vector<62x5xf32> to vector<5xf32>
    %3 = vector.shape_cast %2 : vector<5xf32> to vector<1x5xf32>
    %cst_2 = arith.constant 0.0161290318 : f32
    %4 = vector.broadcast %cst_2 : f32 to vector<1x5xf32>
    %5 = arith.mulf %3, %4 : vector<1x5xf32>
    %cst_3 = arith.constant dense<0xFF800000> : vector<5xf32>
    %6 = vector.multi_reduction <maximumf>, %1, %cst_3 [0] : vector<62x5xf32> to vector<5xf32>
    %7 = vector.shape_cast %6 : vector<5xf32> to vector<1x5xf32>
    %8 = tpu.concatenate %5, %7 in 0 : vector<1x5xf32>, vector<1x5xf32> -> vector<2x5xf32>
    %c0_4 = arith.constant 0 : index
    %c0_5 = arith.constant 0 : index
    %9 = vector.load %arg2[%c0_4, %c0_5] : memref<5x32xf32, #tpu.memory_space<vmem>>, vector<5x32xf32>
    %cst_6 = arith.constant dense<0.000000e+00> : vector<2x32xf32>
    %10 = tpu.matmul %8, %9, %cst_6 {dimension_numbers = #tpu.dot_dimension_numbers<[1], [0], [0], [1], [0, 0, 1, 1], [], []>} : vector<2x5xf32>, vector<5x32xf32>, vector<2x32xf32> -> vector<2x32xf32>
    %cst_7 = arith.constant 0.000000e+00 : f32
    %11 = vector.broadcast %cst_7 : f32 to vector<2x32xf32>
    %12 = arith.maximumf %10, %11 : vector<2x32xf32>
    %c0_8 = arith.constant 0 : index
    %c0_9 = arith.constant 0 : index
    %13 = vector.load %arg3[%c0_8, %c0_9] : memref<32x5xf32, #tpu.memory_space<vmem>>, vector<32x5xf32>
    %cst_10 = arith.constant dense<0.000000e+00> : vector<2x5xf32>
    %14 = tpu.matmul %12, %13, %cst_10 {dimension_numbers = #tpu.dot_dimension_numbers<[1], [0], [0], [1], [0, 0, 1, 1], [], []>} : vector<2x32xf32>, vector<32x5xf32>, vector<2x5xf32> -> vector<2x5xf32>
    %15 = vector.extract_strided_slice %14 {offsets = [0, 0], sizes = [1, 5], strides = [1, 1]} : vector<2x5xf32> to vector<1x5xf32>
    %16 = vector.extract_strided_slice %14 {offsets = [1, 0], sizes = [1, 5], strides = [1, 1]} : vector<2x5xf32> to vector<1x5xf32>
    %17 = arith.addf %15, %16 : vector<1x5xf32>
    %cst_11 = arith.constant 0.000000e+00 : f32
    %18 = vector.broadcast %cst_11 : f32 to vector<1x5xf32>
    %19 = arith.subf %18, %17 : vector<1x5xf32>
    %20 = math.exp %19 : vector<1x5xf32>
    %cst_12 = arith.constant 1.000000e+00 : f32
    %21 = vector.broadcast %cst_12 : f32 to vector<1x5xf32>
    %22 = arith.addf %21, %20 : vector<1x5xf32>
    %cst_13 = arith.constant 1.000000e+00 : f32
    %23 = vector.broadcast %cst_13 : f32 to vector<1x5xf32>
    %24 = arith.divf %23, %22 : vector<1x5xf32>
    %cst_14 = arith.constant 1.000000e+00 : f32
    %25 = vector.broadcast %cst_14 : f32 to vector<1x5xf32>
    %26 = arith.addf %25, %24 : vector<1x5xf32>
    %27 = vector.broadcast %26 : vector<1x5xf32> to vector<62x5xf32>
    %28 = arith.mulf %1, %27 : vector<62x5xf32>
    %c0_15 = arith.constant 0 : index
    %c0_16 = arith.constant 0 : index
    %c0_17 = arith.constant 0 : index
    %29 = vector.load %arg4[%c0_15, %c0_16, %c0_17] : memref<1x62x5xf32, #tpu.memory_space<vmem>>, vector<1x62x5xf32>
    %30 = vector.shape_cast %29 : vector<1x62x5xf32> to vector<62x5xf32>
    %31 = vector.shape_cast %28 : vector<62x5xf32> to vector<1x62x5xf32>
    tpu.vector_store %arg4[%c0_15, %c0_16, %c0_17], %31 {strides = array<i32>} : memref<1x62x5xf32, #tpu.memory_space<vmem>>, vector<1x62x5xf32>,
    %c0_18 = arith.constant 0 : index
    %c0_19 = arith.constant 0 : index
    %c0_20 = arith.constant 0 : index
    %32 = vector.load %arg5[%c0_18, %c0_19, %c0_20] : memref<1x1x5xf32, #tpu.memory_space<vmem>>, vector<1x1x5xf32>
    %33 = vector.shape_cast %32 : vector<1x1x5xf32> to vector<1x5xf32>
    %34 = vector.shape_cast %24 : vector<1x5xf32> to vector<1x1x5xf32>
    tpu.vector_store %arg5[%c0_18, %c0_19, %c0_20], %34 {strides = array<i32>} : memref<1x1x5xf32, #tpu.memory_space<vmem>>, vector<1x1x5xf32>,
    return
  }
  func.func @transform_0(%arg0: i32) -> (i32, i32, i32) {
    %c0_i32 = arith.constant 0 : i32
    %c0_i32_0 = arith.constant 0 : i32
    %c0_i32_1 = arith.constant 0 : i32
    return %arg0, %c0_i32, %c0_i32_0 : i32, i32, i32
  }
  func.func @transform_1(%arg0: i32) -> (i32, i32) {
    %c0_i32 = arith.constant 0 : i32
    %c0_i32_0 = arith.constant 0 : i32
    %c0_i32_1 = arith.constant 0 : i32
    return %c0_i32, %c0_i32_0 : i32, i32
  }
  func.func @transform_2(%arg0: i32) -> (i32, i32) {
    %c0_i32 = arith.constant 0 : i32
    %c0_i32_0 = arith.constant 0 : i32
    %c0_i32_1 = arith.constant 0 : i32
    return %c0_i32, %c0_i32_0 : i32, i32
  }
  func.func @transform_3(%arg0: i32) -> (i32, i32, i32) {
    %c0_i32 = arith.constant 0 : i32
    %c0_i32_0 = arith.constant 0 : i32
    %c0_i32_1 = arith.constant 0 : i32
    return %arg0, %c0_i32, %c0_i32_0 : i32, i32, i32
  }
  func.func @transform_4(%arg0: i32) -> (i32, i32, i32) {
    %c0_i32 = arith.constant 0 : i32
    %c0_i32_0 = arith.constant 0 : i32
    %c0_i32_1 = arith.constant 0 : i32
    return %arg0, %c0_i32, %c0_i32_0 : i32, i32, i32
  }
}

module attributes {stable_mosaic.version = 11 : i64} {
  func.func @_channel_att_kernel(%arg0: i32, %arg1: memref<1x5x62xf32, #tpu.memory_space<vmem>>, %arg2: memref<62x32xf32, #tpu.memory_space<vmem>>, %arg3: memref<32x62xf32, #tpu.memory_space<vmem>>, %arg4: memref<1x5x62xf32, #tpu.memory_space<vmem>>, %arg5: memref<1x1x62xf32, #tpu.memory_space<vmem>>) attributes {dimension_semantics = [#tpu.dimension_semantics<parallel>], iteration_bounds = array<i64: 8>, scalar_prefetch = 0 : i64, scratch_operands = 0 : i64, tpu.core_type = #tpu.core_type<tc>, window_params = [{transform_indices = @transform_0, window_bounds = array<i64: 1, 5, 62>}, {pipeline_mode = #tpu.pipeline_mode<synchronous>, transform_indices = @transform_1, window_bounds = array<i64: 62, 32>}, {pipeline_mode = #tpu.pipeline_mode<synchronous>, transform_indices = @transform_2, window_bounds = array<i64: 32, 62>}, {transform_indices = @transform_3, window_bounds = array<i64: 1, 5, 62>}, {transform_indices = @transform_4, window_bounds = array<i64: 1, 1, 62>}]} {
    %c0 = arith.constant 0 : index
    %c0_0 = arith.constant 0 : index
    %c0_1 = arith.constant 0 : index
    %0 = vector.load %arg1[%c0, %c0_0, %c0_1] : memref<1x5x62xf32, #tpu.memory_space<vmem>>, vector<1x5x62xf32>
    %1 = vector.shape_cast %0 : vector<1x5x62xf32> to vector<5x62xf32>
    %cst = arith.constant dense<0.000000e+00> : vector<62xf32>
    %2 = vector.multi_reduction <add>, %1, %cst [0] : vector<5x62xf32> to vector<62xf32>
    %3 = vector.shape_cast %2 : vector<62xf32> to vector<1x62xf32>
    %cst_2 = arith.constant 2.000000e-01 : f32
    %4 = vector.broadcast %cst_2 : f32 to vector<1x62xf32>
    %5 = arith.mulf %3, %4 : vector<1x62xf32>
    %cst_3 = arith.constant dense<0xFF800000> : vector<62xf32>
    %6 = vector.multi_reduction <maximumf>, %1, %cst_3 [0] : vector<5x62xf32> to vector<62xf32>
    %7 = vector.shape_cast %6 : vector<62xf32> to vector<1x62xf32>
    %8 = tpu.concatenate %5, %7 in 0 : vector<1x62xf32>, vector<1x62xf32> -> vector<2x62xf32>
    %c0_4 = arith.constant 0 : index
    %c0_5 = arith.constant 0 : index
    %9 = vector.load %arg2[%c0_4, %c0_5] : memref<62x32xf32, #tpu.memory_space<vmem>>, vector<62x32xf32>
    %cst_6 = arith.constant dense<0.000000e+00> : vector<2x32xf32>
    %10 = tpu.matmul %8, %9, %cst_6 {dimension_numbers = #tpu.dot_dimension_numbers<[1], [0], [0], [1], [0, 0, 1, 1], [], []>} : vector<2x62xf32>, vector<62x32xf32>, vector<2x32xf32> -> vector<2x32xf32>
    %cst_7 = arith.constant 0.000000e+00 : f32
    %11 = vector.broadcast %cst_7 : f32 to vector<2x32xf32>
    %12 = arith.maximumf %10, %11 : vector<2x32xf32>
    %c0_8 = arith.constant 0 : index
    %c0_9 = arith.constant 0 : index
    %13 = vector.load %arg3[%c0_8, %c0_9] : memref<32x62xf32, #tpu.memory_space<vmem>>, vector<32x62xf32>
    %cst_10 = arith.constant dense<0.000000e+00> : vector<2x62xf32>
    %14 = tpu.matmul %12, %13, %cst_10 {dimension_numbers = #tpu.dot_dimension_numbers<[1], [0], [0], [1], [0, 0, 1, 1], [], []>} : vector<2x32xf32>, vector<32x62xf32>, vector<2x62xf32> -> vector<2x62xf32>
    %15 = vector.extract_strided_slice %14 {offsets = [0, 0], sizes = [1, 62], strides = [1, 1]} : vector<2x62xf32> to vector<1x62xf32>
    %16 = vector.extract_strided_slice %14 {offsets = [1, 0], sizes = [1, 62], strides = [1, 1]} : vector<2x62xf32> to vector<1x62xf32>
    %17 = arith.addf %15, %16 : vector<1x62xf32>
    %cst_11 = arith.constant 0.000000e+00 : f32
    %18 = vector.broadcast %cst_11 : f32 to vector<1x62xf32>
    %19 = arith.subf %18, %17 : vector<1x62xf32>
    %20 = math.exp %19 : vector<1x62xf32>
    %cst_12 = arith.constant 1.000000e+00 : f32
    %21 = vector.broadcast %cst_12 : f32 to vector<1x62xf32>
    %22 = arith.addf %21, %20 : vector<1x62xf32>
    %cst_13 = arith.constant 1.000000e+00 : f32
    %23 = vector.broadcast %cst_13 : f32 to vector<1x62xf32>
    %24 = arith.divf %23, %22 : vector<1x62xf32>
    %cst_14 = arith.constant 1.000000e+00 : f32
    %25 = vector.broadcast %cst_14 : f32 to vector<1x62xf32>
    %26 = arith.addf %25, %24 : vector<1x62xf32>
    %27 = vector.broadcast %26 : vector<1x62xf32> to vector<5x62xf32>
    %28 = arith.mulf %1, %27 : vector<5x62xf32>
    %c0_15 = arith.constant 0 : index
    %c0_16 = arith.constant 0 : index
    %c0_17 = arith.constant 0 : index
    %29 = vector.load %arg4[%c0_15, %c0_16, %c0_17] : memref<1x5x62xf32, #tpu.memory_space<vmem>>, vector<1x5x62xf32>
    %30 = vector.shape_cast %29 : vector<1x5x62xf32> to vector<5x62xf32>
    %31 = vector.shape_cast %28 : vector<5x62xf32> to vector<1x5x62xf32>
    tpu.vector_store %arg4[%c0_15, %c0_16, %c0_17], %31 {strides = array<i32>} : memref<1x5x62xf32, #tpu.memory_space<vmem>>, vector<1x5x62xf32>,
    %c0_18 = arith.constant 0 : index
    %c0_19 = arith.constant 0 : index
    %c0_20 = arith.constant 0 : index
    %32 = vector.load %arg5[%c0_18, %c0_19, %c0_20] : memref<1x1x62xf32, #tpu.memory_space<vmem>>, vector<1x1x62xf32>
    %33 = vector.shape_cast %32 : vector<1x1x62xf32> to vector<1x62xf32>
    %34 = vector.shape_cast %24 : vector<1x62xf32> to vector<1x1x62xf32>
    tpu.vector_store %arg5[%c0_18, %c0_19, %c0_20], %34 {strides = array<i32>} : memref<1x1x62xf32, #tpu.memory_space<vmem>>, vector<1x1x62xf32>,
    return
  }
  func.func @transform_0(%arg0: i32) -> (i32, i32, i32) {
    %c0_i32 = arith.constant 0 : i32
    %c0_i32_0 = arith.constant 0 : i32
    %c0_i32_1 = arith.constant 0 : i32
    return %arg0, %c0_i32, %c0_i32_0 : i32, i32, i32
  }
  func.func @transform_1(%arg0: i32) -> (i32, i32) {
    %c0_i32 = arith.constant 0 : i32
    %c0_i32_0 = arith.constant 0 : i32
    %c0_i32_1 = arith.constant 0 : i32
    return %c0_i32, %c0_i32_0 : i32, i32
  }
  func.func @transform_2(%arg0: i32) -> (i32, i32) {
    %c0_i32 = arith.constant 0 : i32
    %c0_i32_0 = arith.constant 0 : i32
    %c0_i32_1 = arith.constant 0 : i32
    return %c0_i32, %c0_i32_0 : i32, i32
  }
  func.func @transform_3(%arg0: i32) -> (i32, i32, i32) {
    %c0_i32 = arith.constant 0 : i32
    %c0_i32_0 = arith.constant 0 : i32
    %c0_i32_1 = arith.constant 0 : i32
    return %arg0, %c0_i32, %c0_i32_0 : i32, i32, i32
  }
  func.func @transform_4(%arg0: i32) -> (i32, i32, i32) {
    %c0_i32 = arith.constant 0 : i32
    %c0_i32_0 = arith.constant 0 : i32
    %c0_i32_1 = arith.constant 0 : i32
    return %arg0, %c0_i32, %c0_i32_0 : i32, i32, i32
  }
}

module attributes {stable_mosaic.version = 11 : i64} {
  func.func @_norm_lrelu_mm_stats_kernel(%arg0: i32, %arg1: memref<8x256xf32, #tpu.memory_space<vmem>>, %arg2: memref<2x256xf32, #tpu.memory_space<vmem>>, %arg3: memref<256x128xf32, #tpu.memory_space<vmem>>, %arg4: memref<8x128xf32, #tpu.memory_space<vmem>>, %arg5: memref<1x2x128xf32, #tpu.memory_space<vmem>>) attributes {dimension_semantics = [#tpu.dimension_semantics<parallel>], iteration_bounds = array<i64: 1>, scalar_prefetch = 0 : i64, scratch_operands = 0 : i64, tpu.core_type = #tpu.core_type<tc>, window_params = [{transform_indices = @transform_0, window_bounds = array<i64: 8, 256>}, {pipeline_mode = #tpu.pipeline_mode<synchronous>, transform_indices = @transform_1, window_bounds = array<i64: 2, 256>}, {pipeline_mode = #tpu.pipeline_mode<synchronous>, transform_indices = @transform_2, window_bounds = array<i64: 256, 128>}, {transform_indices = @transform_3, window_bounds = array<i64: 8, 128>}, {transform_indices = @transform_4, window_bounds = array<i64: 1, 2, 128>}]} {
    %c0 = arith.constant 0 : index
    %c0_0 = arith.constant 0 : index
    %0 = vector.load %arg1[%c0, %c0_0] : memref<8x256xf32, #tpu.memory_space<vmem>>, vector<8x256xf32>
    %c0_1 = arith.constant 0 : index
    %c0_2 = arith.constant 0 : index
    %1 = vector.load %arg2[%c0_1, %c0_2] : memref<2x256xf32, #tpu.memory_space<vmem>>, vector<1x256xf32>
    %2 = vector.broadcast %1 : vector<1x256xf32> to vector<8x256xf32>
    %3 = arith.mulf %0, %2 : vector<8x256xf32>
    %c1 = arith.constant 1 : index
    %c0_3 = arith.constant 0 : index
    %4 = vector.load %arg2[%c1, %c0_3] : memref<2x256xf32, #tpu.memory_space<vmem>>, vector<1x256xf32>
    %5 = vector.broadcast %4 : vector<1x256xf32> to vector<8x256xf32>
    %6 = arith.addf %3, %5 : vector<8x256xf32>
    %cst = arith.constant 0.000000e+00 : f32
    %7 = vector.broadcast %cst : f32 to vector<8x256xf32>
    %8 = arith.cmpf oge, %6, %7 : vector<8x256xf32>
    %cst_4 = arith.constant 0.00999999977 : f32
    %9 = vector.broadcast %cst_4 : f32 to vector<8x256xf32>
    %10 = arith.mulf %9, %6 : vector<8x256xf32>
    %11 = arith.select %8, %6, %10 : vector<8x256xi1>, vector<8x256xf32>
    %c0_5 = arith.constant 0 : index
    %c0_6 = arith.constant 0 : index
    %12 = vector.load %arg3[%c0_5, %c0_6] : memref<256x128xf32, #tpu.memory_space<vmem>>, vector<256x128xf32>
    %cst_7 = arith.constant dense<0.000000e+00> : vector<8x128xf32>
    %13 = tpu.matmul %11, %12, %cst_7 {dimension_numbers = #tpu.dot_dimension_numbers<[1], [0], [0], [1], [0, 0, 1, 1], [], []>} : vector<8x256xf32>, vector<256x128xf32>, vector<8x128xf32> -> vector<8x128xf32>
    %c0_8 = arith.constant 0 : index
    %c0_9 = arith.constant 0 : index
    %14 = vector.load %arg4[%c0_8, %c0_9] : memref<8x128xf32, #tpu.memory_space<vmem>>, vector<8x128xf32>
    tpu.vector_store %arg4[%c0_8, %c0_9], %13 {strides = array<i32>} : memref<8x128xf32, #tpu.memory_space<vmem>>, vector<8x128xf32>,
    %cst_10 = arith.constant dense<0.000000e+00> : vector<128xf32>
    %15 = vector.multi_reduction <add>, %13, %cst_10 [0] : vector<8x128xf32> to vector<128xf32>
    %16 = vector.shape_cast %15 : vector<128xf32> to vector<1x128xf32>
    %17 = arith.mulf %13, %13 : vector<8x128xf32>
    %cst_11 = arith.constant dense<0.000000e+00> : vector<128xf32>
    %18 = vector.multi_reduction <add>, %17, %cst_11 [0] : vector<8x128xf32> to vector<128xf32>
    %19 = vector.shape_cast %18 : vector<128xf32> to vector<1x128xf32>
    %20 = tpu.concatenate %16, %19 in 0 : vector<1x128xf32>, vector<1x128xf32> -> vector<2x128xf32>
    %c0_12 = arith.constant 0 : index
    %c0_13 = arith.constant 0 : index
    %c0_14 = arith.constant 0 : index
    %21 = vector.load %arg5[%c0_12, %c0_13, %c0_14] : memref<1x2x128xf32, #tpu.memory_space<vmem>>, vector<1x2x128xf32>
    %22 = vector.shape_cast %21 : vector<1x2x128xf32> to vector<2x128xf32>
    %23 = vector.shape_cast %20 : vector<2x128xf32> to vector<1x2x128xf32>
    tpu.vector_store %arg5[%c0_12, %c0_13, %c0_14], %23 {strides = array<i32>} : memref<1x2x128xf32, #tpu.memory_space<vmem>>, vector<1x2x128xf32>,
    return
  }
  func.func @transform_0(%arg0: i32) -> (i32, i32) {
    %c0_i32 = arith.constant 0 : i32
    %c0_i32_0 = arith.constant 0 : i32
    return %arg0, %c0_i32 : i32, i32
  }
  func.func @transform_1(%arg0: i32) -> (i32, i32) {
    %c0_i32 = arith.constant 0 : i32
    %c0_i32_0 = arith.constant 0 : i32
    %c0_i32_1 = arith.constant 0 : i32
    return %c0_i32, %c0_i32_0 : i32, i32
  }
  func.func @transform_2(%arg0: i32) -> (i32, i32) {
    %c0_i32 = arith.constant 0 : i32
    %c0_i32_0 = arith.constant 0 : i32
    %c0_i32_1 = arith.constant 0 : i32
    return %c0_i32, %c0_i32_0 : i32, i32
  }
  func.func @transform_3(%arg0: i32) -> (i32, i32) {
    %c0_i32 = arith.constant 0 : i32
    %c0_i32_0 = arith.constant 0 : i32
    return %arg0, %c0_i32 : i32, i32
  }
  func.func @transform_4(%arg0: i32) -> (i32, i32, i32) {
    %c0_i32 = arith.constant 0 : i32
    %c0_i32_0 = arith.constant 0 : i32
    %c0_i32_1 = arith.constant 0 : i32
    return %arg0, %c0_i32, %c0_i32_0 : i32, i32, i32
  }
}

module attributes {stable_mosaic.version = 11 : i64} {
  func.func @_mm_stats_kernel(%arg0: i32, %arg1: memref<8x735xf32, #tpu.memory_space<vmem>>, %arg2: memref<735x256xf32, #tpu.memory_space<vmem>>, %arg3: memref<8x256xf32, #tpu.memory_space<vmem>>, %arg4: memref<1x2x256xf32, #tpu.memory_space<vmem>>) attributes {dimension_semantics = [#tpu.dimension_semantics<parallel>], iteration_bounds = array<i64: 1>, scalar_prefetch = 0 : i64, scratch_operands = 0 : i64, tpu.core_type = #tpu.core_type<tc>, window_params = [{transform_indices = @transform_0, window_bounds = array<i64: 8, 735>}, {pipeline_mode = #tpu.pipeline_mode<synchronous>, transform_indices = @transform_1, window_bounds = array<i64: 735, 256>}, {transform_indices = @transform_2, window_bounds = array<i64: 8, 256>}, {transform_indices = @transform_3, window_bounds = array<i64: 1, 2, 256>}]} {
    %c0 = arith.constant 0 : index
    %c0_0 = arith.constant 0 : index
    %0 = vector.load %arg1[%c0, %c0_0] : memref<8x735xf32, #tpu.memory_space<vmem>>, vector<8x735xf32>
    %c0_1 = arith.constant 0 : index
    %c0_2 = arith.constant 0 : index
    %1 = vector.load %arg2[%c0_1, %c0_2] : memref<735x256xf32, #tpu.memory_space<vmem>>, vector<735x256xf32>
    %cst = arith.constant dense<0.000000e+00> : vector<8x256xf32>
    %2 = tpu.matmul %0, %1, %cst {dimension_numbers = #tpu.dot_dimension_numbers<[1], [0], [0], [1], [0, 0, 1, 1], [], []>} : vector<8x735xf32>, vector<735x256xf32>, vector<8x256xf32> -> vector<8x256xf32>
    %c0_3 = arith.constant 0 : index
    %c0_4 = arith.constant 0 : index
    %3 = vector.load %arg3[%c0_3, %c0_4] : memref<8x256xf32, #tpu.memory_space<vmem>>, vector<8x256xf32>
    tpu.vector_store %arg3[%c0_3, %c0_4], %2 {strides = array<i32>} : memref<8x256xf32, #tpu.memory_space<vmem>>, vector<8x256xf32>,
    %cst_5 = arith.constant dense<0.000000e+00> : vector<256xf32>
    %4 = vector.multi_reduction <add>, %2, %cst_5 [0] : vector<8x256xf32> to vector<256xf32>
    %5 = vector.shape_cast %4 : vector<256xf32> to vector<1x256xf32>
    %6 = arith.mulf %2, %2 : vector<8x256xf32>
    %cst_6 = arith.constant dense<0.000000e+00> : vector<256xf32>
    %7 = vector.multi_reduction <add>, %6, %cst_6 [0] : vector<8x256xf32> to vector<256xf32>
    %8 = vector.shape_cast %7 : vector<256xf32> to vector<1x256xf32>
    %9 = tpu.concatenate %5, %8 in 0 : vector<1x256xf32>, vector<1x256xf32> -> vector<2x256xf32>
    %c0_7 = arith.constant 0 : index
    %c0_8 = arith.constant 0 : index
    %c0_9 = arith.constant 0 : index
    %10 = vector.load %arg4[%c0_7, %c0_8, %c0_9] : memref<1x2x256xf32, #tpu.memory_space<vmem>>, vector<1x2x256xf32>
    %11 = vector.shape_cast %10 : vector<1x2x256xf32> to vector<2x256xf32>
    %12 = vector.shape_cast %9 : vector<2x256xf32> to vector<1x2x256xf32>
    tpu.vector_store %arg4[%c0_7, %c0_8, %c0_9], %12 {strides = array<i32>} : memref<1x2x256xf32, #tpu.memory_space<vmem>>, vector<1x2x256xf32>,
    return
  }
  func.func @transform_0(%arg0: i32) -> (i32, i32) {
    %c0_i32 = arith.constant 0 : i32
    %c0_i32_0 = arith.constant 0 : i32
    return %arg0, %c0_i32 : i32, i32
  }
  func.func @transform_1(%arg0: i32) -> (i32, i32) {
    %c0_i32 = arith.constant 0 : i32
    %c0_i32_0 = arith.constant 0 : i32
    %c0_i32_1 = arith.constant 0 : i32
    return %c0_i32, %c0_i32_0 : i32, i32
  }
  func.func @transform_2(%arg0: i32) -> (i32, i32) {
    %c0_i32 = arith.constant 0 : i32
    %c0_i32_0 = arith.constant 0 : i32
    return %arg0, %c0_i32 : i32, i32
  }
  func.func @transform_3(%arg0: i32) -> (i32, i32, i32) {
    %c0_i32 = arith.constant 0 : i32
    %c0_i32_0 = arith.constant 0 : i32
    %c0_i32_1 = arith.constant 0 : i32
    return %arg0, %c0_i32, %c0_i32_0 : i32, i32, i32
  }
}

module attributes {stable_mosaic.version = 11 : i64} {
  func.func @_norm_lrelu_mm_stats_kernel(%arg0: i32, %arg1: memref<8x128xf32, #tpu.memory_space<vmem>>, %arg2: memref<2x128xf32, #tpu.memory_space<vmem>>, %arg3: memref<128x64xf32, #tpu.memory_space<vmem>>, %arg4: memref<8x64xf32, #tpu.memory_space<vmem>>, %arg5: memref<1x2x64xf32, #tpu.memory_space<vmem>>) attributes {dimension_semantics = [#tpu.dimension_semantics<parallel>], iteration_bounds = array<i64: 1>, scalar_prefetch = 0 : i64, scratch_operands = 0 : i64, tpu.core_type = #tpu.core_type<tc>, window_params = [{transform_indices = @transform_0, window_bounds = array<i64: 8, 128>}, {pipeline_mode = #tpu.pipeline_mode<synchronous>, transform_indices = @transform_1, window_bounds = array<i64: 2, 128>}, {pipeline_mode = #tpu.pipeline_mode<synchronous>, transform_indices = @transform_2, window_bounds = array<i64: 128, 64>}, {transform_indices = @transform_3, window_bounds = array<i64: 8, 64>}, {transform_indices = @transform_4, window_bounds = array<i64: 1, 2, 64>}]} {
    %c0 = arith.constant 0 : index
    %c0_0 = arith.constant 0 : index
    %0 = vector.load %arg1[%c0, %c0_0] : memref<8x128xf32, #tpu.memory_space<vmem>>, vector<8x128xf32>
    %c0_1 = arith.constant 0 : index
    %c0_2 = arith.constant 0 : index
    %1 = vector.load %arg2[%c0_1, %c0_2] : memref<2x128xf32, #tpu.memory_space<vmem>>, vector<1x128xf32>
    %2 = vector.broadcast %1 : vector<1x128xf32> to vector<8x128xf32>
    %3 = arith.mulf %0, %2 : vector<8x128xf32>
    %c1 = arith.constant 1 : index
    %c0_3 = arith.constant 0 : index
    %4 = vector.load %arg2[%c1, %c0_3] : memref<2x128xf32, #tpu.memory_space<vmem>>, vector<1x128xf32>
    %5 = vector.broadcast %4 : vector<1x128xf32> to vector<8x128xf32>
    %6 = arith.addf %3, %5 : vector<8x128xf32>
    %cst = arith.constant 0.000000e+00 : f32
    %7 = vector.broadcast %cst : f32 to vector<8x128xf32>
    %8 = arith.cmpf oge, %6, %7 : vector<8x128xf32>
    %cst_4 = arith.constant 0.00999999977 : f32
    %9 = vector.broadcast %cst_4 : f32 to vector<8x128xf32>
    %10 = arith.mulf %9, %6 : vector<8x128xf32>
    %11 = arith.select %8, %6, %10 : vector<8x128xi1>, vector<8x128xf32>
    %c0_5 = arith.constant 0 : index
    %c0_6 = arith.constant 0 : index
    %12 = vector.load %arg3[%c0_5, %c0_6] : memref<128x64xf32, #tpu.memory_space<vmem>>, vector<128x64xf32>
    %cst_7 = arith.constant dense<0.000000e+00> : vector<8x64xf32>
    %13 = tpu.matmul %11, %12, %cst_7 {dimension_numbers = #tpu.dot_dimension_numbers<[1], [0], [0], [1], [0, 0, 1, 1], [], []>} : vector<8x128xf32>, vector<128x64xf32>, vector<8x64xf32> -> vector<8x64xf32>
    %c0_8 = arith.constant 0 : index
    %c0_9 = arith.constant 0 : index
    %14 = vector.load %arg4[%c0_8, %c0_9] : memref<8x64xf32, #tpu.memory_space<vmem>>, vector<8x64xf32>
    tpu.vector_store %arg4[%c0_8, %c0_9], %13 {strides = array<i32>} : memref<8x64xf32, #tpu.memory_space<vmem>>, vector<8x64xf32>,
    %cst_10 = arith.constant dense<0.000000e+00> : vector<64xf32>
    %15 = vector.multi_reduction <add>, %13, %cst_10 [0] : vector<8x64xf32> to vector<64xf32>
    %16 = vector.shape_cast %15 : vector<64xf32> to vector<1x64xf32>
    %17 = arith.mulf %13, %13 : vector<8x64xf32>
    %cst_11 = arith.constant dense<0.000000e+00> : vector<64xf32>
    %18 = vector.multi_reduction <add>, %17, %cst_11 [0] : vector<8x64xf32> to vector<64xf32>
    %19 = vector.shape_cast %18 : vector<64xf32> to vector<1x64xf32>
    %20 = tpu.concatenate %16, %19 in 0 : vector<1x64xf32>, vector<1x64xf32> -> vector<2x64xf32>
    %c0_12 = arith.constant 0 : index
    %c0_13 = arith.constant 0 : index
    %c0_14 = arith.constant 0 : index
    %21 = vector.load %arg5[%c0_12, %c0_13, %c0_14] : memref<1x2x64xf32, #tpu.memory_space<vmem>>, vector<1x2x64xf32>
    %22 = vector.shape_cast %21 : vector<1x2x64xf32> to vector<2x64xf32>
    %23 = vector.shape_cast %20 : vector<2x64xf32> to vector<1x2x64xf32>
    tpu.vector_store %arg5[%c0_12, %c0_13, %c0_14], %23 {strides = array<i32>} : memref<1x2x64xf32, #tpu.memory_space<vmem>>, vector<1x2x64xf32>,
    return
  }
  func.func @transform_0(%arg0: i32) -> (i32, i32) {
    %c0_i32 = arith.constant 0 : i32
    %c0_i32_0 = arith.constant 0 : i32
    return %arg0, %c0_i32 : i32, i32
  }
  func.func @transform_1(%arg0: i32) -> (i32, i32) {
    %c0_i32 = arith.constant 0 : i32
    %c0_i32_0 = arith.constant 0 : i32
    %c0_i32_1 = arith.constant 0 : i32
    return %c0_i32, %c0_i32_0 : i32, i32
  }
  func.func @transform_2(%arg0: i32) -> (i32, i32) {
    %c0_i32 = arith.constant 0 : i32
    %c0_i32_0 = arith.constant 0 : i32
    %c0_i32_1 = arith.constant 0 : i32
    return %c0_i32, %c0_i32_0 : i32, i32
  }
  func.func @transform_3(%arg0: i32) -> (i32, i32) {
    %c0_i32 = arith.constant 0 : i32
    %c0_i32_0 = arith.constant 0 : i32
    return %arg0, %c0_i32 : i32, i32
  }
  func.func @transform_4(%arg0: i32) -> (i32, i32, i32) {
    %c0_i32 = arith.constant 0 : i32
    %c0_i32_0 = arith.constant 0 : i32
    %c0_i32_1 = arith.constant 0 : i32
    return %arg0, %c0_i32, %c0_i32_0 : i32, i32, i32
  }
}

module attributes {stable_mosaic.version = 11 : i64} {
  func.func @_norm_lrelu_kernel(%arg0: i32, %arg1: memref<8x64xf32, #tpu.memory_space<vmem>>, %arg2: memref<2x64xf32, #tpu.memory_space<vmem>>, %arg3: memref<8x64xf32, #tpu.memory_space<vmem>>) attributes {dimension_semantics = [#tpu.dimension_semantics<parallel>], iteration_bounds = array<i64: 1>, scalar_prefetch = 0 : i64, scratch_operands = 0 : i64, tpu.core_type = #tpu.core_type<tc>, window_params = [{transform_indices = @transform_0, window_bounds = array<i64: 8, 64>}, {pipeline_mode = #tpu.pipeline_mode<synchronous>, transform_indices = @transform_1, window_bounds = array<i64: 2, 64>}, {transform_indices = @transform_2, window_bounds = array<i64: 8, 64>}]} {
    %c0 = arith.constant 0 : index
    %c0_0 = arith.constant 0 : index
    %0 = vector.load %arg1[%c0, %c0_0] : memref<8x64xf32, #tpu.memory_space<vmem>>, vector<8x64xf32>
    %c0_1 = arith.constant 0 : index
    %c0_2 = arith.constant 0 : index
    %1 = vector.load %arg2[%c0_1, %c0_2] : memref<2x64xf32, #tpu.memory_space<vmem>>, vector<1x64xf32>
    %2 = vector.broadcast %1 : vector<1x64xf32> to vector<8x64xf32>
    %3 = arith.mulf %0, %2 : vector<8x64xf32>
    %c1 = arith.constant 1 : index
    %c0_3 = arith.constant 0 : index
    %4 = vector.load %arg2[%c1, %c0_3] : memref<2x64xf32, #tpu.memory_space<vmem>>, vector<1x64xf32>
    %5 = vector.broadcast %4 : vector<1x64xf32> to vector<8x64xf32>
    %6 = arith.addf %3, %5 : vector<8x64xf32>
    %cst = arith.constant 0.000000e+00 : f32
    %7 = vector.broadcast %cst : f32 to vector<8x64xf32>
    %8 = arith.cmpf oge, %6, %7 : vector<8x64xf32>
    %cst_4 = arith.constant 0.00999999977 : f32
    %9 = vector.broadcast %cst_4 : f32 to vector<8x64xf32>
    %10 = arith.mulf %9, %6 : vector<8x64xf32>
    %11 = arith.select %8, %6, %10 : vector<8x64xi1>, vector<8x64xf32>
    %c0_5 = arith.constant 0 : index
    %c0_6 = arith.constant 0 : index
    %12 = vector.load %arg3[%c0_5, %c0_6] : memref<8x64xf32, #tpu.memory_space<vmem>>, vector<8x64xf32>
    tpu.vector_store %arg3[%c0_5, %c0_6], %11 {strides = array<i32>} : memref<8x64xf32, #tpu.memory_space<vmem>>, vector<8x64xf32>,
    return
  }
  func.func @transform_0(%arg0: i32) -> (i32, i32) {
    %c0_i32 = arith.constant 0 : i32
    %c0_i32_0 = arith.constant 0 : i32
    return %arg0, %c0_i32 : i32, i32
  }
  func.func @transform_1(%arg0: i32) -> (i32, i32) {
    %c0_i32 = arith.constant 0 : i32
    %c0_i32_0 = arith.constant 0 : i32
    %c0_i32_1 = arith.constant 0 : i32
    return %c0_i32, %c0_i32_0 : i32, i32
  }
  func.func @transform_2(%arg0: i32) -> (i32, i32) {
    %c0_i32 = arith.constant 0 : i32
    %c0_i32_0 = arith.constant 0 : i32
    return %arg0, %c0_i32 : i32, i32
  }
}

</mosaic_0001>

<bundles_post_ra>
// kernel: emotion_attention_forward.9
= control target key start
LH: loop header
LB: loop body
LE: loop exit
PB: predicated region body
PF: predicated region fallthrough
CT: control target
= control target key end

     0   :  { %s722_s15 = smov 0   ;;  %s799_s0 = inlined_call_operand.vmem [shape: f32[8,62,5], index: 0, kind: input, shape index: {}]   ;;  %s800_s1 = inlined_call_operand.vmem [shape: f32[5,5], index: 1, kind: input, shape index: {}]   ;;  %s801_s2 = inlined_call_operand.vmem [shape: f32[62,62], index: 2, kind: input, shape index: {}]   ;;  %s802_s3 = inlined_call_operand.vmem [shape: f32[1,5], index: 3, kind: input, shape index: {}]   ;;  %s803_s4 = inlined_call_operand.vmem [shape: f32[8,62,5], index: 4, kind: output, shape index: {}]  }
   0x1 LB: > { %s554_s16 = sadd.s32 4294967295, %s694_s15   ;;  %p558_p0 = scmp.ge.s32.totalorder %s694_s15, 1  ;;  %s694_s15 = sphi %s722_s15, %s14_s15  }
   0x2   : > { %p162_p1 = scmp.lt.s32.totalorder %s694_s15, 9 }
   0x4   : > { %p163_p2 = pnand %p558_p0, %p162_p1 }
   0x5   : > { %v206_v0 = vld [vmem:[%s800_s1] sm:$0x1f] (!%p163_p2)  ;;  %vm232_vm0 = vcmask (!%p163_p2), 1044480   ;;  %p188_p3 = scmp.lt.s32.totalorder (!%p163_p2), %s554_s16, 7  ;;  %vm207_vm1 = vcmask (!%p163_p2), 39936   ;;  %v343_v9 = vld [vmem:[%s801_s2 + $0x10] sm:$0xff] (!%p163_p2) }
   0x6   : > { %166 = sbr.rel (%p163_p2) target bundleno = 473 (0x1d9), region = 36  ;;  %611 = vmatprep.subr.msk.mxu0 (!%p163_p2), %vm232_vm0, %v206_v0  ;;  %vm356_vm2 = vcmask (!%p163_p2), 506880   ;;  %v341_v10 = vld [vmem:[%s801_s2] sm:$0xff] (!%p163_p2)  ;;  %vm381_vm3 = vcmask (!%p163_p2), 1045504   ;;  %vm696_vm4 = vmmov (!%p163_p2), 1   ;;  %v344_v23 = vld [vmem:[%s801_s2 + $0x18] sm:$0xff] (!%p163_p2) }
   0x7   : > { %612 = vmatpush3.msk.msra.mxu0 (!%p163_p2), %vm232_vm0, %v206_v0  ;;  %644 = vmatprep.mubr.msk.f32.mxu1 (!%p163_p2), %vm356_vm2, %v343_v9  ;;  %vm666_vm5 = vmpackc.low (!%p163_p2), %vm381_vm3, %vm696_vm4  ;;  %v342_v24 = vld [vmem:[%s801_s2 + $0x8] sm:$0xff] (!%p163_p2)  ;;  %v345_v25 = vld [vmem:[%s801_s2 + $0x20] sm:$0xff] (!%p163_p2)  ;;  %vm497_vm6 = vcmask (!%p163_p2), 37888  }
   0x8   : > { %v346_v26 = vld [vmem:[%s801_s2 + $0x28] sm:$0xff] (!%p163_p2)  ;;  %v347_v27 = vld [vmem:[%s801_s2 + $0x30] sm:$0xff] (!%p163_p2)  ;;  %v348_v28 = vld [vmem:[%s801_s2 + $0x38] sm:$0x3f] (!%p163_p2) }
   0x9   : > { %v572_v29 = vld [vmem:[%s802_s3] ss:$0 sm:$0xff] (!%p163_p2) }
   0xd   : > { %s805_s16 = smov (!%p188_p3, %s554_s16), 7 }
   0xe   : > { %s584_s19 = sshll.u32 %s805_s16, 6 }
   0xf   : > { %s192_s22 = scalar_lea.vmem %s799_s0, %s584_s19  ;;  %s197_s20 = scalar_lea.vmem %s803_s4, %s584_s19 }
  0x10   : > { %v198_v1 = vld [vmem:[%s192_s22] sm:$0xff]  ;;  %v199_v2 = vld [vmem:[%s192_s22 + $0x8] sm:$0xff]  ;;  %v200_v3 = vld [vmem:[%s192_s22 + $0x10] sm:$0xff] }
  0x11   : > { %613 = vmatprep.mubr.msk.f32.mxu0 %vm207_vm1, %v198_v1  ;;  %v201_v4 = vld [vmem:[%s192_s22 + $0x18] sm:$0xff]  ;;  %v202_v5 = vld [vmem:[%s192_s22 + $0x20] sm:$0xff]  ;;  %v203_v6 = vld [vmem:[%s192_s22 + $0x28] sm:$0xff] }
  0x12   : > { %614 = vmatmul.mubr.msk.f32.vlgmr.msra.gmra.mrb[0].mxu0 %vm207_vm1, %v199_v2  ;;  %v204_v7 = vld [vmem:[%s192_s22 + $0x30] sm:$0xff]  ;;  %v205_v8 = vld [vmem:[%s192_s22 + $0x38] sm:$0x3f] }
  0x13   : > { %616 = vmatprep.mubr.msk.f32.mxu0 %vm207_vm1, %v200_v3 }
  0x16   : > { %617 = vmatmul.mubr.msk.f32.gmra.mrb[2].mxu0 %vm207_vm1, %v201_v4 }
  0x17   : > { %619 = vmatprep.mubr.msk.f32.mxu0 %vm207_vm1, %v202_v5 }
  0x1a   : > { %620 = vmatmul.mubr.msk.f32.gmra.mrb[4].mxu0 %vm207_vm1, %v203_v6 }
  0x1b   : > { %622 = vmatprep.mubr.msk.f32.mxu0 %vm207_vm1, %v204_v7 }
  0x1e   : > { %623 = vmatmul.mubr.msk.f32.gmra.mrb[6].mxu0 %vm207_vm1, %v205_v8 }
  0x1f   : > { %641 = vmatprep.mubr.msk.f32.mxu0 %vm356_vm2, %v341_v10 }
  0xe5   : > { %v615_v11 = vpop.f32.mrb[0].mxu0 }
  0xe6   : > { %v302_v12 = vpop.f32.mrb[1].mxu0 }
  0xe7   : > { %v653_v13 = vpack.c.bf16 %v615_v11, %v302_v12 }
  0xe9   : > { %v618_v14 = vpop.f32.mrb[2].mxu0  ;;  %654 = vmatprep.subr.bf16.mxu0 %v653_v13  ;;  %671 = vmatprep.subr.bf16.mxu1 %v653_v13 }
  0xea   : > { %v312_v15 = vpop.f32.mrb[3].mxu0  ;;  %656 = vmatpush3.bf16.msra.mxu0 %v653_v13  ;;  %675 = vmatpush3.bf16.msra.mxu1 %v653_v13 }
  0xeb   : > { %v657_v16 = vpack.c.bf16 %v618_v14, %v312_v15 }
  0xed   : > { %v621_v17 = vpop.f32.mrb[4].mxu0  ;;  %658 = vmatprep.subr.bf16.mxu0 %v657_v16  ;;  %672 = vmatprep.subr.bf16.mxu1 %v657_v16 }
  0xee   : > { %v322_v18 = vpop.f32.mrb[5].mxu0  ;;  %660 = vmatpush3.bf16.msra.mxu0 %v657_v16  ;;  %676 = vmatpush3.bf16.msra.mxu1 %v657_v16 }
  0xef   : > { %v661_v19 = vpack.c.bf16 %v621_v17, %v322_v18 }
  0xf1   : > { %v624_v20 = vpop.f32.mrb[6].mxu0  ;;  %662 = vmatprep.subr.bf16.mxu0 %v661_v19  ;;  %673 = vmatprep.subr.bf16.mxu1 %v661_v19 }
  0xf2   : > { %v332_v21 = vpop.f32.mrb[7].mxu0  ;;  %664 = vmatpush3.bf16.msra.mxu0 %v661_v19  ;;  %677 = vmatpush3.bf16.msra.mxu1 %v661_v19 }
  0xf3   : > { %v665_v22 = vpack.c.bf16 %v624_v20, %v332_v21 }
  0xf5   : > { %667 = vmatprep.subr.msk.bf16.mxu0 %vm666_vm5, %v665_v22  ;;  %674 = vmatprep.subr.msk.bf16.mxu1 %vm666_vm5, %v665_v22 }
  0xf6   : > { %670 = vmatpush3.bf16.msk.msra.mxu0 %vm666_vm5, %v665_v22  ;;  %678 = vmatpush3.bf16.msk.msra.mxu1 %vm666_vm5, %v665_v22 }
  0xf9   : > { %645 = vmatmul.mubr.msk.f32.vlgmr.msra.gmra.mrb[0].mxu1 %vm356_vm2, %v344_v23  ;;  %642 = vmatmul.mubr.msk.f32.vlgmr.msra.gmra.mrb[8].mxu0 %vm356_vm2, %v342_v24 }
  0xfa   : > { %647 = vmatprep.mubr.msk.f32.mxu1 %vm356_vm2, %v345_v25 }
  0xfd   : > { %648 = vmatmul.mubr.msk.f32.gmra.mrb[2].mxu1 %vm356_vm2, %v346_v26 }
  0xfe   : > { %650 = vmatprep.mubr.msk.f32.mxu1 %vm356_vm2, %v347_v27 }
 0x101   : > { %651 = vmatmul.mubr.msk.f32.gmra.mrb[4].mxu1 %vm356_vm2, %v348_v28 }
 0x1cc   : > { %v646_v30 = vpop.f32.mrb[0].mxu1  ;;  %v643_v31 = vpop.f32.mrb[8].mxu0 }
 0x1cd   : > { %v467_v32 = vadd.f32 %v646_v30, %v572_v29  ;;  %v461_v33 = vpop.f32.mrb[1].mxu1  ;;  %v457_v34 = vadd.f32 %v643_v31, %v572_v29  ;;  %v451_v35 = vpop.f32.mrb[9].mxu0 }
 0x1ce   : > { %v462_v36 = vadd.f32 %v572_v29, %v461_v33  ;;  %v452_v37 = vadd.f32 %v572_v29, %v451_v35 }
 0x1cf   : > { %493 = vst.msk [vmem:[%s197_s20 + $0x18] sm:$0xff] %vm207_vm1, %v467_v32  ;;  %491 = vst.msk [vmem:[%s197_s20 + $0x8] sm:$0xff] %vm207_vm1, %v457_v34 }
 0x1d0   : > { %492 = vst.msk [vmem:[%s197_s20 + $0x10] sm:$0xff] %vm207_vm1, %v462_v36  ;;  %v649_v38 = vpop.f32.mrb[2].mxu1  ;;  %490 = vst.msk [vmem:[%s197_s20] sm:$0xff] %vm207_vm1, %v452_v37 }
 0x1d1   : > { %v477_v39 = vadd.f32 %v649_v38, %v572_v29  ;;  %v471_v40 = vpop.f32.mrb[3].mxu1 }
 0x1d2   : > { %v472_v41 = vadd.f32 %v572_v29, %v471_v40 }
 0x1d3   : > { %495 = vst.msk [vmem:[%s197_s20 + $0x28] sm:$0xff] %vm207_vm1, %v477_v39 }
 0x1d4   : > { %494 = vst.msk [vmem:[%s197_s20 + $0x20] sm:$0xff] %vm207_vm1, %v472_v41  ;;  %v652_v42 = vpop.f32.mrb[4].mxu1 }
 0x1d5   : > { %v487_v43 = vadd.f32 %v652_v42, %v572_v29  ;;  %v481_v44 = vpop.f32.mrb[5].mxu1 }
 0x1d6   : > { %v482_v45 = vadd.f32 %v572_v29, %v481_v44 }
 0x1d7   : > { %498 = vst.msk [vmem:[%s197_s20 + $0x38] sm:$0x3f] %vm497_vm6, %v487_v43 }
 0x1d8   : > { %496 = vst.msk [vmem:[%s197_s20 + $0x30] sm:$0xff] %vm207_vm1, %v482_v45 }
 0x1d9 PF: > { %s14_s15 = sadd.s32 1, %s694_s15  }
 0x1da   : > { %p11_p4 = scmp.ge.s32.totalorder %s14_s15, 10  }
 0x1dc   :  { %13 = sbr.rel (!%p11_p4) target bundleno = 1 (0x1), region = 66 }

// kernel: emotion_attention_forward.13
= control target key start
LH: loop header
LB: loop body
LE: loop exit
PB: predicated region body
PF: predicated region fallthrough
CT: control target
= control target key end

     0   :  { %s3351_s12 = smov 0   ;;  %s4136_s0 = inlined_call_operand.vmem [shape: f32[7,8,25,5], index: 0, kind: input, shape index: {}]   ;;  %s4137_s1 = inlined_call_operand.vmem [shape: f32[7,25,1], index: 1, kind: input, shape index: {}]   ;;  %s4138_s2 = inlined_call_operand.vmem [shape: f32[5,10], index: 2, kind: input, shape index: {}]   ;;  %s4139_s3 = inlined_call_operand.vmem [shape: f32[7,8,5], index: 3, kind: output, shape index: {}]  }
   0x1 LB: > { %s2673_s13 = sadd.s32 4294967295, %s3328_s12   ;;  %p2677_p0 = scmp.ge.s32.totalorder %s3328_s12, 1  ;;  %s3328_s12 = sphi %s3351_s12, %s13_s12  }
   0x2   : > { %p147_p1 = scmp.lt.s32.totalorder %s3328_s12, 8 }
   0x4   : > { %p148_p2 = pnand %p2677_p0, %p147_p1 }
   0x5   : > { %v3362_v0 = vld [vmem:[%s4138_s2] sm:$0x1f] (!%p148_p2)  ;;  %vm211_vm0 = vcmask (!%p148_p2), 1044480   ;;  %p175_p3 = scmp.lt.s32.totalorder (!%p148_p2), %s2673_s13, 6  ;;  %vm198_vm1 = vcmask (!%p148_p2), 39936   ;;  %vm300_vm2 = vcmask (!%p148_p2), 80896  }
   0x6   : > { %151 = sbr.rel (%p148_p2) target bundleno = 1560 (0x618), region = 32  ;;  %2923 = vmatprep.subr.msk.mxu1 (!%p148_p2), %vm211_vm0, %v3362_v0  ;;  %2945 = vmatprep.subr.msk.mxu0 (!%p148_p2), %vm211_vm0, %v3362_v0  ;;  %vm3398_vm3 = vmpackc.low (!%p148_p2), %vm300_vm2, %vm300_vm2  ;;  %vm398_vm4 = vcmask (!%p148_p2), 203776   ;;  %vm408_vm5 = vcmask (!%p148_p2), 196608   ;;  %vm420_vm10 = vcmask (!%p148_p2), 7168   ;;  %vm424_vm11 = vcmask (!%p148_p2), 0  }
   0x7   : > { %2924 = vmatpush3.msk.msra.mxu1 (!%p148_p2), %vm211_vm0, %v3362_v0  ;;  %2946 = vmatpush3.msk.msra.mxu0 (!%p148_p2), %vm211_vm0, %v3362_v0  ;;  %vm498_vm12 = vcmask (!%p148_p2), 32768  }
   0xd   : > { %s4143_s13 = smov (!%p175_p3, %s2673_s13), 6 }
   0xe   : > { %s2817_s16 = sshll.u32 %s4143_s13, 8  ;;  %s2818_s20 = sshll.u32 %s4143_s13, 5 }
   0xf   : > { %s3378_s19 = scalar_lea.vmem %s4136_s0, %s2817_s16  ;;  %s3598_s23 = scalar_lea.vmem %s4137_s1, %s2818_s20 }
  0x10   : > { %v194_v1 = vld [vmem:[%s3378_s19] sm:$0xff]  ;;  %v195_v3 = vld [vmem:[%s3378_s19 + $0x8] sm:$0xff]  ;;  %v196_v5 = vld [vmem:[%s3378_s19 + $0x10] sm:$0xff]  ;;  %s2682_s24 = sshll.u32 %s4143_s13, 3 }
  0x11   : > { %v2696_v2 = vld [vmem:[%s3378_s19 + $0x20] sm:$0xff]  ;;  %2925 = vmatprep.mubr.msk.f32.mxu1 %vm198_vm1, %v194_v1  ;;  %v2697_v4 = vld [vmem:[%s3378_s19 + $0x28] sm:$0xff]  ;;  %v2698_v6 = vld [vmem:[%s3378_s19 + $0x30] sm:$0xff]  ;;  %s4023_s27 = scalar_lea.vmem %s4139_s3, %s2682_s24 }
  0x12   : > { %2947 = vmatprep.mubr.msk.f32.mxu0 %vm198_vm1, %v2696_v2  ;;  %2926 = vmatmul.mubr.msk.f32.vlgmr.msra.gmra.mrb[0].mxu1 %vm198_vm1, %v195_v3  ;;  %v197_v7 = vld [vmem:[%s3378_s19 + $0x18] sm:$0x1]  ;;  %v2713_v22 = vld [vmem:[%s3378_s19 + $0x40] sm:$0xff]  ;;  %v2714_v24 = vld [vmem:[%s3378_s19 + $0x48] sm:$0xff] }
  0x13   : > { %2948 = vmatmul.mubr.msk.f32.vlgmr.msra.gmra.mrb[0].mxu0 %vm198_vm1, %v2697_v4  ;;  %2928 = vmatprep.mubr.msk.f32.mxu1 %vm198_vm1, %v196_v5  ;;  %v2699_v8 = vld [vmem:[%s3378_s19 + $0x38] sm:$0x1]  ;;  %v2730_v23 = vld [vmem:[%s3378_s19 + $0x60] sm:$0xff]  ;;  %v2731_v25 = vld [vmem:[%s3378_s19 + $0x68] sm:$0xff] }
  0x14   : > { %2950 = vmatprep.mubr.msk.f32.mxu0 %vm198_vm1, %v2698_v6  ;;  %v2715_v26 = vld [vmem:[%s3378_s19 + $0x50] sm:$0xff]  ;;  %v2716_v28 = vld [vmem:[%s3378_s19 + $0x58] sm:$0x1]  ;;  %v2747_v58 = vld [vmem:[%s3378_s19 + $0x80] sm:$0xff] }
  0x15   : > { %v2732_v27 = vld [vmem:[%s3378_s19 + $0x70] sm:$0xff]  ;;  %v2733_v29 = vld [vmem:[%s3378_s19 + $0x78] sm:$0x1]  ;;  %v2764_v59 = vld [vmem:[%s3378_s19 + $0xa0] sm:$0xff] }
  0x16   : > { %2929 = vmatmul.mubr.msk.f32.gmra.mrb[2].mxu1 %vm198_vm1, %v197_v7  ;;  %v2748_v60 = vld [vmem:[%s3378_s19 + $0x88] sm:$0xff]  ;;  %v2749_v62 = vld [vmem:[%s3378_s19 + $0x90] sm:$0xff]  ;;  %v2750_v1 = vld [vmem:[%s3378_s19 + $0x98] sm:$0x1] }
  0x17   : > { %2951 = vmatmul.mubr.msk.f32.gmra.mrb[2].mxu0 %vm198_vm1, %v2699_v8  ;;  %v2765_v61 = vld [vmem:[%s3378_s19 + $0xa8] sm:$0xff]  ;;  %v2766_v63 = vld [vmem:[%s3378_s19 + $0xb0] sm:$0xff]  ;;  %v2767_v2 = vld [vmem:[%s3378_s19 + $0xb8] sm:$0x1] }
  0xe5   : > { %v2927_v9 = vpop.f32.mrb[0].mxu1 }
  0xe6   : > { %v2949_v10 = vpop.f32.mrb[0].mxu0  ;;  %v281_v11 = vpop.f32.mrb[1].mxu1 }
  0xe7   : > { %v591_v12 = vpop.f32.mrb[1].mxu0  ;;  %v3099_v14 = vpack.c.bf16 %v2927_v9, %v281_v11  ;;  %2939 = vmatprep.mubr.msk.f32.mxu1 %vm300_vm2, %v281_v11 }
  0xe8   : > { %v3111_v15 = vpack.c.bf16 %v2949_v10, %v591_v12  ;;  %2961 = vmatprep.mubr.msk.f32.mxu0 %vm300_vm2, %v591_v12 }
  0xe9   : > { %3101 = vmatprep.subr.msk.bf16.mxu1 %vm3398_vm3, %v3099_v14  ;;  %v2930_v16 = vpop.f32.mrb[2].mxu1 }
  0xea   : > { %3113 = vmatprep.subr.msk.bf16.mxu0 %vm3398_vm3, %v3111_v15  ;;  %v2952_v17 = vpop.f32.mrb[2].mxu0  ;;  %3104 = vmatpush3.bf16.xpose.msk.msra.mxu1 %vm3398_vm3, %v3099_v14  ;;  %v291_v18 = vpop.f32.mrb[3].mxu1 }
  0xeb   : > { %3116 = vmatpush3.bf16.xpose.msk.msra.mxu0 %vm3398_vm3, %v3111_v15  ;;  %v601_v19 = vpop.f32.mrb[3].mxu0  ;;  %v3105_v20 = vpack.c.bf16 %v2930_v16, %v291_v18 }
  0xec   : > { %v3117_v21 = vpack.c.bf16 %v2952_v17, %v601_v19 }
  0xed   : > { %3107 = vmatprep.subr.msk.bf16.mxu1 %vm3398_vm3, %v3105_v20 }
  0xee   : > { %3119 = vmatprep.subr.msk.bf16.mxu0 %vm3398_vm3, %v3117_v21 }
  0xf2   : > { %3110 = vmatpush3.bf16.xpose.msk.msra.mxu1 %vm3398_vm3, %v3105_v20 }
  0xf3   : > { %3122 = vmatpush3.bf16.xpose.msk.msra.mxu0 %vm3398_vm3, %v3117_v21  ;;  %2967 = vmatprep.subr.msk.mxu1 %vm211_vm0, %v3362_v0 }
  0xf4   : > { %2989 = vmatprep.subr.msk.mxu0 %vm211_vm0, %v3362_v0 }
  0xf9   : > { %2940 = vmatmul.mubr.msk.f32.vlgmr.msra.gmra.mrb[4].mxu1 %vm300_vm2, %v2927_v9 }
  0xfa   : > { %2962 = vmatmul.mubr.msk.f32.vlgmr.msra.gmra.mrb[4].mxu0 %vm300_vm2, %v2949_v10  ;;  %2942 = vmatprep.mubr.msk.f32.mxu1 %vm300_vm2, %v291_v18 }
  0xfb   : > { %2964 = vmatprep.mubr.msk.f32.mxu0 %vm300_vm2, %v601_v19  ;;  %2968 = vmatpush3.msk.msra.mxu1 %vm211_vm0, %v3362_v0 }
  0xfc   : > { %2990 = vmatpush3.msk.msra.mxu0 %vm211_vm0, %v3362_v0 }
  0xfd   : > { %2943 = vmatmul.mubr.msk.f32.gmra.mrb[6].mxu1 %vm300_vm2, %v2930_v16 }
  0xfe   : > { %2965 = vmatmul.mubr.msk.f32.gmra.mrb[6].mxu0 %vm300_vm2, %v2952_v17  ;;  %2969 = vmatprep.mubr.msk.f32.mxu1 %vm198_vm1, %v2713_v22 }
  0xff   : > { %2991 = vmatprep.mubr.msk.f32.mxu0 %vm198_vm1, %v2730_v23 }
 0x101   : > { %2970 = vmatmul.mubr.msk.f32.vlgmr.msra.gmra.mrb[8].mxu1 %vm198_vm1, %v2714_v24 }
 0x102   : > { %2992 = vmatmul.mubr.msk.f32.vlgmr.msra.gmra.mrb[8].mxu0 %vm198_vm1, %v2731_v25  ;;  %2972 = vmatprep.mubr.msk.f32.mxu1 %vm198_vm1, %v2715_v26 }
 0x103   : > { %2994 = vmatprep.mubr.msk.f32.mxu0 %vm198_vm1, %v2732_v27 }
 0x105   : > { %2973 = vmatmul.mubr.msk.f32.gmra.mrb[10].mxu1 %vm198_vm1, %v2716_v28 }
 0x106   : > { %2995 = vmatmul.mubr.msk.f32.gmra.mrb[10].mxu0 %vm198_vm1, %v2733_v29 }
 0x1cc   : > { %v2941_v30 = vpop.f32.mrb[4].mxu1 }
 0x1cd   : > { %v2963_v31 = vpop.f32.mrb[4].mxu0  ;;  %v379_v32 = vpop.f32.mrb[5].mxu1  ;;  %v402_v34 = vsel %vm398_vm4, %v2941_v30, 0.0 }
 0x1ce   : > { %v688_v33 = vpop.f32.mrb[5].mxu0  ;;  %403 = vadd.xlane.f32.xlu0 %v402_v34  ;;  %v710_v40 = vsel %vm398_vm4, %v2963_v31, 0.0  ;;  %v399_v46 = vsel %vm398_vm4, %v379_v32, 0.0  ;;  %v2781_v32 = vld [vmem:[%s3378_s19 + $0xc0] sm:$0xff]  ;;  %v2782_v34 = vld [vmem:[%s3378_s19 + $0xc8] sm:$0xff] }
 0x1cf   : > { %v707_v35 = vsel %vm398_vm4, %v688_v33, 0.0  ;;  %v2798_v33 = vld [vmem:[%s3378_s19 + $0xe0] sm:$0xff] }
 0x1d0   : > { %708 = vadd.xlane.f32.xlu1 %v707_v35  ;;  %v2944_v36 = vpop.f32.mrb[6].mxu1  ;;  %v2799_v35 = vld [vmem:[%s3378_s19 + $0xe8] sm:$0xff] }
 0x1d1   : > { %v2966_v37 = vpop.f32.mrb[6].mxu0  ;;  %v389_v38 = vpop.f32.mrb[7].mxu1  ;;  %v409_v41 = vsel %vm408_vm5, %v2944_v36, 0.0  ;;  %v2783_v36 = vld [vmem:[%s3378_s19 + $0xd0] sm:$0xff] }
 0x1d2   : > { %v698_v39 = vpop.f32.mrb[7].mxu0  ;;  %711 = vadd.xlane.f32.xlu0 %v710_v40  ;;  %v716_v49 = vsel %vm408_vm5, %v2966_v37, 0.0  ;;  %v405_v54 = vsel %vm398_vm4, %v389_v38, 0.0  ;;  %v2800_v37 = vld [vmem:[%s3378_s19 + $0xf0] sm:$0xff]  ;;  %v2801_v38 = vld [vmem:[%s3378_s19 + $0xf8] sm:$0x1] }
 0x1d3   : > { %v713_v57 = vsel %vm398_vm4, %v698_v39, 0.0 }
 0x1d4   : > { %410 = vadd.xlane.f32.xlu1 %v409_v41  ;;  %v2971_v42 = vpop.f32.mrb[8].mxu1 }
 0x1d5   : > { %v2993_v43 = vpop.f32.mrb[8].mxu0  ;;  %v891_v44 = vpop.f32.mrb[9].mxu1 }
 0x1d6   : > { %v1191_v45 = vpop.f32.mrb[9].mxu0  ;;  %v3123_v47 = vpack.c.bf16 %v2971_v42, %v891_v44  ;;  %400 = vadd.xlane.f32.xlu0 %v399_v46  ;;  %2983 = vmatprep.mubr.msk.f32.mxu1 %vm300_vm2, %v891_v44 }
 0x1d7   : > { %v3135_v48 = vpack.c.bf16 %v2993_v43, %v1191_v45  ;;  %3005 = vmatprep.mubr.msk.f32.mxu0 %vm300_vm2, %v1191_v45 }
 0x1d8   : > { %717 = vadd.xlane.f32.xlu1 %v716_v49  ;;  %3125 = vmatprep.subr.msk.bf16.mxu1 %vm3398_vm3, %v3123_v47  ;;  %v2974_v50 = vpop.f32.mrb[10].mxu1 }
 0x1d9   : > { %3137 = vmatprep.subr.msk.bf16.mxu0 %vm3398_vm3, %v3135_v48  ;;  %v2996_v51 = vpop.f32.mrb[10].mxu0  ;;  %3128 = vmatpush3.bf16.xpose.msk.msra.mxu1 %vm3398_vm3, %v3123_v47  ;;  %v901_v52 = vpop.f32.mrb[11].mxu1 }
 0x1da   : > { %3140 = vmatpush3.bf16.xpose.msk.msra.mxu0 %vm3398_vm3, %v3135_v48  ;;  %v1201_v53 = vpop.f32.mrb[11].mxu0  ;;  %v3129_v55 = vpack.c.bf16 %v2974_v50, %v901_v52 }
 0x1db   : > { %v3141_v56 = vpack.c.bf16 %v2996_v51, %v1201_v53 }
 0x1dc   : > { %406 = vadd.xlane.f32.xlu1 %v405_v54  ;;  %3131 = vmatprep.subr.msk.bf16.mxu1 %vm3398_vm3, %v3129_v55 }
 0x1dd   : > { %3143 = vmatprep.subr.msk.bf16.mxu0 %vm3398_vm3, %v3141_v56 }
 0x1e0   : > { %714 = vadd.xlane.f32.xlu1 %v713_v57 }
 0x1e1   : > { %3134 = vmatpush3.bf16.xpose.msk.msra.mxu1 %vm3398_vm3, %v3129_v55 }
 0x1e2   : > { %3146 = vmatpush3.bf16.xpose.msk.msra.mxu0 %vm3398_vm3, %v3141_v56  ;;  %3011 = vmatprep.subr.msk.mxu1 %vm211_vm0, %v3362_v0 }
 0x1e3   : > { %3033 = vmatprep.subr.msk.mxu0 %vm211_vm0, %v3362_v0 }
 0x1e8   : > { %2984 = vmatmul.mubr.msk.f32.vlgmr.msra.gmra.mrb[12].mxu1 %vm300_vm2, %v2971_v42 }
 0x1e9   : > { %3006 = vmatmul.mubr.msk.f32.vlgmr.msra.gmra.mrb[12].mxu0 %vm300_vm2, %v2993_v43  ;;  %2986 = vmatprep.mubr.msk.f32.mxu1 %vm300_vm2, %v901_v52 }
 0x1ea   : > { %3008 = vmatprep.mubr.msk.f32.mxu0 %vm300_vm2, %v1201_v53  ;;  %3012 = vmatpush3.msk.msra.mxu1 %vm211_vm0, %v3362_v0 }
 0x1eb   : > { %3034 = vmatpush3.msk.msra.mxu0 %vm211_vm0, %v3362_v0 }
 0x1ec   : > { %2987 = vmatmul.mubr.msk.f32.gmra.mrb[14].mxu1 %vm300_vm2, %v2974_v50 }
 0x1ed   : > { %3009 = vmatmul.mubr.msk.f32.gmra.mrb[14].mxu0 %vm300_vm2, %v2996_v51  ;;  %3013 = vmatprep.mubr.msk.f32.mxu1 %vm198_vm1, %v2747_v58 }
 0x1ee   : > { %3035 = vmatprep.mubr.msk.f32.mxu0 %vm198_vm1, %v2764_v59 }
 0x1f0   : > { %3014 = vmatmul.mubr.msk.f32.vlgmr.msra.gmra.mrb[16].mxu1 %vm198_vm1, %v2748_v60 }
 0x1f1   : > { %3036 = vmatmul.mubr.msk.f32.vlgmr.msra.gmra.mrb[16].mxu0 %vm198_vm1, %v2765_v61  ;;  %3016 = vmatprep.mubr.msk.f32.mxu1 %vm198_vm1, %v2749_v62 }
 0x1f2   : > { %3038 = vmatprep.mubr.msk.f32.mxu0 %vm198_vm1, %v2766_v63 }
 0x1f4   : > { %3017 = vmatmul.mubr.msk.f32.gmra.mrb[18].mxu1 %vm198_vm1, %v2750_v1 }
 0x1f5   : > { %3039 = vmatmul.mubr.msk.f32.gmra.mrb[18].mxu0 %vm198_vm1, %v2767_v2 }
 0x25b   : > { %v404_v13 = vpop.xlane.xlu0 %403 }
 0x2bb   : > { %v2985_v3 = vpop.f32.mrb[12].mxu1 }
 0x2bc   : > { %v3007_v4 = vpop.f32.mrb[12].mxu0  ;;  %v988_v5 = vpop.f32.mrb[13].mxu1  ;;  %v1010_v7 = vsel %vm398_vm4, %v2985_v3, 0.0 }
 0x2bd   : > { %v1288_v6 = vpop.f32.mrb[13].mxu0  ;;  %1011 = vadd.xlane.f32.xlu0 %v1010_v7  ;;  %v1007_v8 = vsel %vm398_vm4, %v988_v5, 0.0  ;;  %v1310_v14 = vsel %vm398_vm4, %v3007_v4, 0.0  ;;  %v709_v4 = vpop.xlane.xlu1 %708 }
 0x2be   : > { %1008 = vadd.xlane.f32.xlu1 %v1007_v8  ;;  %v1307_v15 = vsel %vm398_vm4, %v1288_v6, 0.0  ;;  %v3330_v6 = vmov 0   ;;  %v712_v8 = vpop.xlane.xlu0 %711 }
 0x2bf   : > { %v2988_v9 = vpop.f32.mrb[14].mxu1  ;;  %3205 = vset.pattern.permute.xlu1 %v3330_v6  ;;  %3204 = vset.pattern.permute.xlu0 %v3330_v6 }
 0x2c0   : > { %v3010_v10 = vpop.f32.mrb[14].mxu0  ;;  %v998_v11 = vpop.f32.mrb[15].mxu1  ;;  %v1016_v23 = vsel %vm408_vm5, %v2988_v9, 0.0 }
 0x2c1   : > { %v1298_v12 = vpop.f32.mrb[15].mxu0  ;;  %1311 = vadd.xlane.f32.xlu0 %v1310_v14  ;;  %v1013_v20 = vsel %vm398_vm4, %v998_v11, 0.0  ;;  %v1316_v29 = vsel %vm408_vm5, %v3010_v10, 0.0  ;;  %v411_v5 = vpop.xlane.xlu1 %410 }
 0x2c2   : > { %1308 = vadd.xlane.f32.xlu1 %v1307_v15  ;;  %v1313_v26 = vsel %vm398_vm4, %v1298_v12, 0.0  ;;  %v401_v10 = vpop.xlane.xlu0 %400  ;;  %v3601_v12 = vld [vmem:[%s3598_s23 + $0x10] sm:$0xff] }
 0x2c3   : > { %v3015_v16 = vpop.f32.mrb[16].mxu1  ;;  %vm414_vm6 = vcmp.gt.f32.partialorder %v3601_v12, 0.0 }
 0x2c4   : > { %v3037_v17 = vpop.f32.mrb[16].mxu0  ;;  %v1491_v18 = vpop.f32.mrb[17].mxu1 }
 0x2c5   : > { %v1791_v19 = vpop.f32.mrb[17].mxu0  ;;  %v3147_v21 = vpack.c.bf16 %v3015_v16, %v1491_v18  ;;  %3027 = vmatprep.mubr.msk.f32.mxu1 %vm300_vm2, %v1491_v18  ;;  %1014 = vadd.xlane.f32.xlu0 %v1013_v20  ;;  %v718_v7 = vpop.xlane.xlu1 %717  ;;  %v3611_v18 = vld [vmem:[%s3598_s23] sm:$0xff] }
 0x2c6   : > { %v3159_v22 = vpack.c.bf16 %v3037_v17, %v1791_v19  ;;  %1017 = vadd.xlane.f32.xlu1 %v1016_v23  ;;  %3049 = vmatprep.mubr.msk.f32.mxu0 %vm300_vm2, %v1791_v19  ;;  %vm412_vm9 = vcmp.gt.f32.partialorder %v3611_v18, 0.0 }
 0x2c7   : > { %3149 = vmatprep.subr.msk.bf16.mxu1 %vm3398_vm3, %v3147_v21  ;;  %v3018_v24 = vpop.f32.mrb[18].mxu1  ;;  %v3626_v23 = vsel %vm412_vm9, %v401_v10, -1e+30 }
 0x2c8   : > { %3161 = vmatprep.subr.msk.bf16.mxu0 %vm3398_vm3, %v3159_v22  ;;  %v3040_v25 = vpop.f32.mrb[18].mxu0  ;;  %3152 = vmatpush3.bf16.xpose.msk.msra.mxu1 %vm3398_vm3, %v3147_v21  ;;  %v1501_v27 = vpop.f32.mrb[19].mxu1 }
 0x2c9   : > { %3164 = vmatpush3.bf16.xpose.msk.msra.mxu0 %vm3398_vm3, %v3159_v22  ;;  %v1801_v28 = vpop.f32.mrb[19].mxu0  ;;  %1314 = vadd.xlane.f32.xlu0 %v1313_v26  ;;  %v3153_v30 = vpack.c.bf16 %v3018_v24, %v1501_v27  ;;  %v407_v9 = vpop.xlane.xlu1 %406 }
 0x2ca   : > { %v3165_v31 = vpack.c.bf16 %v3040_v25, %v1801_v28  ;;  %1317 = vadd.xlane.f32.xlu1 %v1316_v29  ;;  %v3616_v19 = vsel %vm414_vm6, %v407_v9, -1e+30 }
 0x2cb   : > { %3155 = vmatprep.subr.msk.bf16.mxu1 %vm3398_vm3, %v3153_v30 }
 0x2cc   : > { %3167 = vmatprep.subr.msk.bf16.mxu0 %vm3398_vm3, %v3165_v31 }
 0x2cd   : > { %v715_v11 = vpop.xlane.xlu1 %714 }
 0x2d0   : > { %3158 = vmatpush3.bf16.xpose.msk.msra.mxu1 %vm3398_vm3, %v3153_v30 }
 0x2d1   : > { %3170 = vmatpush3.bf16.xpose.msk.msra.mxu0 %vm3398_vm3, %v3165_v31  ;;  %3055 = vmatprep.subr.msk.mxu1 %vm211_vm0, %v3362_v0 }
 0x2d2   : > { %3077 = vmatprep.subr.msk.mxu0 %vm211_vm0, %v3362_v0 }
 0x2d7   : > { %3028 = vmatmul.mubr.msk.f32.vlgmr.msra.gmra.mrb[20].mxu1 %vm300_vm2, %v3015_v16  ;;  %v3604_v16 = vld [vmem:[%s3598_s23 + $0x18] sm:$0x1] }
 0x2d8   : > { %3050 = vmatmul.mubr.msk.f32.vlgmr.msra.gmra.mrb[20].mxu0 %vm300_vm2, %v3037_v17  ;;  %3030 = vmatprep.mubr.msk.f32.mxu1 %vm300_vm2, %v1501_v27  ;;  %v3608_v17 = vld [vmem:[%s3598_s23 + $0x8] sm:$0xff]  ;;  %vm415_vm7 = vcmp.gt.f32.partialorder %v3604_v16, 0.0  ;;  %v421_v27 = vsel %vm420_vm10, %v3626_v23, -inf }
 0x2d9   : > { %3052 = vmatprep.mubr.msk.f32.mxu0 %vm300_vm2, %v1801_v28  ;;  %3056 = vmatpush3.msk.msra.mxu1 %vm211_vm0, %v3362_v0  ;;  %vm413_vm8 = vcmp.gt.f32.partialorder %v3608_v17, 0.0  ;;  %v3622_v22 = vsel %vm415_vm7, %v411_v5, -1e+30 }
 0x2da   : > { %3078 = vmatpush3.msk.msra.mxu0 %vm211_vm0, %v3362_v0  ;;  %v2784_v0 = vld [vmem:[%s3378_s19 + $0xd8] sm:$0x1]  ;;  %v425_v26 = vsel %vm424_vm11, %v3622_v22, -inf }
 0x2db   : > { %3031 = vmatmul.mubr.msk.f32.gmra.mrb[22].mxu1 %vm300_vm2, %v3018_v24  ;;  %v423_v24 = vsel %vm420_vm10, %v3616_v19, -inf }
 0x2dc   : > { %3053 = vmatmul.mubr.msk.f32.gmra.mrb[22].mxu0 %vm300_vm2, %v3040_v25  ;;  %3057 = vmatprep.mubr.msk.f32.mxu1 %vm198_vm1, %v2781_v32  ;;  %v3632_v25 = vsel %vm413_vm8, %v404_v13, -1e+30  ;;  %v427_v28 = vmax.f32 %v423_v24, %v425_v26 }
 0x2dd   : > { %3079 = vmatprep.mubr.msk.f32.mxu0 %vm198_vm1, %v2798_v33  ;;  %v422_v31 = vsel %vm420_vm10, %v3632_v25, -inf  ;;  %v3642_v33 = vsel %vm414_vm6, %v715_v11, -1e+30 }
 0x2de   : > { %v426_v32 = vmax.f32 %v421_v27, %v422_v31 }
 0x2df   : > { %3058 = vmatmul.mubr.msk.f32.vlgmr.msra.gmra.mrb[24].mxu1 %vm198_vm1, %v2782_v34 }
 0x2e0   : > { %3080 = vmatmul.mubr.msk.f32.vlgmr.msra.gmra.mrb[24].mxu0 %vm198_vm1, %v2799_v35  ;;  %3060 = vmatprep.mubr.msk.f32.mxu1 %vm198_vm1, %v2783_v36  ;;  %v428_v34 = vmax.f32 %v426_v32, %v427_v28  ;;  %v3646_v35 = vsel %vm413_vm8, %v712_v8, -1e+30  ;;  %v3650_v36 = vsel %vm415_vm7, %v718_v7, -1e+30 }
 0x2e1   : > { %3082 = vmatprep.mubr.msk.f32.mxu0 %vm198_vm1, %v2800_v37  ;;  %v725_v37 = vsel %vm420_vm10, %v3642_v33, -inf }
 0x2e3   : > { %3061 = vmatmul.mubr.msk.f32.gmra.mrb[26].mxu1 %vm198_vm1, %v2784_v0 }
 0x2e4   : > { %3083 = vmatmul.mubr.msk.f32.gmra.mrb[26].mxu0 %vm198_vm1, %v2801_v38 }
 0x34a   : > { %v1012_v14 = vpop.xlane.xlu0 %1011 }
 0x34b   : > { %v1009_v15 = vpop.xlane.xlu1 %1008 }
 0x34e   : > { %v1312_v20 = vpop.xlane.xlu0 %1311 }
 0x34f   : > { %v1309_v21 = vpop.xlane.xlu1 %1308 }
 0x352   : > { %v1015_v29 = vpop.xlane.xlu0 %1014 }
 0x353   : > { %v1018_v30 = vpop.xlane.xlu1 %1017 }
 0x356   : > { %v1315_v0 = vpop.xlane.xlu0 %1314 }
 0x357   : > { %v1318_v38 = vpop.xlane.xlu1 %1317 }
 0x3aa   : > { %v3029_v39 = vpop.f32.mrb[20].mxu1 }
 0x3ab   : > { %v3051_v40 = vpop.f32.mrb[20].mxu0  ;;  %v1588_v41 = vpop.f32.mrb[21].mxu1  ;;  %v1610_v43 = vsel %vm398_vm4, %v3029_v39, 0.0  ;;  %v3656_v39 = vsel %vm412_vm9, %v709_v4, -1e+30 }
 0x3ac   : > { %v1888_v42 = vpop.f32.mrb[21].mxu0  ;;  %v1910_v44 = vsel %vm398_vm4, %v3051_v40, 0.0  ;;  %1611 = vadd.xlane.f32.xlu0 %v1610_v43  ;;  %v1607_v50 = vsel %vm398_vm4, %v1588_v41, 0.0  ;;  %v724_v40 = vsel %vm420_vm10, %v3646_v35, -inf  ;;  %v726_v41 = vsel %vm424_vm11, %v3650_v36, -inf }
 0x3ad   : > { %1911 = vadd.xlane.f32.xlu1 %v1910_v44  ;;  %v1907_v49 = vsel %vm398_vm4, %v1888_v42, 0.0  ;;  %v429_v42 = vrot.slane %v428_v34, 4  ;;  %v728_v43 = vmax.f32 %v725_v37, %v726_v41  ;;  %v3664_v44 = vsel %vm414_vm6, %v1015_v29, -1e+30 }
 0x3ae   : > { %v3032_v45 = vpop.f32.mrb[22].mxu1  ;;  %v3704_v4 = vsel %vm412_vm9, %v1309_v21, -1e+30 }
 0x3af   : > { %v3054_v46 = vpop.f32.mrb[22].mxu0  ;;  %v1598_v47 = vpop.f32.mrb[23].mxu1  ;;  %v1616_v58 = vsel %vm408_vm5, %v3032_v45, 0.0  ;;  %v3668_v45 = vsel %vm415_vm7, %v1018_v30, -1e+30  ;;  %v1323_v10 = vsel %vm420_vm10, %v3704_v4, -inf }
 0x3b0   : > { %v1898_v48 = vpop.f32.mrb[23].mxu0  ;;  %1908 = vadd.xlane.f32.xlu0 %v1907_v49  ;;  %v1613_v55 = vsel %vm398_vm4, %v1598_v47, 0.0  ;;  %v1916_v1 = vsel %vm408_vm5, %v3054_v46, 0.0  ;;  %v723_v46 = vsel %vm420_vm10, %v3656_v39, -inf }
 0x3b1   : > { %1608 = vadd.xlane.f32.xlu1 %v1607_v50  ;;  %v1913_v61 = vsel %vm398_vm4, %v1898_v48, 0.0  ;;  %v727_v49 = vmax.f32 %v723_v46, %v724_v40  ;;  %v3676_v50 = vsel %vm413_vm8, %v1012_v14, -1e+30 }
 0x3b2   : > { %v3059_v51 = vpop.f32.mrb[24].mxu1 }
 0x3b3   : > { %v3081_v52 = vpop.f32.mrb[24].mxu0  ;;  %v2091_v53 = vpop.f32.mrb[25].mxu1 }
 0x3b4   : > { %v2391_v54 = vpop.f32.mrb[25].mxu0  ;;  %v3171_v56 = vpack.c.bf16 %v3059_v51, %v2091_v53  ;;  %3071 = vmatprep.mubr.msk.f32.mxu1 %vm300_vm2, %v2091_v53  ;;  %1614 = vadd.xlane.f32.xlu0 %v1613_v55  ;;  %v1025_v53 = vsel %vm420_vm10, %v3664_v44, -inf  ;;  %v729_v55 = vmax.f32 %v727_v49, %v728_v43 }
 0x3b5   : > { %v3183_v57 = vpack.c.bf16 %v3081_v52, %v2391_v54  ;;  %1617 = vadd.xlane.f32.xlu1 %v1616_v58  ;;  %3093 = vmatprep.mubr.msk.f32.mxu0 %vm300_vm2, %v2391_v54  ;;  %v1026_v54 = vsel %vm424_vm11, %v3668_v45, -inf }
 0x3b6   : > { %3173 = vmatprep.subr.msk.bf16.mxu1 %vm3398_vm3, %v3171_v56  ;;  %v3062_v59 = vpop.f32.mrb[26].mxu1  ;;  %v1028_v58 = vmax.f32 %v1025_v53, %v1026_v54 }
 0x3b7   : > { %3185 = vmatprep.subr.msk.bf16.mxu0 %vm3398_vm3, %v3183_v57  ;;  %v3084_v60 = vpop.f32.mrb[26].mxu0  ;;  %3176 = vmatpush3.bf16.xpose.msk.msra.mxu1 %vm3398_vm3, %v3171_v56  ;;  %v2101_v62 = vpop.f32.mrb[27].mxu1  ;;  %v1024_v56 = vsel %vm420_vm10, %v3676_v50, -inf }
 0x3b8   : > { %3188 = vmatpush3.bf16.xpose.msk.msra.mxu0 %vm3398_vm3, %v3183_v57  ;;  %v2401_v63 = vpop.f32.mrb[27].mxu0  ;;  %1914 = vadd.xlane.f32.xlu0 %v1913_v61  ;;  %v3177_v2 = vpack.c.bf16 %v3062_v59, %v2101_v62 }
 0x3b9   : > { %v3189_v3 = vpack.c.bf16 %v3084_v60, %v2401_v63  ;;  %1917 = vadd.xlane.f32.xlu1 %v1916_v1  ;;  %v3692_v1 = vsel %vm414_vm6, %v1315_v0, -1e+30 }
 0x3ba   : > { %3179 = vmatprep.subr.msk.bf16.mxu1 %vm3398_vm3, %v3177_v2  ;;  %v1325_v13 = vsel %vm420_vm10, %v3692_v1, -inf }
 0x3bb   : > { %3191 = vmatprep.subr.msk.bf16.mxu0 %vm3398_vm3, %v3189_v3 }
 0x3bf   : > { %3182 = vmatpush3.bf16.xpose.msk.msra.mxu1 %vm3398_vm3, %v3177_v2  ;;  %v3696_v2 = vsel %vm415_vm7, %v1318_v38, -1e+30 }
 0x3c0   : > { %3194 = vmatpush3.bf16.xpose.msk.msra.mxu0 %vm3398_vm3, %v3189_v3  ;;  %v3700_v3 = vsel %vm413_vm8, %v1312_v20, -1e+30  ;;  %v1326_v7 = vsel %vm424_vm11, %v3696_v2, -inf }
 0x3c1   : > { %v1324_v9 = vsel %vm420_vm10, %v3700_v3, -inf  ;;  %v1328_v20 = vmax.f32 %v1325_v13, %v1326_v7 }
 0x3c2   : > { %v1327_v26 = vmax.f32 %v1323_v10, %v1324_v9 }
 0x3c4   : > { %v1329_v30 = vmax.f32 %v1327_v26, %v1328_v20 }
 0x3c6   : > { %3072 = vmatmul.mubr.msk.f32.vlgmr.msra.gmra.mrb[28].mxu1 %vm300_vm2, %v3059_v51  ;;  %v3680_v51 = vsel %vm412_vm9, %v1009_v15, -1e+30  ;;  %v1330_v46 = vrot.slane %v1329_v30, 4 }
 0x3c7   : > { %3094 = vmatmul.mubr.msk.f32.vlgmr.msra.gmra.mrb[28].mxu0 %vm300_vm2, %v3081_v52  ;;  %3074 = vmatprep.mubr.msk.f32.mxu1 %vm300_vm2, %v2101_v62  ;;  %v430_v52 = vmax.f32 %v428_v34, %v429_v42  ;;  %v1023_v57 = vsel %vm420_vm10, %v3680_v51, -inf  ;;  %v730_v62 = vrot.slane %v729_v55, 4 }
 0x3c8   : > { %3096 = vmatprep.mubr.msk.f32.mxu0 %vm300_vm2, %v2401_v63  ;;  %v1027_v63 = vmax.f32 %v1023_v57, %v1024_v56 }
 0x3c9   : > { %v731_v8 = vmax.f32 %v729_v55, %v730_v62 }
 0x3ca   : > { %3075 = vmatmul.mubr.msk.f32.gmra.mrb[30].mxu1 %vm300_vm2, %v3062_v59  ;;  %v431_v59 = vrot.slane %v430_v52, 2  ;;  %v1029_v5 = vmax.f32 %v1027_v63, %v1028_v58 }
 0x3cb   : > { %3097 = vmatmul.mubr.msk.f32.gmra.mrb[30].mxu0 %vm300_vm2, %v3084_v60  ;;  %v732_v24 = vrot.slane %v731_v8, 2 }
 0x3cc   : > { %v432_v6 = vmax.f32 %v430_v52, %v431_v59  ;;  %v1030_v15 = vrot.slane %v1029_v5, 4  ;;  %v1331_v59 = vmax.f32 %v1329_v30, %v1330_v46 }
 0x3cd   : > { %v733_v0 = vmax.f32 %v731_v8, %v732_v24 }
 0x3ce   : > { %v433_v21 = vrot.slane %v432_v6, 1  ;;  %v1031_v29 = vmax.f32 %v1029_v5, %v1030_v15  ;;  %v1332_v8 = vrot.slane %v1331_v59, 2 }
 0x3cf   : > { %v734_v55 = vrot.slane %v733_v0, 1 }
 0x3d0   : > { %v434_v32 = vmax.f32 %v432_v6, %v433_v21  ;;  %v1032_v43 = vrot.slane %v1031_v29, 2  ;;  %v1333_v24 = vmax.f32 %v1331_v59, %v1332_v8 }
 0x3d1   : > { %v735_v5 = vmax.f32 %v733_v0, %v734_v55 }
 0x3d2   : > { %v435_v52 = vsub.f32 %v3626_v23, %v434_v32  ;;  %v436_v53 = vsub.f32 %v3632_v25, %v434_v32  ;;  %v1033_v58 = vmax.f32 %v1031_v29, %v1032_v43  ;;  %v438_v30 = vsub.f32 %v3622_v22, %v434_v32 }
 0x3d3   : > { %v736_v15 = vsub.f32 %v3656_v39, %v735_v5 }
 0x3d4   : > { %v441_v13 = vmul.f32 1.442695, %v436_v53  ;;  %v445_v43 = vmul.f32 1.442695, %v438_v30 }
 0x439   : > { %v1612_v47 = vpop.xlane.xlu0 %1611 }
 0x43a   : > { %v3672_v48 = vpop.xlane.xlu1 %1911  ;;  %v3732_v38 = vsel %vm413_vm8, %v1612_v47, -1e+30 }
 0x43b   : > { %v1624_v54 = vsel %vm420_vm10, %v3732_v38, -inf  ;;  %v3759_v6 = vsel %vm413_vm8, %v3672_v48, -1e+30  ;;  %v737_v48 = vsub.f32 %v3646_v35, %v735_v5 }
 0x43d   : > { %v1909_v60 = vpop.xlane.xlu0 %1908  ;;  %v742_v0 = vmul.f32 1.442695, %v737_v48 }
 0x43e   : > { %v1609_v61 = vpop.xlane.xlu1 %1608  ;;  %v3750_v23 = vsel %vm412_vm9, %v1909_v60, -1e+30  ;;  %v1034_v60 = vrot.slane %v1033_v58, 1 }
 0x43f   : > { %v3724_v31 = vsel %vm412_vm9, %v1609_v61, -1e+30  ;;  %v439_v61 = vmul.f32 1.442695, %v435_v52  ;;  %v1923_v7 = vsel %vm420_vm10, %v3750_v23, -inf }
 0x440   : > { %v1623_v40 = vsel %vm420_vm10, %v3724_v31, -inf  ;;  %v1035_v21 = vmax.f32 %v1033_v58, %v1034_v60 }
 0x441   : > { %v1615_v11 = vpop.xlane.xlu0 %1614  ;;  %v1627_v56 = vmax.f32 %v1623_v40, %v1624_v54  ;;  %3206 = vpow2.f32 %v439_v61 }
 0x442   : > { %v1618_v14 = vpop.xlane.xlu1 %1617  ;;  %v3716_v27 = vsel %vm414_vm6, %v1615_v11, -1e+30  ;;  %v437_v11 = vsub.f32 %v3616_v19, %v434_v32  ;;  %3208 = vpow2.f32 %v441_v13  ;;  %v738_v19 = vsub.f32 %v3642_v33, %v735_v5 }
 0x443   : > { %v3720_v28 = vsel %vm415_vm7, %v1618_v14, -1e+30  ;;  %v1625_v34 = vsel %vm420_vm10, %v3716_v27, -inf  ;;  %v1924_v14 = vsel %vm420_vm10, %v3759_v6, -inf  ;;  %v1037_v40 = vsub.f32 %v3676_v50, %v1035_v21 }
 0x444   : > { %v1626_v37 = vsel %vm424_vm11, %v3720_v28, -inf  ;;  %v1927_v20 = vmax.f32 %v1923_v7, %v1924_v14  ;;  %v1036_v35 = vsub.f32 %v3680_v51, %v1035_v21  ;;  %v739_v33 = vsub.f32 %v3650_v36, %v735_v5 }
 0x445   : > { %v1915_v41 = vpop.xlane.xlu0 %1914  ;;  %v1628_v49 = vmax.f32 %v1625_v34, %v1626_v37  ;;  %v443_v34 = vmul.f32 1.442695, %v437_v11  ;;  %v740_v37 = vmul.f32 1.442695, %v736_v15  ;;  %v1042_v22 = vmul.f32 1.442695, %v1037_v40 }
 0x446   : > { %v1918_v42 = vpop.xlane.xlu1 %1917  ;;  %v3742_v47 = vsel %vm414_vm6, %v1915_v41, -1e+30  ;;  %v1334_v41 = vrot.slane %v1333_v24, 1  ;;  %v1040_v50 = vmul.f32 1.442695, %v1036_v35  ;;  %v1038_v55 = vsub.f32 %v3664_v44, %v1035_v21 }
 0x447   : > { %v3746_v57 = vsel %vm415_vm7, %v1918_v42, -1e+30  ;;  %v1629_v25 = vmax.f32 %v1627_v56, %v1628_v49  ;;  %v1925_v62 = vsel %vm420_vm10, %v3742_v47, -inf  ;;  %3210 = vpow2.f32 %v443_v34 }
 0x448   : > { %v1926_v63 = vsel %vm424_vm11, %v3746_v57, -inf  ;;  %3212 = vpow2.f32 %v740_v37  ;;  %v744_v49 = vmul.f32 1.442695, %v738_v19  ;;  %v1335_v32 = vmax.f32 %v1333_v24, %v1334_v41 }
 0x449   : > { %v1630_v9 = vrot.slane %v1629_v25, 4  ;;  %v1928_v10 = vmax.f32 %v1925_v62, %v1926_v63  ;;  %3214 = vpow2.f32 %v742_v0  ;;  %v746_v61 = vmul.f32 1.442695, %v739_v33 }
 0x44a   : > { %3216 = vpow2.f32 %v445_v43  ;;  %v1337_v58 = vsub.f32 %v3700_v3, %v1335_v32  ;;  %v1336_v62 = vsub.f32 %v3704_v4, %v1335_v32  ;;  %v1039_v63 = vsub.f32 %v3668_v45, %v1035_v21 }
 0x44b   : > { %v1631_v26 = vmax.f32 %v1629_v25, %v1630_v9  ;;  %v1929_v29 = vmax.f32 %v1927_v20, %v1928_v10  ;;  %v3207_v46 = vpop.eup %3206  ;;  %3218 = vpow2.f32 %v744_v49  ;;  %v1044_v5 = vmul.f32 1.442695, %v1038_v55 }
 0x44c   : > { %v3209_v52 = vpop.eup %3208  ;;  %v3775_v56 = vmul.f32 %v3207_v46, %v3611_v18  ;;  %3220 = vpow2.f32 %v1042_v22  ;;  %v1342_v7 = vmul.f32 1.442695, %v1337_v58  ;;  %v1340_v10 = vmul.f32 1.442695, %v1336_v62 }
 0x44d   : > { %v1632_v42 = vrot.slane %v1631_v26, 2  ;;  %v1930_v39 = vrot.slane %v1929_v29, 4  ;;  %v3778_v51 = vmul.f32 %v3209_v52, %v3608_v17  ;;  %3222 = vpow2.f32 %v1040_v50 }
 0x44e   : > { %v451_v44 = vsel %vm420_vm10, %v3775_v56, 0.0  ;;  %3224 = vpow2.f32 %v746_v61  ;;  %v1046_v45 = vmul.f32 1.442695, %v1039_v63  ;;  %v1338_v14 = vsub.f32 %v3692_v1, %v1335_v32 }
 0x44f   : > { %v1633_v53 = vmax.f32 %v1631_v26, %v1632_v42  ;;  %v1931_v54 = vmax.f32 %v1929_v29, %v1930_v39  ;;  %v452_v3 = vsel %vm420_vm10, %v3778_v51, 0.0  ;;  %3226 = vpow2.f32 %v1044_v5 }
 0x450   : > { %v453_v15 = vadd.f32 %v452_v3, %v451_v44  ;;  %3228 = vpow2.f32 %v1342_v7  ;;  %v1339_v37 = vsub.f32 %v3696_v2, %v1335_v32  ;;  %v1344_v19 = vmul.f32 1.442695, %v1338_v14 }
 0x451   : > { %v1634_v59 = vrot.slane %v1633_v53, 1  ;;  %v1932_v25 = vrot.slane %v1931_v54, 2  ;;  %v3211_v36 = vpop.eup %3210  ;;  %3230 = vpow2.f32 %v1340_v10 }
 0x452   : > { %v3213_v13 = vpop.eup %3212  ;;  %v3790_v4 = vmul.f32 %v3211_v36, %v3601_v12  ;;  %3232 = vpow2.f32 %v1046_v45  ;;  %v1346_v52 = vmul.f32 1.442695, %v1339_v37 }
 0x453   : > { %v3785_v60 = vmax.f32 %v1633_v53, %v1634_v59  ;;  %v1933_v8 = vmax.f32 %v1931_v54, %v1932_v25  ;;  %v3215_v9 = vpop.eup %3214  ;;  %v3798_v26 = vmul.f32 %v3213_v13, %v3611_v18  ;;  %3234 = vpow2.f32 %v1344_v19 }
 0x454   : > { %v3217_v11 = vpop.eup %3216  ;;  %v3801_v29 = vmul.f32 %v3215_v9, %v3608_v17  ;;  %v454_v34 = vsel %vm420_vm10, %v3790_v4, 0.0 }
 0x455   : > { %v1637_v20 = vsub.f32 %v3732_v38, %v3785_v60  ;;  %v1934_v48 = vrot.slane %v1933_v8, 1  ;;  %v3219_v21 = vpop.eup %3218  ;;  %v1636_v24 = vsub.f32 %v3724_v31, %v3785_v60  ;;  %v3804_v1 = vmul.f32 %v3217_v11, %v3604_v16 }
 0x456   : > { %v3221_v30 = vpop.eup %3220  ;;  %v455_v31 = vadd.f32 %v454_v34, %v453_v15  ;;  %v752_v41 = vsel %vm420_vm10, %v3798_v26, 0.0  ;;  %v753_v42 = vsel %vm420_vm10, %v3801_v29, 0.0  ;;  %v3816_v43 = vmul.f32 %v3219_v21, %v3601_v12 }
 0x457   : > { %v3223_v38 = vpop.eup %3222  ;;  %v1642_v0 = vmul.f32 1.442695, %v1637_v20  ;;  %v3809_v40 = vmax.f32 %v1933_v8, %v1934_v48  ;;  %v1640_v39 = vmul.f32 1.442695, %v1636_v24  ;;  %v456_v35 = vsel %vm424_vm11, %v3804_v1, 0.0 }
 0x458   : > { %v3821_v2 = vmul.f32 %v3223_v38, %v3611_v18  ;;  %v3824_v46 = vmul.f32 %v3221_v30, %v3608_v17  ;;  %v3225_v49 = vpop.eup %3224  ;;  %v1638_v22 = vsub.f32 %v3716_v27, %v3785_v60  ;;  %v457_v32 = vadd.f32 %v456_v35, %v455_v31 }
 0x459   : > { %3236 = vpow2.f32 %v1642_v0  ;;  %v1936_v53 = vsub.f32 %v3750_v23, %v3809_v40  ;;  %v754_v54 = vadd.f32 %v753_v42, %v752_v41  ;;  %v3227_v33 = vpop.eup %3226  ;;  %v1937_v50 = vsub.f32 %v3759_v6, %v3809_v40 }
 0x45a   : > { %3238 = vpow2.f32 %v1640_v39  ;;  %v3229_v55 = vpop.eup %3228  ;;  %v3833_v58 = vmul.f32 %v3225_v49, %v3604_v16  ;;  %v755_v59 = vsel %vm420_vm10, %v3816_v43, 0.0  ;;  %v1052_v27 = vsel %vm420_vm10, %v3821_v2, 0.0 }
 0x45b   : > { %v1053_v25 = vsel %vm420_vm10, %v3824_v46, 0.0  ;;  %v3231_v23 = vpop.eup %3230  ;;  %3240 = vpow2.f32 %v1346_v52  ;;  %v1639_v61 = vsub.f32 %v3720_v28, %v3785_v60  ;;  %v1644_v6 = vmul.f32 1.442695, %v1638_v22 }
 0x45c   : > { %v458_v62 = vrot.slane %v457_v32, 4  ;;  %v1940_v36 = vmul.f32 1.442695, %v1936_v53  ;;  %v756_v63 = vadd.f32 %v755_v59, %v754_v54  ;;  %v3844_v5 = vmul.f32 %v3227_v33, %v3601_v12  ;;  %v3233_v44 = vpop.eup %3232 }
 0x45d   : > { %v1054_v13 = vadd.f32 %v1053_v25, %v1052_v27  ;;  %v1942_v7 = vmul.f32 1.442695, %v1937_v50  ;;  %v757_v8 = vsel %vm424_vm11, %v3833_v58, 0.0  ;;  %v3849_v3 = vmul.f32 %v3231_v23, %v3611_v18  ;;  %v3235_v15 = vpop.eup %3234 }
 0x45e   : > { %v3852_v9 = vmul.f32 %v3229_v55, %v3608_v17  ;;  %3242 = vpow2.f32 %v1644_v6  ;;  %v1646_v28 = vmul.f32 1.442695, %v1639_v61  ;;  %v1938_v60 = vsub.f32 %v3742_v47, %v3809_v40 }
 0x45f   : > { %v459_v10 = vadd.f32 %v458_v62, %v457_v32  ;;  %v3857_v11 = vmul.f32 %v3233_v44, %v3604_v16  ;;  %3244 = vpow2.f32 %v1940_v36  ;;  %v758_v45 = vadd.f32 %v757_v8, %v756_v63 }
 0x460   : > { %v1055_v14 = vsel %vm420_vm10, %v3844_v5, 0.0  ;;  %3246 = vpow2.f32 %v1942_v7  ;;  %v1352_v21 = vsel %vm420_vm10, %v3849_v3, 0.0  ;;  %v1353_v24 = vsel %vm420_vm10, %v3852_v9, 0.0 }
 0x461   : > { %v1056_v20 = vadd.f32 %v1055_v14, %v1054_v13  ;;  %3248 = vpow2.f32 %v1646_v28  ;;  %v1939_v30 = vsub.f32 %v3746_v57, %v3809_v40  ;;  %v1944_v34 = vmul.f32 1.442695, %v1938_v60 }
 0x462   : > { %v460_v19 = vrot.slane %v459_v10, 2  ;;  %v759_v42 = vrot.slane %v758_v45, 4  ;;  %v1057_v39 = vsel %vm424_vm11, %v3857_v11, 0.0  ;;  %v3871_v35 = vmul.f32 %v3235_v15, %v3601_v12 }
 0x463   : > { %v3237_v48 = vpop.eup %3236  ;;  %v1058_v57 = vadd.f32 %v1057_v39, %v1056_v20  ;;  %v1354_v40 = vadd.f32 %v1353_v24, %v1352_v21  ;;  %3250 = vpow2.f32 %v1944_v34  ;;  %v1946_v53 = vmul.f32 1.442695, %v1939_v30 }
 0x464   : > { %v3239_v47 = vpop.eup %3238  ;;  %v3878_v32 = vmul.f32 %v3237_v48, %v3608_v17  ;;  %v461_v50 = vadd.f32 %v460_v19, %v459_v10  ;;  %v760_v23 = vadd.f32 %v759_v42, %v758_v45  ;;  %v1355_v61 = vsel %vm420_vm10, %v3871_v35, 0.0 }
 0x465   : > { %v3241_v49 = vpop.eup %3240  ;;  %v3875_v22 = vmul.f32 %v3239_v47, %v3611_v18  ;;  %v1059_v36 = vrot.slane %v1058_v57, 4  ;;  %v1356_v63 = vadd.f32 %v1355_v61, %v1354_v40  ;;  %3252 = vpow2.f32 %v1946_v53 }
 0x466   : > { %v3881_v55 = vmul.f32 %v3241_v49, %v3604_v16  ;;  %v1653_v7 = vsel %vm420_vm10, %v3878_v32, 0.0  ;;  %v462_v28 = vrot.slane %v461_v50, 1  ;;  %v761_v10 = vrot.slane %v760_v23, 2 }
 0x467   : > { %v1652_v13 = vsel %vm420_vm10, %v3875_v22, 0.0  ;;  %v1060_v48 = vadd.f32 %v1059_v36, %v1058_v57 }
 0x468   : > { %v3243_v6 = vpop.eup %3242  ;;  %v1357_v45 = vsel %vm424_vm11, %v3881_v55, 0.0  ;;  %v1654_v24 = vadd.f32 %v1653_v7, %v1652_v13  ;;  %v463_v34 = vadd.f32 %v462_v28, %v461_v50  ;;  %v762_v19 = vadd.f32 %v761_v10, %v760_v23 }
 0x469   : > { %v3245_v44 = vpop.eup %3244  ;;  %v3895_v14 = vmul.f32 %v3243_v6, %v3601_v12  ;;  %v1358_v21 = vadd.f32 %v1357_v45, %v1356_v63  ;;  %v1061_v42 = vrot.slane %v1060_v48, 2 }
 0x46a   : > { %v3247_v8 = vpop.eup %3246  ;;  %v3899_v47 = vmul.f32 %v3245_v44, %v3611_v18  ;;  %3254 = vrcp.f32 %v463_v34  ;;  %v763_v40 = vrot.slane %v762_v19, 1 }
 0x46b   : > { %v3249_v15 = vpop.eup %3248  ;;  %v3902_v30 = vmul.f32 %v3247_v8, %v3608_v17  ;;  %v1359_v39 = vrot.slane %v1358_v21, 4  ;;  %v1062_v50 = vadd.f32 %v1061_v42, %v1060_v48 }
 0x46c   : > { %v764_v61 = vadd.f32 %v763_v40, %v762_v19 }
 0x46d   : > { %v1953_v57 = vsel %vm420_vm10, %v3902_v30, 0.0 }
 0x46e   : > { %3256 = vrcp.f32 %v764_v61 }
 0x499   : > { %v3073_v38 = vpop.f32.mrb[28].mxu1 }
 0x49a   : > { %v3095_v37 = vpop.f32.mrb[28].mxu0  ;;  %v2188_v31 = vpop.f32.mrb[29].mxu1  ;;  %v2210_v41 = vsel %vm398_vm4, %v3073_v38, 0.0  ;;  %v3905_v38 = vmul.f32 %v3249_v15, %v3604_v16 }
 0x49b   : > { %v2488_v0 = vpop.f32.mrb[29].mxu0  ;;  %2211 = vadd.xlane.f32.xlu1 %v2210_v41  ;;  %v2207_v52 = vsel %vm398_vm4, %v2188_v31, 0.0  ;;  %v2510_v25 = vsel %vm398_vm4, %v3095_v37, 0.0  ;;  %v1655_v31 = vsel %vm420_vm10, %v3895_v14, 0.0 }
 0x49c   : > { %2208 = vadd.xlane.f32.xlu0 %v2207_v52  ;;  %v2507_v62 = vsel %vm398_vm4, %v2488_v0, 0.0  ;;  %v3251_v0 = vpop.eup %3250  ;;  %v1656_v49 = vadd.f32 %v1655_v31, %v1654_v24  ;;  %v1952_v52 = vsel %vm420_vm10, %v3899_v47, 0.0  ;;  %v1657_v53 = vsel %vm424_vm11, %v3905_v38, 0.0 }
 0x49d   : > { %v3076_v54 = vpop.f32.mrb[30].mxu1 }
 0x49e   : > { %v3098_v33 = vpop.f32.mrb[30].mxu0  ;;  %v2198_v59 = vpop.f32.mrb[31].mxu1  ;;  %v2216_v60 = vsel %vm408_vm5, %v3076_v54, 0.0  ;;  %v3918_v54 = vmul.f32 %v3251_v0, %v3601_v12 }
 0x49f   : > { %v2498_v27 = vpop.f32.mrb[31].mxu0  ;;  %2511 = vadd.xlane.f32.xlu1 %v2510_v25  ;;  %v2213_v20 = vsel %vm398_vm4, %v2198_v59, 0.0  ;;  %v2516_v37 = vsel %vm408_vm5, %v3098_v33, 0.0  ;;  %v3253_v33 = vpop.eup %3252  ;;  %v1360_v59 = vadd.f32 %v1359_v39, %v1358_v21  ;;  %v1954_v25 = vadd.f32 %v1953_v57, %v1952_v52 }
 0x4a0   : > { %2508 = vadd.xlane.f32.xlu0 %v2507_v62  ;;  %v2513_v41 = vsel %vm398_vm4, %v2498_v27, 0.0  ;;  %v1658_v27 = vadd.f32 %v1657_v53, %v1656_v49  ;;  %v3921_v23 = vmul.f32 %v3253_v33, %v3604_v16  ;;  %v1955_v6 = vsel %vm420_vm10, %v3918_v54, 0.0  ;;  %v3255_v7 = vpop.eup %3254 }
 0x4a1   : > { %v1063_v62 = vrot.slane %v1062_v50, 1  ;;  %v1361_v36 = vrot.slane %v1360_v59, 2  ;;  %v1956_v44 = vadd.f32 %v1955_v6, %v1954_v25  ;;  %v466_v45 = vmul.f32 %v3255_v7, %v3778_v51  ;;  %v3257_v19 = vpop.eup %3256 }
 0x4a2   : > { %v1659_v63 = vrot.slane %v1658_v27, 4  ;;  %v1957_v13 = vsel %vm424_vm11, %v3921_v23, 0.0  ;;  %v467_v21 = vmul.f32 %v3255_v7, %v3790_v4  ;;  %v465_v31 = vmul.f32 %v3255_v7, %v3775_v56 }
 0x4a3   : > { %2217 = vadd.xlane.f32.xlu1 %v2216_v60  ;;  %v1064_v8 = vadd.f32 %v1063_v62, %v1062_v50  ;;  %v1362_v28 = vadd.f32 %v1361_v36, %v1360_v59  ;;  %v1958_v10 = vadd.f32 %v1957_v13, %v1956_v44  ;;  %v468_v0 = vmul.f32 %v3255_v7, %v3804_v1 }
 0x4a4   : > { %2214 = vadd.xlane.f32.xlu0 %v2213_v20  ;;  %v1660_v60 = vadd.f32 %v1659_v63, %v1658_v27  ;;  %v767_v42 = vmul.f32 %v3257_v19, %v3801_v29  ;;  %v766_v4 = vmul.f32 %v3257_v19, %v3798_v26  ;;  %v768_v56 = vmul.f32 %v3257_v19, %v3816_v43 }
 0x4a5   : > { %3258 = vrcp.f32 %v1064_v8  ;;  %v1363_v15 = vrot.slane %v1362_v28, 1  ;;  %v1959_v48 = vrot.slane %v1958_v10, 4  ;;  %v769_v29 = vmul.f32 %v3257_v19, %v3833_v58 }
 0x4a6   : > { %v1661_v20 = vrot.slane %v1660_v60, 2 }
 0x4a7   : > { %2517 = vadd.xlane.f32.xlu1 %v2516_v37  ;;  %v1364_v24 = vadd.f32 %v1363_v15, %v1362_v28  ;;  %v1960_v37 = vadd.f32 %v1959_v48, %v1958_v10 }
 0x4a8   : > { %2514 = vadd.xlane.f32.xlu0 %v2513_v41  ;;  %v1662_v34 = vadd.f32 %v1661_v20, %v1660_v60 }
 0x4a9   : > { %3260 = vrcp.f32 %v1364_v24  ;;  %v1961_v51 = vrot.slane %v1960_v37, 2 }
 0x4aa   : > { %v1663_v41 = vrot.slane %v1662_v34, 1 }
 0x4ab   : > { %v1962_v52 = vadd.f32 %v1961_v51, %v1960_v37 }
 0x4ac   : > { %v1664_v49 = vadd.f32 %v1663_v41, %v1662_v34 }
 0x4ad   : > { %v1963_v1 = vrot.slane %v1962_v52, 1 }
 0x4ae   : > { %3262 = vrcp.f32 %v1664_v49 }
 0x4af   : > { %v3259_v39 = vpop.eup %3258  ;;  %v1964_v33 = vadd.f32 %v1963_v1, %v1962_v52  ;;  %v3288_v1 = vld [vmem:[%s3378_s19] sm:$0xff] }
 0x4b0   : > { %v1066_v57 = vmul.f32 %v3259_v39, %v3821_v2  ;;  %v1069_v40 = vmul.f32 %v3259_v39, %v3857_v11  ;;  %v1067_v50 = vmul.f32 %v3259_v39, %v3824_v46  ;;  %v1068_v59 = vmul.f32 %v3259_v39, %v3844_v5 }
 0x4b1   : > { %3264 = vrcp.f32 %v1964_v33 }
 0x4b3   : > { %v3261_v53 = vpop.eup %3260 }
 0x4b4   : > { %v1366_v26 = vmul.f32 %v3261_v53, %v3849_v3  ;;  %v1369_v43 = vmul.f32 %v3261_v53, %v3881_v55  ;;  %v1367_v58 = vmul.f32 %v3261_v53, %v3852_v9  ;;  %v1368_v46 = vmul.f32 %v3261_v53, %v3871_v35 }
 0x4b8   : > { %476 = vperm.xlu1 %3205, %v466_v45   ;;  %v3263_v2 = vpop.eup %3262 }
 0x4b9   : > { %v1666_v11 = vmul.f32 %v3263_v2, %v3875_v22  ;;  %v1669_v3 = vmul.f32 %v3263_v2, %v3905_v38  ;;  %v1667_v25 = vmul.f32 %v3263_v2, %v3878_v32  ;;  %v1668_v22 = vmul.f32 %v3263_v2, %v3895_v14  ;;  %v3289_v2 = vld [vmem:[%s3378_s19 + $0x18] sm:$0x1] }
 0x4bb   : > { %v3265_v27 = vpop.eup %3264 }
 0x4bc   : > { %481 = vperm.xlu1 %3205, %v467_v21   ;;  %v1967_v55 = vmul.f32 %v3265_v27, %v3902_v30  ;;  %v1969_v5 = vmul.f32 %v3265_v27, %v3921_v23  ;;  %v1966_v9 = vmul.f32 %v3265_v27, %v3899_v47  ;;  %v1968_v38 = vmul.f32 %v3265_v27, %v3918_v54 }
 0x4be   : > { %471 = vperm.xlu0 %3204, %v465_v31  }
 0x4c0   : > { %486 = vperm.xlu1 %3205, %v468_v0  }
 0x4c2   : > { %777 = vperm.xlu0 %3204, %v767_v42   ;;  %v3286_v42 = vld [vmem:[%s3378_s19 + $0x8] sm:$0xff] }
 0x4c4   : > { %772 = vperm.xlu1 %3205, %v766_v4  }
 0x4c6   : > { %1072 = vperm.xlu0 %3204, %v1066_v57   ;;  %v3287_v57 = vld [vmem:[%s3378_s19 + $0x10] sm:$0xff] }
 0x4c8   : > { %782 = vperm.xlu1 %3205, %v768_v56  }
 0x4ca   : > { %1087 = vperm.xlu0 %3204, %v1069_v40  }
 0x4cc   : > { %787 = vperm.xlu1 %3205, %v769_v29  }
 0x4ce   : > { %1372 = vperm.xlu0 %3204, %v1366_v26  }
 0x4d0   : > { %1077 = vperm.xlu1 %3205, %v1067_v50  }
 0x4d2   : > { %1387 = vperm.xlu0 %3204, %v1369_v43  }
 0x4d4   : > { %1082 = vperm.xlu1 %3205, %v1068_v59  }
 0x4d6   : > { %1672 = vperm.xlu0 %3204, %v1666_v11  }
 0x4d8   : > { %1377 = vperm.xlu1 %3205, %v1367_v58  }
 0x4da   : > { %1687 = vperm.xlu0 %3204, %v1669_v3  }
 0x4dc   : > { %1382 = vperm.xlu1 %3205, %v1368_v46  }
 0x4de   : > { %1977 = vperm.xlu0 %3204, %v1967_v55  }
 0x4e0   : > { %1677 = vperm.xlu1 %3205, %v1667_v25   ;;  %v3290_v25 = vld [vmem:[%s3378_s19 + $0x28] sm:$0xff] }
 0x4e2   : > { %1987 = vperm.xlu0 %3204, %v1969_v5  }
 0x4e4   : > { %1682 = vperm.xlu1 %3205, %v1668_v22  }
 0x4e8   : > { %1972 = vperm.xlu1 %3205, %v1966_v9  }
 0x4ec   : > { %1982 = vperm.xlu1 %3205, %v1968_v38  }
 0x528   : > { %v2212_v35 = vpop.xlane.xlu1 %2211 }
 0x529   : > { %v2209_v61 = vpop.xlane.xlu0 %2208  ;;  %v3953_v32 = vsel %vm413_vm8, %v2212_v35, -1e+30 }
 0x52a   : > { %v3957_v23 = vsel %vm412_vm9, %v2209_v61, -1e+30  ;;  %v2224_v47 = vsel %vm420_vm10, %v3953_v32, -inf }
 0x52b   : > { %v2223_v54 = vsel %vm420_vm10, %v3957_v23, -inf }
 0x52c   : > { %v2512_v6 = vpop.xlane.xlu1 %2511  ;;  %v2227_v17 = vmax.f32 %v2223_v54, %v2224_v47 }
 0x52d   : > { %v2509_v30 = vpop.xlane.xlu0 %2508  ;;  %v3965_v62 = vsel %vm413_vm8, %v2512_v6, -1e+30 }
 0x52e   : > { %v3973_v44 = vsel %vm412_vm9, %v2509_v30, -1e+30  ;;  %v2524_v10 = vsel %vm420_vm10, %v3965_v62, -inf }
 0x52f   : > { %v2523_v18 = vsel %vm420_vm10, %v3973_v44, -inf }
 0x530   : > { %v2218_v14 = vpop.xlane.xlu1 %2217  ;;  %v2527_v34 = vmax.f32 %v2523_v18, %v2524_v10 }
 0x531   : > { %v3969_v36 = vsel %vm415_vm7, %v2218_v14, -1e+30  ;;  %v2215_v63 = vpop.xlane.xlu0 %2214  ;;  %v3291_v14 = vld [vmem:[%s3378_s19 + $0x20] sm:$0xff] }
 0x532   : > { %v2226_v13 = vsel %vm424_vm11, %v3969_v36, -inf  ;;  %v2221_v7 = vsel %vm414_vm6, %v2215_v63, -1e+30 }
 0x533   : > { %v2225_v8 = vsel %vm420_vm10, %v2221_v7, -inf }
 0x534   : > { %v2228_v28 = vmax.f32 %v2225_v8, %v2226_v13  ;;  %v2518_v60 = vpop.xlane.xlu1 %2517 }
 0x535   : > { %v3986_v45 = vsel %vm415_vm7, %v2518_v60, -1e+30  ;;  %v2515_v15 = vpop.xlane.xlu0 %2514 }
 0x536   : > { %v2229_v20 = vmax.f32 %v2227_v17, %v2228_v28  ;;  %v2526_v48 = vsel %vm424_vm11, %v3986_v45, -inf  ;;  %v3992_v21 = vsel %vm414_vm6, %v2515_v15, -1e+30 }
 0x537   : > { %v2525_v24 = vsel %vm420_vm10, %v3992_v21, -inf }
 0x538   : > { %v2230_v37 = vrot.slane %v2229_v20, 4  ;;  %v2528_v19 = vmax.f32 %v2525_v24, %v2526_v48  ;;  %v477_v16 = vpop.permute.xlu1 %476  ;;  %v3292_v24 = vld [vmem:[%s3378_s19 + $0x30] sm:$0xff] }
 0x539   : > { %v490_v39 = vmul.f32 %v3286_v42, %v477_v16 }
 0x53a   : > { %v2231_v31 = vmax.f32 %v2229_v20, %v2230_v37  ;;  %v2529_v0 = vmax.f32 %v2527_v34, %v2528_v19 }
 0x53b   : > { %v494_v33 = vsel %vm198_vm1, %v490_v39, 0.0 }
 0x53c   : > { %v2232_v41 = vrot.slane %v2231_v31, 2  ;;  %v2530_v51 = vrot.slane %v2529_v0, 4  ;;  %v482_v4 = vpop.permute.xlu1 %481 }
 0x53d   : > { %v472_v12 = vpop.permute.xlu0 %471  ;;  %v491_v56 = vmul.f32 %v3287_v57, %v482_v4  ;;  %v3294_v57 = vld [vmem:[%s3378_s19 + $0x40] sm:$0xff] }
 0x53e   : > { %v2233_v49 = vmax.f32 %v2231_v31, %v2232_v41  ;;  %v2531_v52 = vmax.f32 %v2529_v0, %v2530_v51  ;;  %v489_v40 = vmul.f32 %v3288_v1, %v472_v12  ;;  %v3295_v1 = vld [vmem:[%s3378_s19 + $0x48] sm:$0xff] }
 0x53f   : > { %v496_v27 = vsel %vm198_vm1, %v491_v56, 0.0 }
 0x540   : > { %v2234_v53 = vrot.slane %v2233_v49, 1  ;;  %v2532_v29 = vrot.slane %v2531_v52, 2  ;;  %v493_v26 = vsel %vm198_vm1, %v489_v40, 0.0  ;;  %v487_v50 = vpop.permute.xlu1 %486 }
 0x541   : > { %v495_v43 = vadd.f32 %v494_v33, %v493_v26  ;;  %v492_v59 = vmul.f32 %v3289_v2, %v487_v50  ;;  %v778_v11 = vpop.permute.xlu0 %777 }
 0x542   : > { %v2235_v58 = vmax.f32 %v2233_v49, %v2234_v53  ;;  %v2533_v3 = vmax.f32 %v2531_v52, %v2532_v29  ;;  %v791_v5 = vmul.f32 %v3290_v25, %v778_v11  ;;  %v3297_v11 = vld [vmem:[%s3598_s23] sm:$0xff]  ;;  %v3298_v25 = vld [vmem:[%s3598_s23 + $0x10] sm:$0xff] }
 0x543   : > { %v497_v46 = vadd.f32 %v496_v27, %v495_v43  ;;  %v499_v55 = vsel %vm498_vm12, %v492_v59, 0.0  ;;  %v3296_v43 = vld [vmem:[%s3378_s19 + $0x58] sm:$0x1] }
 0x544   : > { %v2236_v22 = vsub.f32 %v3957_v23, %v2235_v58  ;;  %v2237_v9 = vsub.f32 %v3953_v32, %v2235_v58  ;;  %v2238_v38 = vsub.f32 %v2221_v7, %v2235_v58  ;;  %v2239_v35 = vsub.f32 %v3969_v36, %v2235_v58  ;;  %v773_v61 = vpop.permute.xlu1 %772 }
 0x545   : > { %v2534_v6 = vrot.slane %v2533_v3, 1  ;;  %v500_v30 = vadd.f32 %v499_v55, %v497_v46  ;;  %v790_v47 = vmul.f32 %v3291_v14, %v773_v61  ;;  %v1073_v54 = vpop.permute.xlu0 %1072  ;;  %v795_v23 = vsel %vm198_vm1, %v791_v5, 0.0  ;;  %v3301_v14 = vld [vmem:[%s3598_s23 + $0x8] sm:$0xff] }
 0x546   : > { %v2240_v63 = vmul.f32 1.442695, %v2236_v22  ;;  %v2244_v13 = vmul.f32 1.442695, %v2238_v38  ;;  %v2246_v8 = vmul.f32 1.442695, %v2239_v35  ;;  %v1090_v56 = vmul.f32 %v3294_v57, %v1073_v54 }
 0x547   : > { %v2535_v17 = vmax.f32 %v2533_v3, %v2534_v6  ;;  %v501_v28 = vrot.slane %v500_v30, 4  ;;  %v2242_v60 = vmul.f32 1.442695, %v2237_v9  ;;  %v794_v32 = vsel %vm198_vm1, %v790_v47, 0.0  ;;  %v3299_v9 = vld [vmem:[%s3378_s19 + $0x60] sm:$0xff]  ;;  %v3300_v35 = vld [vmem:[%s3378_s19 + $0x50] sm:$0xff] }
 0x548   : > { %3266 = vpow2.f32 %v2240_v63  ;;  %v783_v7 = vpop.permute.xlu1 %782  ;;  %v796_v16 = vadd.f32 %v795_v23, %v794_v32  ;;  %v1094_v22 = vsel %vm198_vm1, %v1090_v56, 0.0 }
 0x549   : > { %3268 = vpow2.f32 %v2244_v13  ;;  %v2536_v36 = vsub.f32 %v3973_v44, %v2535_v17  ;;  %v2537_v10 = vsub.f32 %v3965_v62, %v2535_v17  ;;  %v2538_v18 = vsub.f32 %v3992_v21, %v2535_v17  ;;  %v1088_v15 = vpop.permute.xlu0 %1087  ;;  %v3293_v21 = vld [vmem:[%s3378_s19 + $0x38] sm:$0x1] }
 0x54a   : > { %3270 = vpow2.f32 %v2246_v8  ;;  %v2539_v20 = vsub.f32 %v3986_v45, %v2535_v17  ;;  %v502_v48 = vadd.f32 %v501_v28, %v500_v30  ;;  %v792_v34 = vmul.f32 %v3292_v24, %v783_v7  ;;  %v3302_v7 = vld [vmem:[%s3598_s23 + $0x18] sm:$0x1] }
 0x54b   : > { %v2540_v37 = vmul.f32 1.442695, %v2536_v36  ;;  %v2544_v19 = vmul.f32 1.442695, %v2538_v18  ;;  %3272 = vpow2.f32 %v2242_v60  ;;  %v2542_v41 = vmul.f32 1.442695, %v2537_v10 }
 0x54c   : > { %v2546_v31 = vmul.f32 1.442695, %v2539_v20  ;;  %v503_v0 = vrot.slane %v502_v48, 2  ;;  %v797_v44 = vsel %vm198_vm1, %v792_v34, 0.0  ;;  %v788_v62 = vpop.permute.xlu1 %787  ;;  %v1093_v2 = vmul.f32 %v3296_v43, %v1088_v15  ;;  %v3303_v20 = vld [vmem:[%s3378_s19 + $0x68] sm:$0xff] }
 0x54d   : > { %3274 = vpow2.f32 %v2540_v37  ;;  %v793_v51 = vmul.f32 %v3293_v21, %v788_v62  ;;  %v1373_v45 = vpop.permute.xlu0 %1372  ;;  %v798_v39 = vadd.f32 %v797_v44, %v796_v16 }
 0x54e   : > { %3276 = vpow2.f32 %v2544_v19  ;;  %v504_v42 = vadd.f32 %v503_v0, %v502_v48  ;;  %v1390_v38 = vmul.f32 %v3299_v9, %v1373_v45  ;;  %v1099_v13 = vsel %vm498_vm12, %v1093_v2, 0.0  ;;  %v3304_v45 = vld [vmem:[%s3378_s19 + $0x78] sm:$0x1] }
 0x54f   : > { %3278 = vpow2.f32 %v2546_v31  ;;  %v799_v4 = vsel %vm498_vm12, %v793_v51, 0.0 }
 0x550   : > { %v505_v12 = vrot.slane %v504_v42, 1  ;;  %v800_v49 = vadd.f32 %v799_v4, %v798_v39  ;;  %v1078_v52 = vpop.permute.xlu1 %1077  ;;  %3280 = vpow2.f32 %v2542_v41  ;;  %v1394_v15 = vsel %vm198_vm1, %v1390_v38, 0.0 }
 0x551   : > { %v1091_v40 = vmul.f32 %v3295_v1, %v1078_v52  ;;  %v1388_v26 = vpop.permute.xlu0 %1387 }
 0x552   : > { %v3267_v53 = vpop.eup %3266  ;;  %v506_v29 = vadd.f32 %v505_v12, %v504_v42  ;;  %v801_v33 = vrot.slane %v800_v49, 4  ;;  %v1393_v42 = vmul.f32 %v3304_v45, %v1388_v26 }
 0x553   : > { %v3269_v50 = vpop.eup %3268  ;;  %v1095_v59 = vsel %vm198_vm1, %v1091_v40, 0.0  ;;  %v4030_v58 = vmul.f32 %v3297_v11, %v3267_v53 }
 0x554   : > { %v3271_v3 = vpop.eup %3270  ;;  %507 = vst.msk [vmem:[%s4023_s27] sm:$0x1] %vm498_vm12, %v506_v29  ;;  %v802_v27 = vadd.f32 %v801_v33, %v800_v49  ;;  %v1083_v46 = vpop.permute.xlu1 %1082  ;;  %v4035_v5 = vmul.f32 %v3298_v25, %v3269_v50  ;;  %v1096_v30 = vadd.f32 %v1095_v59, %v1094_v22  ;;  %v3305_v49 = vld [vmem:[%s3378_s19 + $0x70] sm:$0xff]  ;;  %v1399_v2 = vsel %vm498_vm12, %v1393_v42, 0.0 }
 0x555   : > { %v3273_v55 = vpop.eup %3272  ;;  %v1092_v61 = vmul.f32 %v3300_v35, %v1083_v46  ;;  %v2252_v54 = vsel %vm420_vm10, %v4030_v58, 0.0  ;;  %v1673_v23 = vpop.permute.xlu0 %1672  ;;  %v4048_v36 = vmul.f32 %v3302_v7, %v3271_v3  ;;  %v3306_v46 = vld [vmem:[%s3378_s19 + $0x80] sm:$0xff] }
 0x556   : > { %v803_v6 = vrot.slane %v802_v27, 2  ;;  %v4041_v47 = vmul.f32 %v3301_v14, %v3273_v55  ;;  %v2255_v0 = vsel %vm420_vm10, %v4035_v5, 0.0  ;;  %v1690_v55 = vmul.f32 %v3306_v46, %v1673_v23  ;;  %v3309_v23 = vld [vmem:[%s3378_s19 + $0x90] sm:$0xff] }
 0x557   : > { %v3275_v63 = vpop.eup %3274  ;;  %v1097_v8 = vsel %vm198_vm1, %v1092_v61, 0.0  ;;  %v2257_v12 = vsel %vm424_vm11, %v4048_v36, 0.0 }
 0x558   : > { %v3277_v17 = vpop.eup %3276  ;;  %v804_v28 = vadd.f32 %v803_v6, %v802_v27  ;;  %v1098_v60 = vadd.f32 %v1097_v8, %v1096_v30  ;;  %v1378_v32 = vpop.permute.xlu1 %1377  ;;  %v2253_v10 = vsel %vm420_vm10, %v4041_v47, 0.0  ;;  %v4054_v34 = vmul.f32 %v3297_v11, %v3275_v63  ;;  %v3308_v63 = vld [vmem:[%s3378_s19 + $0x98] sm:$0x1] }
 0x559   : > { %v3279_v18 = vpop.eup %3278  ;;  %v1391_v48 = vmul.f32 %v3303_v20, %v1378_v32  ;;  %v2254_v24 = vadd.f32 %v2253_v10, %v2252_v54  ;;  %v4056_v19 = vmul.f32 %v3298_v25, %v3277_v17  ;;  %v1688_v29 = vpop.permute.xlu0 %1687  ;;  %v3307_v25 = vld [vmem:[%s3378_s19 + $0x88] sm:$0xff] }
 0x55a   : > { %v3281_v37 = vpop.eup %3280  ;;  %v805_v16 = vrot.slane %v804_v28, 1  ;;  %v1100_v31 = vadd.f32 %v1099_v13, %v1098_v60  ;;  %v2552_v21 = vsel %vm420_vm10, %v4054_v34, 0.0  ;;  %v4069_v56 = vmul.f32 %v3302_v7, %v3279_v18 }
 0x55b   : > { %v1395_v44 = vsel %vm198_vm1, %v1391_v48, 0.0  ;;  %v2256_v62 = vadd.f32 %v2255_v0, %v2254_v24  ;;  %v4061_v41 = vmul.f32 %v3301_v14, %v3281_v37  ;;  %v2555_v43 = vsel %vm420_vm10, %v4056_v19, 0.0 }
 0x55c   : > { %v806_v51 = vadd.f32 %v805_v16, %v804_v28  ;;  %v1101_v39 = vrot.slane %v1100_v31, 4  ;;  %v1383_v4 = vpop.permute.xlu1 %1382  ;;  %v1396_v53 = vadd.f32 %v1395_v44, %v1394_v15  ;;  %v2557_v38 = vsel %vm424_vm11, %v4069_v56, 0.0 }
 0x55d   : > { %v1392_v52 = vmul.f32 %v3305_v49, %v1383_v4  ;;  %v2258_v57 = vadd.f32 %v2257_v12, %v2256_v62  ;;  %v2553_v1 = vsel %vm420_vm10, %v4061_v41, 0.0  ;;  %v1693_v13 = vmul.f32 %v3308_v63, %v1688_v29  ;;  %v1978_v17 = vpop.permute.xlu0 %1977  ;;  %v3310_v62 = vld [vmem:[%s3378_s19 + $0xa8] sm:$0xff] }
 0x55e   : > { %807 = vst.msk [vmem:[%s4023_s27 + $0x1] sm:$0x1] %vm498_vm12, %v806_v51  ;;  %v1102_v40 = vadd.f32 %v1101_v39, %v1100_v31  ;;  %v2554_v33 = vadd.f32 %v2553_v1, %v2552_v21  ;;  %v1694_v60 = vsel %vm198_vm1, %v1690_v55, 0.0  ;;  %v1991_v21 = vmul.f32 %v3310_v62, %v1978_v17  ;;  %v3311_v51 = vld [vmem:[%s3378_s19 + $0xa0] sm:$0xff] }
 0x55f   : > { %v1397_v26 = vsel %vm198_vm1, %v1392_v52, 0.0  ;;  %v2259_v50 = vrot.slane %v2258_v57, 4  ;;  %v1699_v16 = vsel %vm498_vm12, %v1693_v13, 0.0 }
 0x560   : > { %v1103_v59 = vrot.slane %v1102_v40, 2  ;;  %v1398_v11 = vadd.f32 %v1397_v26, %v1396_v53  ;;  %v1678_v3 = vpop.permute.xlu1 %1677  ;;  %v2556_v27 = vadd.f32 %v2555_v43, %v2554_v33  ;;  %v1995_v29 = vsel %vm198_vm1, %v1991_v21, 0.0  ;;  %v3312_v33 = vld [vmem:[%s3378_s19 + $0xb8] sm:$0x1] }
 0x561   : > { %v1691_v22 = vmul.f32 %v3307_v25, %v1678_v3  ;;  %v2260_v9 = vadd.f32 %v2259_v50, %v2258_v57  ;;  %v1988_v12 = vpop.permute.xlu0 %1987  ;;  %v3313_v50 = vld [vmem:[%s3378_s19 + $0xb0] sm:$0xff] }
 0x562   : > { %v1104_v35 = vadd.f32 %v1103_v59, %v1102_v40  ;;  %v1400_v61 = vadd.f32 %v1399_v2, %v1398_v11  ;;  %v2558_v6 = vadd.f32 %v2557_v38, %v2556_v27  ;;  %v1993_v26 = vmul.f32 %v3312_v33, %v1988_v12 }
 0x563   : > { %v1695_v30 = vsel %vm198_vm1, %v1691_v22, 0.0  ;;  %v2261_v14 = vrot.slane %v2260_v9, 2 }
 0x564   : > { %v1105_v54 = vrot.slane %v1104_v35, 1  ;;  %v1401_v8 = vrot.slane %v1400_v61, 4  ;;  %v1683_v28 = vpop.permute.xlu1 %1682  ;;  %v2559_v10 = vrot.slane %v2558_v6, 4  ;;  %v1696_v20 = vadd.f32 %v1695_v30, %v1694_v60 }
 0x565   : > { %v1692_v32 = vmul.f32 %v3309_v23, %v1683_v28  ;;  %v2262_v7 = vadd.f32 %v2261_v14, %v2260_v9  ;;  %v1999_v22 = vsel %vm498_vm12, %v1993_v26, 0.0  ;;  %v3321_v26 = vld [vmem:[%s3378_s19 + $0xf0] sm:$0xff] }
 0x566   : > { %v1106_v18 = vadd.f32 %v1105_v54, %v1104_v35  ;;  %v1402_v15 = vadd.f32 %v1401_v8, %v1400_v61  ;;  %v2560_v37 = vadd.f32 %v2559_v10, %v2558_v6 }
 0x567   : > { %v1697_v48 = vsel %vm198_vm1, %v1692_v32, 0.0  ;;  %v2263_v24 = vrot.slane %v2262_v7, 1 }
 0x568   : > { %1107 = vst.msk [vmem:[%s4023_s27 + $0x2] sm:$0x1] %vm498_vm12, %v1106_v18  ;;  %v1403_v31 = vrot.slane %v1402_v15, 2  ;;  %v1698_v0 = vadd.f32 %v1697_v48, %v1696_v20  ;;  %v1973_v44 = vpop.permute.xlu1 %1972  ;;  %v2561_v39 = vrot.slane %v2560_v37, 2  ;;  %v3314_v18 = vld [vmem:[%s3378_s19 + $0xc8] sm:$0xff]  ;;  %v3315_v20 = vld [vmem:[%s3378_s19 + $0xc0] sm:$0xff] }
 0x569   : > { %v1990_v45 = vmul.f32 %v3311_v51, %v1973_v44  ;;  %v2264_v42 = vadd.f32 %v2263_v24, %v2262_v7 }
 0x56a   : > { %v1404_v4 = vadd.f32 %v1403_v31, %v1402_v15  ;;  %v1700_v49 = vadd.f32 %v1699_v16, %v1698_v0  ;;  %v2562_v57 = vadd.f32 %v2561_v39, %v2560_v37  ;;  %v3317_v31 = vld [vmem:[%s3378_s19 + $0xd0] sm:$0xff] }
 0x56b   : > { %v1994_v52 = vsel %vm198_vm1, %v1990_v45, 0.0  ;;  %3282 = vrcp.f32 %v2264_v42  ;;  %v3318_v42 = vld [vmem:[%s3378_s19 + $0xe8] sm:$0xff] }
 0x56c   : > { %v1405_v1 = vrot.slane %v1404_v4, 1  ;;  %v1701_v40 = vrot.slane %v1700_v49, 4  ;;  %v1983_v53 = vpop.permute.xlu1 %1982  ;;  %v2563_v2 = vrot.slane %v2562_v57, 1  ;;  %v1996_v3 = vadd.f32 %v1995_v29, %v1994_v52  ;;  %v3320_v29 = vld [vmem:[%s3378_s19 + $0xf8] sm:$0x1] }
 0x56d   : > { %v1992_v43 = vmul.f32 %v3313_v50, %v1983_v53 }
 0x56e   : > { %v1406_v59 = vadd.f32 %v1405_v1, %v1404_v4  ;;  %v1702_v11 = vadd.f32 %v1701_v40, %v1700_v49  ;;  %v2564_v46 = vadd.f32 %v2563_v2, %v2562_v57  ;;  %v3319_v4 = vld [vmem:[%s3378_s19 + $0xe0] sm:$0xff] }
 0x56f   : > { %v1997_v27 = vsel %vm198_vm1, %v1992_v43, 0.0 }
 0x570   : > { %1407 = vst.msk [vmem:[%s4023_s27 + $0x3] sm:$0x1] %vm498_vm12, %v1406_v59  ;;  %v1703_v55 = vrot.slane %v1702_v11, 2  ;;  %v1998_v25 = vadd.f32 %v1997_v27, %v1996_v3  ;;  %3284 = vrcp.f32 %v2564_v46 }
 0x572   : > { %v1704_v9 = vadd.f32 %v1703_v55, %v1702_v11  ;;  %v2000_v38 = vadd.f32 %v1999_v22, %v1998_v25 }
 0x574   : > { %v1705_v35 = vrot.slane %v1704_v9, 1  ;;  %v2001_v61 = vrot.slane %v2000_v38, 4 }
 0x575   : > { %v3283_v6 = vpop.eup %3282 }
 0x576   : > { %v1706_v30 = vadd.f32 %v1705_v35, %v1704_v9  ;;  %v2002_v14 = vadd.f32 %v2001_v61, %v2000_v38  ;;  %v2267_v54 = vmul.f32 %v3283_v6, %v4041_v47  ;;  %v2266_v63 = vmul.f32 %v3283_v6, %v4030_v58 }
 0x577   : > { %v2269_v17 = vmul.f32 %v3283_v6, %v4048_v36  ;;  %v2268_v28 = vmul.f32 %v3283_v6, %v4035_v5 }
 0x578   : > { %1707 = vst.msk [vmem:[%s4023_s27 + $0x4] sm:$0x1] %vm498_vm12, %v1706_v30  ;;  %v2003_v13 = vrot.slane %v2002_v14, 2  ;;  %2277 = vperm.xlu0 %3204, %v2267_v54   ;;  %2272 = vperm.xlu1 %3205, %v2266_v63  }
 0x57a   : > { %v2004_v8 = vadd.f32 %v2003_v13, %v2002_v14  ;;  %v3285_v60 = vpop.eup %3284 }
 0x57b   : > { %v2567_v32 = vmul.f32 %v3285_v60, %v4061_v41  ;;  %v2566_v58 = vmul.f32 %v3285_v60, %v4054_v34  ;;  %v2569_v36 = vmul.f32 %v3285_v60, %v4069_v56  ;;  %v2568_v5 = vmul.f32 %v3285_v60, %v4056_v19  ;;  %v3316_v56 = vld [vmem:[%s3378_s19 + $0xd8] sm:$0x1] }
 0x57c   : > { %v2005_v23 = vrot.slane %v2004_v8, 1  ;;  %2287 = vperm.xlu0 %3204, %v2269_v17   ;;  %2282 = vperm.xlu1 %3205, %v2268_v28  }
 0x57e   : > { %v2006_v47 = vadd.f32 %v2005_v23, %v2004_v8 }
 0x580   : > { %2007 = vst.msk [vmem:[%s4023_s27 + $0x5] sm:$0x1] %vm498_vm12, %v2006_v47  ;;  %2577 = vperm.xlu0 %3204, %v2567_v32   ;;  %2572 = vperm.xlu1 %3205, %v2566_v58  }
 0x584   : > { %2587 = vperm.xlu0 %3204, %v2569_v36   ;;  %2582 = vperm.xlu1 %3205, %v2568_v5  }
 0x5f7   : > { %v2278_v7 = vpop.permute.xlu0 %2277  ;;  %v2273_v10 = vpop.permute.xlu1 %2272 }
 0x5f8   : > { %v2291_v15 = vmul.f32 %v3314_v18, %v2278_v7  ;;  %v2290_v41 = vmul.f32 %v3315_v20, %v2273_v10 }
 0x5fa   : > { %v2295_v34 = vsel %vm198_vm1, %v2291_v15, 0.0  ;;  %v2294_v48 = vsel %vm198_vm1, %v2290_v41, 0.0 }
 0x5fb   : > { %v2288_v24 = vpop.permute.xlu0 %2287  ;;  %v2283_v37 = vpop.permute.xlu1 %2282  ;;  %v2296_v0 = vadd.f32 %v2295_v34, %v2294_v48 }
 0x5fc   : > { %v2293_v16 = vmul.f32 %v3316_v56, %v2288_v24  ;;  %v2292_v19 = vmul.f32 %v3317_v31, %v2283_v37 }
 0x5fe   : > { %v2297_v44 = vsel %vm198_vm1, %v2292_v19, 0.0  ;;  %v2299_v45 = vsel %vm498_vm12, %v2293_v16, 0.0 }
 0x5ff   : > { %v2298_v62 = vadd.f32 %v2297_v44, %v2296_v0  ;;  %v2578_v21 = vpop.permute.xlu0 %2577  ;;  %v2573_v51 = vpop.permute.xlu1 %2572 }
 0x600   : > { %v2591_v39 = vmul.f32 %v3318_v42, %v2578_v21  ;;  %v2590_v12 = vmul.f32 %v3319_v4, %v2573_v51 }
 0x601   : > { %v2300_v49 = vadd.f32 %v2299_v45, %v2298_v62 }
 0x602   : > { %v2595_v52 = vsel %vm198_vm1, %v2591_v39, 0.0  ;;  %v2594_v57 = vsel %vm198_vm1, %v2590_v12, 0.0 }
 0x603   : > { %v2301_v1 = vrot.slane %v2300_v49, 4  ;;  %v2588_v40 = vpop.permute.xlu0 %2587  ;;  %v2583_v53 = vpop.permute.xlu1 %2582  ;;  %v2596_v2 = vadd.f32 %v2595_v52, %v2594_v57 }
 0x604   : > { %v2593_v33 = vmul.f32 %v3320_v29, %v2588_v40  ;;  %v2592_v50 = vmul.f32 %v3321_v26, %v2583_v53 }
 0x605   : > { %v2302_v43 = vadd.f32 %v2301_v1, %v2300_v49 }
 0x606   : > { %v2597_v59 = vsel %vm198_vm1, %v2592_v50, 0.0  ;;  %v2599_v27 = vsel %vm498_vm12, %v2593_v33, 0.0 }
 0x607   : > { %v2303_v11 = vrot.slane %v2302_v43, 2  ;;  %v2598_v3 = vadd.f32 %v2597_v59, %v2596_v2 }
 0x609   : > { %v2304_v46 = vadd.f32 %v2303_v11, %v2302_v43  ;;  %v2600_v55 = vadd.f32 %v2599_v27, %v2598_v3 }
 0x60b   : > { %v2305_v25 = vrot.slane %v2304_v46, 1  ;;  %v2601_v22 = vrot.slane %v2600_v55, 4 }
 0x60d   : > { %v2306_v9 = vadd.f32 %v2305_v25, %v2304_v46  ;;  %v2602_v38 = vadd.f32 %v2601_v22, %v2600_v55 }
 0x60f   : > { %2307 = vst.msk [vmem:[%s4023_s27 + $0x6] sm:$0x1] %vm498_vm12, %v2306_v9  ;;  %v2603_v35 = vrot.slane %v2602_v38, 2 }
 0x611   : > { %v2604_v61 = vadd.f32 %v2603_v35, %v2602_v38 }
 0x613   : > { %v2605_v6 = vrot.slane %v2604_v61, 1 }
 0x615   : > { %v2606_v30 = vadd.f32 %v2605_v6, %v2604_v61 }
 0x617   : > { %2607 = vst.msk [vmem:[%s4023_s27 + $0x7] sm:$0x1] %vm498_vm12, %v2606_v30 }
 0x618 PF: > { %s13_s12 = sadd.s32 1, %s3328_s12  }
 0x619   : > { %p10_p4 = scmp.ge.s32.totalorder %s13_s12, 9  }
 0x61b   :  { %12 = sbr.rel (!%p10_p4) target bundleno = 1 (0x1), region = 72 }

// kernel: emotion_attention_forward.10
= control target key start
LH: loop header
LB: loop body
LE: loop exit
PB: predicated region body
PF: predicated region fallthrough
CT: control target
= control target key end

     0   :  { %s628_s15 = smov 0   ;;  %s736_s0 = inlined_call_operand.vmem [shape: f32[8,62,5], index: 0, kind: input, shape index: {}]   ;;  %s737_s1 = inlined_call_operand.vmem [shape: f32[5,32], index: 1, kind: input, shape index: {}]   ;;  %s738_s2 = inlined_call_operand.vmem [shape: f32[32,5], index: 2, kind: input, shape index: {}]   ;;  %s739_s3 = inlined_call_operand.vmem [shape: f32[8,62,5], index: 3, kind: output, shape index: {0}]   ;;  %s740_s4 = inlined_call_operand.vmem [shape: f32[8,1,5], index: 4, kind: output, shape index: {1}]  }
   0x1 LB: > { %s532_s16 = sadd.s32 4294967295, %s598_s15   ;;  %p536_p0 = scmp.ge.s32.totalorder %s598_s15, 1  ;;  %s598_s15 = sphi %s628_s15, %s15_s15  }
   0x2   : > { %p165_p1 = scmp.lt.s32.totalorder %s598_s15, 9 }
   0x4   : > { %p166_p2 = pnand %p536_p0, %p165_p1 }
   0x5   : > { %v262_v0 = vld [vmem:[%s737_s1] sm:$0x1f] (!%p166_p2)  ;;  %vm266_vm0 = vcmask (!%p166_p2), 1044480   ;;  %p194_p3 = scmp.lt.s32.totalorder (!%p166_p2), %s532_s16, 7  ;;  %v600_v1 = vmov (!%p166_p2), 0.0   ;;  %vm601_vm1 = vmmov (!%p166_p2), 0  }
   0x6   : > { %169 = sbr.rel (%p166_p2) target bundleno = 516 (0x204), region = 32  ;;  %555 = vmatprep.subr.mxu0 (!%p166_p2), %v600_v1  ;;  %557 = vmatprep.mubr.msk.f32.mxu0 (!%p166_p2), %vm601_vm1, %v600_v1  ;;  %v341_v2 = vld [vmem:[%s738_s2] sm:$0xff] (!%p166_p2)  ;;  %v342_v3 = vld [vmem:[%s738_s2 + $0x8] sm:$0xff] (!%p166_p2)  ;;  %v602_v4 = vmov (!%p166_p2), 0.0|0.0   ;;  %vm215_vm2 = vcmask (!%p166_p2), 39936   ;;  %vm229_vm3 = vcmask (!%p166_p2), 37888  }
   0x7   : > { %556 = vmatpush3.msk.msra.mxu0 (!%p166_p2), %vm266_vm0, %v262_v0  ;;  %571 = vmatprep.subr.bf16.mxu1 (!%p166_p2), %v602_v4  ;;  %v572_v5 = vpack.c.bf16 (!%p166_p2), %v342_v3, %v341_v2  ;;  %vm260_vm4 = vcmask (!%p166_p2), 1040384   ;;  %v343_v58 = vld [vmem:[%s738_s2 + $0x10] sm:$0xff] (!%p166_p2)  ;;  %v344_v59 = vld [vmem:[%s738_s2 + $0x18] sm:$0xff] (!%p166_p2)  ;;  %vm345_vm5 = vcmask (!%p166_p2), 261120   ;;  %vm450_vm6 = vcmask (!%p166_p2), 32768  }
   0x8   : > { %568 = vmatprep.mubr.msk.f32.mxu1 (!%p166_p2), %vm601_vm1, %v600_v1  ;;  %v575_v60 = vpack.c.bf16 (!%p166_p2), %v344_v59, %v343_v58 }
   0x9   : > { %573 = vmatpush3.bf16.msra.mxu1 (!%p166_p2), %v572_v5 }
   0xa   : > { %574 = vmatprep.subr.bf16.mxu1 (!%p166_p2), %v602_v4 }
   0xd   : > { %s742_s16 = smov (!%p194_p3, %s532_s16), 7  ;;  %576 = vmatpush3.bf16.msra.mxu1 %v575_v60 }
   0xe   : > { %s546_s23 = sshll.u32 %s742_s16, 6  ;;  %s206_s7 = scalar_lea.vmem %s740_s4, %s742_s16 }
   0xf   : > { %s198_s26 = scalar_lea.vmem %s736_s0, %s546_s23  ;;  %s203_s10 = scalar_lea.vmem %s739_s3, %s546_s23 }
  0x10   : > { %v653_v6 = vld [vmem:[%s198_s26] sm:$0xff]  ;;  %v655_v7 = vld [vmem:[%s198_s26 + $0x8] sm:$0xff]  ;;  %v657_v8 = vld [vmem:[%s198_s26 + $0x10] sm:$0xff] }
  0x11   : > { %v659_v9 = vld [vmem:[%s198_s26 + $0x18] sm:$0xff]  ;;  %v661_v10 = vld [vmem:[%s198_s26 + $0x20] sm:$0xff]  ;;  %v216_v11 = vsel %vm215_vm2, %v653_v6, 0.0  ;;  %v217_v12 = vsel %vm215_vm2, %v655_v7, 0.0  ;;  %v219_v13 = vsel %vm215_vm2, %v657_v8, 0.0  ;;  %v669_v14 = vld [vmem:[%s198_s26 + $0x30] sm:$0xff] }
  0x12   : > { %v671_v15 = vld [vmem:[%s198_s26 + $0x38] sm:$0x3f]  ;;  %v218_v16 = vadd.f32 %v217_v12, %v216_v11  ;;  %v221_v17 = vsel %vm215_vm2, %v659_v9, 0.0  ;;  %v223_v18 = vsel %vm215_vm2, %v661_v10, 0.0  ;;  %v239_v19 = vsel %vm215_vm2, %v653_v6, -inf  ;;  %v681_v21 = vld [vmem:[%s198_s26 + $0x28] sm:$0xff] }
  0x13   : > { %v240_v20 = vsel %vm215_vm2, %v655_v7, -inf  ;;  %v241_v23 = vsel %vm215_vm2, %v657_v8, -inf  ;;  %v242_v24 = vsel %vm215_vm2, %v659_v9, -inf  ;;  %v243_v25 = vsel %vm215_vm2, %v661_v10, -inf }
  0x14   : > { %v220_v22 = vadd.f32 %v219_v13, %v218_v16  ;;  %v244_v26 = vmax.f32 %v239_v19, %v243_v25  ;;  %v245_v27 = vsel %vm215_vm2, %v681_v21, -inf  ;;  %v247_v28 = vsel %vm215_vm2, %v669_v14, -inf }
  0x15   : > { %v249_v29 = vsel %vm229_vm3, %v671_v15, -inf  ;;  %v246_v31 = vmax.f32 %v240_v20, %v245_v27  ;;  %v248_v32 = vmax.f32 %v241_v23, %v247_v28  ;;  %v225_v34 = vsel %vm215_vm2, %v681_v21, 0.0 }
  0x16   : > { %v222_v30 = vadd.f32 %v221_v17, %v220_v22  ;;  %v250_v33 = vmax.f32 %v242_v24, %v249_v29  ;;  %v227_v38 = vsel %vm215_vm2, %v669_v14, 0.0  ;;  %v230_v41 = vsel %vm229_vm3, %v671_v15, 0.0 }
  0x17   : > { %v251_v36 = vmax.f32 %v244_v26, %v246_v31  ;;  %v430_v13 = vlaneseq }
  0x18   : > { %v224_v35 = vadd.f32 %v223_v18, %v222_v30  ;;  %v252_v37 = vmax.f32 %v248_v32, %v250_v33 }
  0x19   : > { %v431_v16 = vshrl.u32 %v430_v13, 7 }
  0x1a   : > { %v226_v39 = vadd.f32 %v225_v34, %v224_v35  ;;  %v253_v40 = vmax.f32 %v251_v36, %v252_v37 }
  0x1b   : > { %v432_v17 = vsub.s32 0, %v431_v16 }
  0x1c   : > { %v228_v42 = vadd.f32 %v227_v38, %v226_v39  ;;  %v254_v43 = vrot.slane %v253_v40, 4 }
  0x1e   : > { %v231_v44 = vadd.f32 %v230_v41, %v228_v42  ;;  %v255_v45 = vmax.f32 %v253_v40, %v254_v43 }
  0x20   : > { %v232_v46 = vrot.slane %v231_v44, 4  ;;  %v256_v47 = vrot.slane %v255_v45, 2 }
  0x22   : > { %v233_v48 = vadd.f32 %v232_v46, %v231_v44  ;;  %v257_v49 = vmax.f32 %v255_v45, %v256_v47 }
  0x24   : > { %v234_v50 = vrot.slane %v233_v48, 2  ;;  %v258_v52 = vrot.slane %v257_v49, 1 }
  0x26   : > { %v235_v51 = vadd.f32 %v234_v50, %v233_v48  ;;  %v259_v55 = vmax.f32 %v257_v49, %v258_v52 }
  0x28   : > { %v236_v53 = vrot.slane %v235_v51, 1 }
  0x2a   : > { %v237_v54 = vadd.f32 %v236_v53, %v235_v51 }
  0x2c   : > { %v238_v56 = vmul.f32 0.016129032, %v237_v54 }
  0x2e   : > { %v261_v57 = vsel %vm260_vm4, %v238_v56, %v259_v55 }
  0x2f   : > { %558 = vmatmul.mubr.msk.f32.vlgmr.msra.gmra.mrb[0].mxu0 %vm215_vm2, %v261_v57 }
 0x102   : > { %v336_v61 = vpop.f32.mrb[0].mxu0 }
 0x103   : > { %v340_v62 = vmax.f32 %v336_v61, 0.0  ;;  %v559_v63 = vpop.f32.mrb[1].mxu0 }
 0x105   : > { %569 = vmatmul.mubr.msk.f32.vlgmr.msra.gmra.mrb[0].mxu1 %vm345_vm5, %v340_v62 }
 0x1d8   : > { %v415_v0 = vpop.f32.mrb[0].mxu1 }
 0x1d9   : > { %v420_v1 = vrot.slane %v415_v0, 1  ;;  %v570_v2 = vpop.f32.mrb[1].mxu1 }
 0x1db   : > { %v422_v3 = vadd.f32 %v420_v1, %v415_v0 }
 0x1dd   : > { %v423_v4 = vsub.f32 0.0, %v422_v3 }
 0x1df   : > { %v424_v5 = vmul.f32 1.442695, %v423_v4 }
 0x1e1   : > { %588 = vpow2.f32 %v424_v5 }
 0x1eb   : > { %v589_v11 = vpop.eup %588 }
 0x1ec   : > { %v426_v12 = vadd.f32 1.0, %v589_v11 }
 0x1ee   : > { %590 = vrcp.f32 %v426_v12 }
 0x1f8   : > { %v591_v18 = vpop.eup %590 }
 0x1f9   : > { %v429_v19 = vadd.f32 1.0, %v591_v18  ;;  %451 = vst.msk [vmem:[%s206_s7] sm:$0x1] %vm450_vm6, %v591_v18 }
 0x1fb   : > { %v433_v20 = vrot.slane %v429_v19, %v432_v17 }
 0x1fd   : > { %v434_v22 = vmul.f32 %v433_v20, %v653_v6  ;;  %v435_v23 = vmul.f32 %v433_v20, %v655_v7  ;;  %v436_v24 = vmul.f32 %v433_v20, %v657_v8  ;;  %v437_v25 = vmul.f32 %v433_v20, %v659_v9 }
 0x1fe   : > { %v438_v26 = vmul.f32 %v433_v20, %v661_v10  ;;  %v439_v27 = vmul.f32 %v433_v20, %v681_v21  ;;  %v440_v28 = vmul.f32 %v433_v20, %v669_v14  ;;  %v441_v29 = vmul.f32 %v433_v20, %v671_v15 }
 0x1ff   : > { %442 = vst.msk [vmem:[%s203_s10] sm:$0xff] %vm215_vm2, %v434_v22  ;;  %443 = vst.msk [vmem:[%s203_s10 + $0x8] sm:$0xff] %vm215_vm2, %v435_v23 }
 0x200   : > { %444 = vst.msk [vmem:[%s203_s10 + $0x10] sm:$0xff] %vm215_vm2, %v436_v24  ;;  %445 = vst.msk [vmem:[%s203_s10 + $0x18] sm:$0xff] %vm215_vm2, %v437_v25 }
 0x201   : > { %446 = vst.msk [vmem:[%s203_s10 + $0x20] sm:$0xff] %vm215_vm2, %v438_v26  ;;  %447 = vst.msk [vmem:[%s203_s10 + $0x28] sm:$0xff] %vm215_vm2, %v439_v27 }
 0x202   : > { %448 = vst.msk [vmem:[%s203_s10 + $0x30] sm:$0xff] %vm215_vm2, %v440_v28 }
 0x203   : > { %449 = vst.msk [vmem:[%s203_s10 + $0x38] sm:$0x3f] %vm229_vm3, %v441_v29 }
 0x204 PF: > { %s15_s15 = sadd.s32 1, %s598_s15  }
 0x205   : > { %p12_p4 = scmp.ge.s32.totalorder %s15_s15, 10  }
 0x207   :  { %14 = sbr.rel (!%p12_p4) target bundleno = 1 (0x1), region = 74 }

// kernel: emotion_attention_forward.11
= control target key start
LH: loop header
LB: loop body
LE: loop exit
PB: predicated region body
PF: predicated region fallthrough
CT: control target
= control target key end

     0   :  { %10 = vsyncpa [#allocation3], 0  ;;  %s875_s0 = inlined_call_operand.vmem [shape: f32[8,5,62], index: 0, kind: input, shape index: {}]   ;;  %s876_s1 = inlined_call_operand.vmem [shape: f32[62,32], index: 1, kind: input, shape index: {}]   ;;  %s877_s2 = inlined_call_operand.vmem [shape: f32[32,62], index: 2, kind: input, shape index: {}]   ;;  %s878_s3 = inlined_call_operand.vmem [shape: f32[8,5,62], index: 3, kind: output, shape index: {0}]   ;;  %s879_s4 = inlined_call_operand.hbm [shape: f32[8,1,62], index: 4, kind: output, shape index: {1}]  }
   0x1   :  { %12 = vsyncpa [#allocation3 + $0x1], 0  ;;  %s721_s15 = smov 0   ;;  %s723_s16 = smov 0  }
   0x2   :  { %s725_s17 = smov 0   ;;  %s727_s18 = smov 0  }
   0x3 LB: > { %s742_s19 = sadd.s32 4294967295, %s689_s18   ;;  %s505_s20 = sadd.s32 4294967294, %s689_s18   ;;  %s689_s18 = sphi %s727_s18, %s885_s18   ;;  %s685_s17 = sphi %s725_s17, %s884_s17   ;;  %s681_s16 = sphi %s723_s16, %s883_s16   ;;  %s677_s15 = sphi %s721_s15, %s882_s15  }
   0x4   : > { %s746_s21 = sadd.s32 1, %s689_s18   ;;  %s119_s22 = sadd.s32 1, %s685_s17 }
   0x5   : > { %s116_s23 = ssub.s32 %s689_s18, %s746_s21  ;;  %p129_p0 = scmp.ne.s32.totalorder %s685_s17, %s681_s16 }
   0x6   : > { %p117_p1 = scmp.eq.s32.totalorder %s116_s23, 0  ;;  %p130_p2 = scmp.eq.s32.totalorder %s742_s19, 7 }
   0x7   : > { %p135_p3 = scmp.ne.s32.totalorder %s681_s16, %s677_s15  ;;  %p136_p4 = scmp.eq.s32.totalorder %s505_s20, 7 }
   0x8   : > { %s757_s24 = scalar_select %p117_p1, %s685_s17, %s119_s22  }
   0x9   : > { %p759_p5 = por %p130_p2, %p129_p0  ;;  %p763_p6 = por %p136_p4, %p135_p3 }
   0xa   : > { %p508_p7 = scmp.ge.s32.totalorder %s689_s18, 1  ;;  %p167_p8 = scmp.lt.s32.totalorder %s689_s18, 9 }
   0xc   : > { %p168_p9 = pnand %p508_p7, %p167_p8 }
   0xd   : > { %v222_v0 = vld [vmem:[%s876_s1] sm:$0xff] (!%p168_p9)  ;;  %v223_v1 = vld [vmem:[%s876_s1 + $0x8] sm:$0xff] (!%p168_p9)  ;;  %v224_v2 = vld [vmem:[%s876_s1 + $0x10] sm:$0xff] (!%p168_p9)  ;;  %v691_v3 = vmov (!%p168_p9), 0.0|0.0   ;;  %p195_p10 = scmp.lt.s32.totalorder (!%p168_p9), %s742_s19, 7  ;;  %vm692_vm0 = vmmov (!%p168_p9), 0   ;;  %v398_v48 = vlaneseq (!%p168_p9) }
   0xe   : > { %171 = sbr.rel (%p168_p9) target bundleno = 518 (0x206), region = 32  ;;  %561 = vmatprep.subr.bf16.mxu0 (!%p168_p9), %v691_v3  ;;  %v562_v4 = vpack.c.bf16 (!%p168_p9), %v223_v1, %v222_v0  ;;  %v225_v5 = vld [vmem:[%s876_s1 + $0x18] sm:$0xff] (!%p168_p9)  ;;  %574 = vmatprep.subr.bf16.mxu1 (!%p168_p9), %v691_v3  ;;  %v693_v6 = vmov (!%p168_p9), 0.0   ;;  %v309_v8 = vld [vmem:[%s877_s2] sm:$0xff] (!%p168_p9)  ;;  %v310_v9 = vld [vmem:[%s877_s2 + $0x8] sm:$0xff] (!%p168_p9)  ;;  %vm204_vm1 = vcmask (!%p168_p9), 503808  }
   0xf   : > { %547 = vmatprep.mubr.msk.f32.mxu0 (!%p168_p9), %vm692_vm0, %v693_v6  ;;  %558 = vmatprep.mubr.msk.f32.mxu1 (!%p168_p9), %vm692_vm0, %v693_v6  ;;  %v565_v7 = vpack.c.bf16 (!%p168_p9), %v225_v5, %v224_v2  ;;  %v226_v10 = vld [vmem:[%s876_s1 + $0x20] sm:$0xff] (!%p168_p9)  ;;  %v227_v11 = vld [vmem:[%s876_s1 + $0x28] sm:$0xff] (!%p168_p9)  ;;  %v575_v12 = vpack.c.bf16 (!%p168_p9), %v310_v9, %v309_v8  ;;  %v228_v15 = vld [vmem:[%s876_s1 + $0x30] sm:$0xff] (!%p168_p9)  ;;  %vm234_vm2 = vcmask (!%p168_p9), 1045504   ;;  %vm694_vm3 = vmmov (!%p168_p9), 1   ;;  %s193_s14 = sand.u32 (!%p168_p9), 1, %s681_s16  }
  0x10   : > { %563 = vmatpush3.bf16.msra.mxu0 (!%p168_p9), %v562_v4  ;;  %v568_v13 = vpack.c.bf16 (!%p168_p9), %v227_v11, %v226_v10  ;;  %v229_v16 = vld [vmem:[%s876_s1 + $0x38] sm:$0x3f] (!%p168_p9)  ;;  %vm572_vm4 = vmpackc.low (!%p168_p9), %vm234_vm2, %vm694_vm3  ;;  %vm220_vm5 = vcmask (!%p168_p9), 1040384   ;;  %vm230_vm6 = vcmask (!%p168_p9), 506880   ;;  %v311_v34 = vld [vmem:[%s877_s2 + $0x10] sm:$0xff] (!%p168_p9)  ;;  %vm313_vm7 = vcmask (!%p168_p9), 261120  }
  0x11   : > { %564 = vmatprep.subr.bf16.mxu0 (!%p168_p9), %v691_v3  ;;  %576 = vmatpush3.bf16.msra.mxu1 (!%p168_p9), %v575_v12  ;;  %v571_v21 = vpack.c.bf16 (!%p168_p9), %v229_v16, %v228_v15  ;;  %v312_v35 = vld [vmem:[%s877_s2 + $0x18] sm:$0xff] (!%p168_p9)  ;;  %v399_v49 = vshrl.u32 (!%p168_p9), %v398_v48, 7  ;;  %s514_s20 = sshll.u32 (!%p168_p9), %s742_s19, 4  ;;  %s194_s22 = scalar_lea.vmem (!%p168_p9), [#allocation2], %s193_s14  ;;  %vm404_vm8 = vcmask (!%p168_p9), 499712  }
  0x12   : > { %577 = vmatprep.subr.bf16.mxu1 (!%p168_p9), %v691_v3  ;;  %v578_v36 = vpack.c.bf16 (!%p168_p9), %v312_v35, %v311_v34  ;;  %s426_s23 = sshll.u32 (!%p168_p9), %s194_s22, 4  ;;  %s411_s5 = scalar_lea.sflag (!%p168_p9), [#allocation3], %s193_s14  ;;  %s828_s23 = int_to_ptr.vmem [resolvable:$true] %s426_s23 }
  0x13   : > { %v400_v50 = vsub.s32 (!%p168_p9), 0, %v399_v49  ;;  %s627_s6 = scalar_lea.vmem (!%p168_p9), %s828_s23, 16 }
  0x14   : > { %566 = vmatpush3.bf16.msra.mxu0 (!%p168_p9), %v565_v7  ;;  %p628_p11 = scmp.ne.s32.totalorder (!%p168_p9), %s828_s23, %s627_s6 }
  0x15   : > { %s783_s9 = scalar_select %p195_p10, %s742_s19, 7  ;;  %567 = vmatprep.subr.bf16.mxu0 %v691_v3  ;;  %579 = vmatpush3.bf16.msra.mxu1 %v578_v36 }
  0x16   : > { %p629_p12 = pnand %p628_p11, %p759_p5  ;;  %s695_s19 = smov [#allocation2]  }
  0x17   : > { %s509_s27 = sshll.u32 %s783_s9, 3  ;;  %s631_s7 = sshll.u32 %s695_s19, 4  ;;  %s632_s7 = int_to_ptr.vmem [resolvable:$false] %s631_s7 }
  0x18   : > { %s198_s30 = scalar_lea.vmem %s875_s0, %s509_s27  ;;  %569 = vmatpush3.bf16.msra.mxu0 %v568_v13  ;;  %p630_p13 = pneg %p629_p12 }
  0x19   : > { %v803_v14 = vld [vmem:[%s198_s30] sm:$0x1f]  ;;  %570 = vmatprep.subr.bf16.mxu0 %v691_v3  ;;  %s826_s30 = scalar_lea.hbm %s879_s4, %s514_s20  ;;  %s633_s8 = scalar_lea.vmem %s632_s7, 32 }
  0x1a   : > { %v205_v17 = vsel %vm204_vm1, %v803_v14, 0.0  ;;  %v213_v18 = vsel %vm204_vm1, %v803_v14, -inf  ;;  %p634_p0 = scmp.lt.s32.totalorder %s828_s23, %s632_s7  ;;  %p635_p1 = scmp.lt.s32.totalorder %s633_s8, %s627_s6 }
  0x1b   : > { %v206_v19 = vrot.slane %v205_v17, 4  ;;  %v214_v20 = vrot.slane %v213_v18, 4 }
  0x1c   : > { %573 = vmatpush3.bf16.msk.msra.mxu0 %vm572_vm4, %v571_v21  ;;  %p636_p2 = por %p635_p1, %p634_p0 }
  0x1d   : > { %v207_v22 = vadd.f32 %v206_v19, %v205_v17  ;;  %v215_v23 = vmax.f32 %v213_v18, %v214_v20 }
  0x1e   : > { %p637_p3 = pnand %p636_p2, %p630_p13 }
  0x1f   : > { %v208_v24 = vrot.slane %v207_v22, 2  ;;  %v216_v25 = vrot.slane %v215_v23, 2 }
  0x21   : > { %v209_v26 = vadd.f32 %v208_v24, %v207_v22  ;;  %v217_v27 = vmax.f32 %v215_v23, %v216_v25 }
  0x23   : > { %v210_v28 = vrot.slane %v209_v26, 1  ;;  %v218_v29 = vrot.slane %v217_v27, 1 }
  0x25   : > { %v211_v30 = vadd.f32 %v210_v28, %v209_v26  ;;  %v219_v31 = vmax.f32 %v217_v27, %v218_v29 }
  0x27   : > { %v212_v32 = vmul.f32 0.2, %v211_v30 }
  0x29   : > { %v221_v33 = vsel %vm220_vm5, %v212_v32, %v219_v31 }
  0x2a   : > { %548 = vmatmul.mubr.msk.f32.vlgmr.msra.gmra.mrb[0].mxu0 %vm230_vm6, %v221_v33 }
  0xfd   : > { %v304_v37 = vpop.f32.mrb[0].mxu0 }
  0xfe   : > { %v308_v38 = vmax.f32 %v304_v37, 0.0  ;;  %v549_v39 = vpop.f32.mrb[1].mxu0 }
 0x100   : > { %559 = vmatmul.mubr.msk.f32.vlgmr.msra.gmra.mrb[0].mxu1 %vm313_vm7, %v308_v38 }
 0x1d3   : > { %v383_v40 = vpop.f32.mrb[0].mxu1 }
 0x1d4   : > { %v388_v41 = vrot.slane %v383_v40, 1  ;;  %v560_v42 = vpop.f32.mrb[1].mxu1 }
 0x1d6   : > { %v390_v43 = vadd.f32 %v388_v41, %v383_v40 }
 0x1d8   : > { %v391_v44 = vsub.f32 0.0, %v390_v43 }
 0x1da   : > { %v392_v45 = vmul.f32 1.442695, %v391_v44 }
 0x1dc   : > { %623 = vpow2.f32 %v392_v45 }
 0x1e6   : > { %v624_v46 = vpop.eup %623 }
 0x1e7   : > { %v394_v47 = vadd.f32 1.0, %v624_v46 }
 0x1e9   : > { %625 = vrcp.f32 %v394_v47 }
 0x1f3   : > { %v626_v51 = vpop.eup %625 }
 0x1f4   : > { %v397_v52 = vadd.f32 1.0, %v626_v51  ;;  %405 = vst.msk [vmem:[%s194_s22] sm:$0x1] %vm404_vm8, %v626_v51 }
 0x1f5   : > { %640 = shalt.err (!%p637_p3)
}
 0x1f6   : > { %s641_s10 = scalar_lea.hbm %s826_s30, 16  ;;  %s645_s13 = scalar_lea.hbm %s879_s4, 128 }
 0x1f7   : > { %p642_p4 = scmp.ne.s32.totalorder %s826_s30, %s641_s10  ;;  %p646_p9 = scmp.lt.u32.totalorder %s826_s30, %s879_s4 }
 0x1f8   : > { %p647_p10 = scmp.lt.u32.totalorder %s645_s13, %s641_s10  ;;  %p649_p12 = scmp.lt.u32.totalorder %s641_s10, %s826_s30 }
 0x1f9   : > { %p643_p7 = pnand %p642_p4, %p759_p5 }
 0x1fa   : > { %p648_p11 = por %p647_p10, %p646_p9 }
 0x1fb   : > { %p644_p8 = pneg %p643_p7 }
 0x1fc   : > { %p650_p13 = por %p649_p12, %p648_p11 }
 0x1fe   : > { %p651_p0 = pnand %p650_p13, %p644_p8 }
 0x200   : > { %654 = shalt.err (!%p651_p0)
}
 0x201   : > { %580 = dma.vmem_to_hbm [thread:$0]  (%p759_p5), %s828_s23, 16, %s826_s30, %s411_s5   ;;  %v401_v53 = vrot.slane %v397_v52, %v400_v50 }
 0x202   : > { %s202_s29 = scalar_lea.vmem %s878_s3, %s509_s27 }
 0x203   : > { %v402_v54 = vmul.f32 %v401_v53, %v803_v14 }
 0x205   : > { %403 = vst.msk [vmem:[%s202_s29] sm:$0x1f] %vm204_vm1, %v402_v54 }
 0x206 PF: > { %p586_p1 = scmp.ge.s32.totalorder %s689_s18, 2  ;;  %s445_s25 = sand.u32 1, %s677_s15  }
 0x207   : > { %s446_s6 = scalar_lea.sflag [#allocation3], %s445_s25 }
 0x208   : > { %p583_p2 = pnand %p586_p1, %p763_p6 }
 0x20a   : > { %672 = dma.done.wait (!%p583_p2), %s446_s6, 16  }
 0x20b   : > { %674 = vsyncadd (!%p583_p2), %s446_s6, 4294967280  ;;  %p15_p5 = scmp.ge.s32.totalorder %s746_s21, 10   ;;  %s882_s15 = smov %s681_s16 }
 0x20c   : > { %s883_s16 = smov %s685_s17  ;;  %s884_s17 = smov %s757_s24 }
 0x20d   : > { %s885_s18 = smov %s746_s21  ;;  %17 = sbr.rel (!%p15_p5) target bundleno = 3 (0x3), region = 79 }
 0x214   :  { %450 = vsyncpa [#allocation3], 1 }
 0x215   :  { %452 = vsyncpa [#allocation3 + $0x1], 1 }

// kernel: emotion_attention_forward.12
= control target key start
LH: loop header
LB: loop body
LE: loop exit
PB: predicated region body
PF: predicated region fallthrough
CT: control target
= control target key end

     0   :  { %s2434_s12 = smov 0   ;;  %s2880_s0 = inlined_call_operand.vmem [shape: f32[16,8,12,5], index: 0, kind: input, shape index: {}]   ;;  %s2881_s1 = inlined_call_operand.vmem [shape: f32[16,12,1], index: 1, kind: input, shape index: {}]   ;;  %s2882_s2 = inlined_call_operand.vmem [shape: f32[5,10], index: 2, kind: input, shape index: {}]   ;;  %s2883_s3 = inlined_call_operand.vmem [shape: f32[16,8,5], index: 3, kind: output, shape index: {}]  }
   0x1 LB: > { %s2062_s13 = sadd.s32 4294967295, %s2411_s12   ;;  %p2066_p0 = scmp.ge.s32.totalorder %s2411_s12, 1  ;;  %s2411_s12 = sphi %s2434_s12, %s13_s12  }
   0x2   : > { %p147_p1 = scmp.lt.s32.totalorder %s2411_s12, 17 }
   0x4   : > { %p148_p2 = pnand %p2066_p0, %p147_p1 }
   0x5   : > { %v2445_v0 = vld [vmem:[%s2882_s2] sm:$0x1f] (!%p148_p2)  ;;  %vm201_vm0 = vcmask (!%p148_p2), 1044480   ;;  %p175_p3 = scmp.lt.s32.totalorder (!%p148_p2), %s2062_s13, 15  ;;  %vm194_vm1 = vcmask (!%p148_p2), 39936   ;;  %vm280_vm2 = vcmask (!%p148_p2), 80896  }
   0x6   : > { %151 = sbr.rel (%p148_p2) target bundleno = 1491 (0x5d3), region = 32  ;;  %2202 = vmatprep.subr.msk.mxu1 (!%p148_p2), %vm201_vm0, %v2445_v0  ;;  %2214 = vmatprep.subr.msk.mxu0 (!%p148_p2), %vm201_vm0, %v2445_v0  ;;  %vm2485_vm3 = vmpackc.low (!%p148_p2), %vm280_vm2, %vm280_vm2  ;;  %vm366_vm4 = vcmask (!%p148_p2), 93184   ;;  %vm362_vm5 = vcmask (!%p148_p2), 97280   ;;  %vm374_vm8 = vcmask (!%p148_p2), 7168   ;;  %vm376_vm9 = vcmask (!%p148_p2), 3072  }
   0x7   : > { %2203 = vmatpush3.msk.msra.mxu1 (!%p148_p2), %vm201_vm0, %v2445_v0  ;;  %2215 = vmatpush3.msk.msra.mxu0 (!%p148_p2), %vm201_vm0, %v2445_v0  ;;  %vm418_vm10 = vcmask (!%p148_p2), 35840   ;;  %vm427_vm11 = vcmask (!%p148_p2), 32768  }
   0xd   : > { %s2887_s13 = smov (!%p175_p3, %s2062_s13), 15 }
   0xe   : > { %s2144_s16 = sshll.u32 %s2887_s13, 7  ;;  %s2145_s20 = sshll.u32 %s2887_s13, 4 }
   0xf   : > { %s2461_s19 = scalar_lea.vmem %s2880_s0, %s2144_s16  ;;  %s184_s23 = scalar_lea.vmem %s2881_s1, %s2145_s20 }
  0x10   : > { %v2464_v1 = vld [vmem:[%s2461_s19] sm:$0xff]  ;;  %v2467_v2 = vld [vmem:[%s2461_s19 + $0x10] sm:$0xff]  ;;  %v2470_v3 = vld [vmem:[%s2461_s19 + $0x8] sm:$0xf]  ;;  %s2071_s24 = sshll.u32 %s2887_s13, 3 }
  0x11   : > { %2204 = vmatprep.mubr.msk.f32.mxu1 %vm194_vm1, %v2464_v1  ;;  %2216 = vmatprep.mubr.msk.f32.mxu0 %vm194_vm1, %v2467_v2  ;;  %v2477_v4 = vld [vmem:[%s2461_s19 + $0x18] sm:$0xf]  ;;  %v2504_v12 = vld [vmem:[%s2461_s19 + $0x20] sm:$0xff]  ;;  %v2507_v13 = vld [vmem:[%s2461_s19 + $0x30] sm:$0xff]  ;;  %s2834_s27 = scalar_lea.vmem %s2883_s3, %s2071_s24 }
  0x12   : > { %2205 = vmatmul.mubr.msk.f32.vlgmr.msra.gmra.mrb[0].mxu1 %vm194_vm1, %v2470_v3  ;;  %2217 = vmatmul.mubr.msk.f32.vlgmr.msra.gmra.mrb[0].mxu0 %vm194_vm1, %v2477_v4  ;;  %v2516_v14 = vld [vmem:[%s2461_s19 + $0x28] sm:$0xf]  ;;  %v2519_v15 = vld [vmem:[%s2461_s19 + $0x38] sm:$0xf]  ;;  %v2548_v30 = vld [vmem:[%s2461_s19 + $0x40] sm:$0xff] }
  0x13   : > { %v2551_v31 = vld [vmem:[%s2461_s19 + $0x50] sm:$0xff]  ;;  %v2560_v32 = vld [vmem:[%s2461_s19 + $0x48] sm:$0xf]  ;;  %v2563_v33 = vld [vmem:[%s2461_s19 + $0x58] sm:$0xf] }
  0x14   : > { %v2592_v48 = vld [vmem:[%s2461_s19 + $0x60] sm:$0xff]  ;;  %v2595_v49 = vld [vmem:[%s2461_s19 + $0x70] sm:$0xff]  ;;  %v2604_v50 = vld [vmem:[%s2461_s19 + $0x68] sm:$0xf] }
  0x15   : > { %v2607_v51 = vld [vmem:[%s2461_s19 + $0x78] sm:$0xf]  ;;  %v2637_v9 = vld [vmem:[%s184_s23] sm:$0xff] }
  0x16   : > { %vm370_vm6 = vcmp.gt.f32.partialorder %v2637_v9, 0.0 }
  0xe5   : > { %v2206_v5 = vpop.f32.mrb[0].mxu1  ;;  %v2218_v6 = vpop.f32.mrb[0].mxu0 }
  0xe6   : > { %v271_v7 = vpop.f32.mrb[1].mxu1  ;;  %v504_v8 = vpop.f32.mrb[1].mxu0 }
  0xe7   : > { %v2298_v10 = vpack.c.bf16 %v2206_v5, %v271_v7  ;;  %v2304_v11 = vpack.c.bf16 %v2218_v6, %v504_v8  ;;  %2211 = vmatprep.mubr.msk.f32.mxu1 %vm280_vm2, %v271_v7  ;;  %2223 = vmatprep.mubr.msk.f32.mxu0 %vm280_vm2, %v504_v8 }
  0xe9   : > { %2300 = vmatprep.subr.msk.bf16.mxu1 %vm2485_vm3, %v2298_v10  ;;  %2306 = vmatprep.subr.msk.bf16.mxu0 %vm2485_vm3, %v2304_v11 }
  0xea   : > { %2303 = vmatpush3.bf16.xpose.msk.msra.mxu1 %vm2485_vm3, %v2298_v10  ;;  %2309 = vmatpush3.bf16.xpose.msk.msra.mxu0 %vm2485_vm3, %v2304_v11  ;;  %v2639_v11 = vld [vmem:[%s184_s23 + $0x8] sm:$0xf] }
  0xeb   : > { %2226 = vmatprep.subr.msk.mxu1 %vm201_vm0, %v2445_v0  ;;  %2238 = vmatprep.subr.msk.mxu0 %vm201_vm0, %v2445_v0  ;;  %vm371_vm7 = vcmp.gt.f32.partialorder %v2639_v11, 0.0 }
  0xf1   : > { %2212 = vmatmul.mubr.msk.f32.vlgmr.msra.gmra.mrb[2].mxu1 %vm280_vm2, %v2206_v5  ;;  %2224 = vmatmul.mubr.msk.f32.vlgmr.msra.gmra.mrb[2].mxu0 %vm280_vm2, %v2218_v6  ;;  %v2413_v6 = vmov 0  }
  0xf2   : > { %2227 = vmatpush3.msk.msra.mxu1 %vm201_vm0, %v2445_v0  ;;  %2228 = vmatprep.mubr.msk.f32.mxu1 %vm194_vm1, %v2504_v12 }
  0xf3   : > { %2239 = vmatpush3.msk.msra.mxu0 %vm201_vm0, %v2445_v0  ;;  %2240 = vmatprep.mubr.msk.f32.mxu0 %vm194_vm1, %v2507_v13 }
  0xf4   : > { %2356 = vset.pattern.permute.xlu1 %v2413_v6  ;;  %2355 = vset.pattern.permute.xlu0 %v2413_v6 }
  0xf5   : > { %2229 = vmatmul.mubr.msk.f32.vlgmr.msra.gmra.mrb[4].mxu1 %vm194_vm1, %v2516_v14  ;;  %2241 = vmatmul.mubr.msk.f32.vlgmr.msra.gmra.mrb[4].mxu0 %vm194_vm1, %v2519_v15 }
 0x1c4   : > { %v2213_v16 = vpop.f32.mrb[2].mxu1  ;;  %v2225_v17 = vpop.f32.mrb[2].mxu0 }
 0x1c5   : > { %v353_v18 = vpop.f32.mrb[3].mxu1  ;;  %v585_v19 = vpop.f32.mrb[3].mxu0  ;;  %v597_v20 = vsel %vm366_vm4, %v2225_v17, 0.0  ;;  %v367_v21 = vsel %vm366_vm4, %v2213_v16, 0.0 }
 0x1c6   : > { %598 = vadd.xlane.f32.xlu1 %v597_v20  ;;  %368 = vadd.xlane.f32.xlu0 %v367_v21  ;;  %v363_v26 = vsel %vm362_vm5, %v353_v18, 0.0  ;;  %v594_v29 = vsel %vm362_vm5, %v585_v19, 0.0 }
 0x1c8   : > { %v2230_v22 = vpop.f32.mrb[4].mxu1  ;;  %v2242_v23 = vpop.f32.mrb[4].mxu0 }
 0x1c9   : > { %v728_v24 = vpop.f32.mrb[5].mxu1  ;;  %v952_v25 = vpop.f32.mrb[5].mxu0 }
 0x1ca   : > { %v2310_v27 = vpack.c.bf16 %v2230_v22, %v728_v24  ;;  %v2316_v28 = vpack.c.bf16 %v2242_v23, %v952_v25  ;;  %2235 = vmatprep.mubr.msk.f32.mxu1 %vm280_vm2, %v728_v24  ;;  %364 = vadd.xlane.f32.xlu0 %v363_v26 }
 0x1cb   : > { %2247 = vmatprep.mubr.msk.f32.mxu0 %vm280_vm2, %v952_v25 }
 0x1cc   : > { %2312 = vmatprep.subr.msk.bf16.mxu1 %vm2485_vm3, %v2310_v27  ;;  %2318 = vmatprep.subr.msk.bf16.mxu0 %vm2485_vm3, %v2316_v28 }
 0x1cd   : > { %2315 = vmatpush3.bf16.xpose.msk.msra.mxu1 %vm2485_vm3, %v2310_v27  ;;  %2321 = vmatpush3.bf16.xpose.msk.msra.mxu0 %vm2485_vm3, %v2316_v28 }
 0x1ce   : > { %595 = vadd.xlane.f32.xlu0 %v594_v29  ;;  %2250 = vmatprep.subr.msk.mxu1 %vm201_vm0, %v2445_v0 }
 0x1cf   : > { %2262 = vmatprep.subr.msk.mxu0 %vm201_vm0, %v2445_v0 }
 0x1d4   : > { %2236 = vmatmul.mubr.msk.f32.vlgmr.msra.gmra.mrb[6].mxu1 %vm280_vm2, %v2230_v22  ;;  %2248 = vmatmul.mubr.msk.f32.vlgmr.msra.gmra.mrb[6].mxu0 %vm280_vm2, %v2242_v23 }
 0x1d5   : > { %2251 = vmatpush3.msk.msra.mxu1 %vm201_vm0, %v2445_v0  ;;  %2252 = vmatprep.mubr.msk.f32.mxu1 %vm194_vm1, %v2548_v30 }
 0x1d6   : > { %2263 = vmatpush3.msk.msra.mxu0 %vm201_vm0, %v2445_v0  ;;  %2264 = vmatprep.mubr.msk.f32.mxu0 %vm194_vm1, %v2551_v31 }
 0x1d8   : > { %2253 = vmatmul.mubr.msk.f32.vlgmr.msra.gmra.mrb[8].mxu1 %vm194_vm1, %v2560_v32  ;;  %2265 = vmatmul.mubr.msk.f32.vlgmr.msra.gmra.mrb[8].mxu0 %vm194_vm1, %v2563_v33 }
 0x253   : > { %v369_v7 = vpop.xlane.xlu0 %368  ;;  %v599_v18 = vpop.xlane.xlu1 %598 }
 0x254   : > { %v2649_v19 = vsel %vm371_vm7, %v369_v7, -1e+30  ;;  %v2661_v25 = vsel %vm371_vm7, %v599_v18, -1e+30 }
 0x255   : > { %v377_v23 = vsel %vm376_vm9, %v2649_v19, -inf  ;;  %v603_v29 = vsel %vm376_vm9, %v2661_v25, -inf }
 0x257   : > { %v365_v8 = vpop.xlane.xlu0 %364 }
 0x258   : > { %v2645_v17 = vsel %vm370_vm6, %v365_v8, -1e+30 }
 0x259   : > { %v375_v20 = vsel %vm374_vm8, %v2645_v17, -inf }
 0x25a   : > { %v378_v26 = vmax.f32 %v375_v20, %v377_v23 }
 0x25b   : > { %v596_v10 = vpop.xlane.xlu0 %595 }
 0x25c   : > { %v2655_v22 = vsel %vm370_vm6, %v596_v10, -1e+30 }
 0x25d   : > { %v602_v27 = vsel %vm374_vm8, %v2655_v22, -inf }
 0x2a7   : > { %v2237_v34 = vpop.f32.mrb[6].mxu1  ;;  %v2249_v35 = vpop.f32.mrb[6].mxu0 }
 0x2a8   : > { %v809_v36 = vpop.f32.mrb[7].mxu1  ;;  %v1033_v37 = vpop.f32.mrb[7].mxu0  ;;  %v821_v38 = vsel %vm366_vm4, %v2237_v34, 0.0  ;;  %v1045_v44 = vsel %vm366_vm4, %v2249_v35, 0.0 }
 0x2a9   : > { %822 = vadd.xlane.f32.xlu1 %v821_v38  ;;  %v818_v39 = vsel %vm362_vm5, %v809_v36, 0.0  ;;  %v1042_v47 = vsel %vm362_vm5, %v1033_v37, 0.0  ;;  %v379_v36 = vrot.slane %v378_v26, 4  ;;  %v604_v37 = vmax.f32 %v602_v27, %v603_v29 }
 0x2aa   : > { %819 = vadd.xlane.f32.xlu0 %v818_v39 }
 0x2ab   : > { %v2254_v40 = vpop.f32.mrb[8].mxu1  ;;  %v2266_v41 = vpop.f32.mrb[8].mxu0 }
 0x2ac   : > { %v1176_v42 = vpop.f32.mrb[9].mxu1  ;;  %v1400_v43 = vpop.f32.mrb[9].mxu0 }
 0x2ad   : > { %v2322_v45 = vpack.c.bf16 %v2254_v40, %v1176_v42  ;;  %v2328_v46 = vpack.c.bf16 %v2266_v41, %v1400_v43  ;;  %1046 = vadd.xlane.f32.xlu1 %v1045_v44  ;;  %2259 = vmatprep.mubr.msk.f32.mxu1 %vm280_vm2, %v1176_v42  ;;  %v380_v42 = vmax.f32 %v378_v26, %v379_v36 }
 0x2ae   : > { %1043 = vadd.xlane.f32.xlu0 %v1042_v47  ;;  %2271 = vmatprep.mubr.msk.f32.mxu0 %vm280_vm2, %v1400_v43  ;;  %v605_v43 = vrot.slane %v604_v37, 4 }
 0x2af   : > { %2324 = vmatprep.subr.msk.bf16.mxu1 %vm2485_vm3, %v2322_v45  ;;  %2330 = vmatprep.subr.msk.bf16.mxu0 %vm2485_vm3, %v2328_v46 }
 0x2b0   : > { %2327 = vmatpush3.bf16.xpose.msk.msra.mxu1 %vm2485_vm3, %v2322_v45  ;;  %2333 = vmatpush3.bf16.xpose.msk.msra.mxu0 %vm2485_vm3, %v2328_v46 }
 0x2b1   : > { %2274 = vmatprep.subr.msk.mxu1 %vm201_vm0, %v2445_v0  ;;  %2286 = vmatprep.subr.msk.mxu0 %vm201_vm0, %v2445_v0 }
 0x2b7   : > { %2260 = vmatmul.mubr.msk.f32.vlgmr.msra.gmra.mrb[10].mxu1 %vm280_vm2, %v2254_v40  ;;  %2272 = vmatmul.mubr.msk.f32.vlgmr.msra.gmra.mrb[10].mxu0 %vm280_vm2, %v2266_v41 }
 0x2b8   : > { %2275 = vmatpush3.msk.msra.mxu1 %vm201_vm0, %v2445_v0  ;;  %2276 = vmatprep.mubr.msk.f32.mxu1 %vm194_vm1, %v2592_v48 }
 0x2b9   : > { %2287 = vmatpush3.msk.msra.mxu0 %vm201_vm0, %v2445_v0  ;;  %2288 = vmatprep.mubr.msk.f32.mxu0 %vm194_vm1, %v2595_v49 }
 0x2bb   : > { %2277 = vmatmul.mubr.msk.f32.vlgmr.msra.gmra.mrb[12].mxu1 %vm194_vm1, %v2604_v50  ;;  %2289 = vmatmul.mubr.msk.f32.vlgmr.msra.gmra.mrb[12].mxu0 %vm194_vm1, %v2607_v51 }
 0x336   : > { %v823_v24 = vpop.xlane.xlu1 %822 }
 0x337   : > { %v820_v16 = vpop.xlane.xlu0 %819  ;;  %v2669_v34 = vsel %vm371_vm7, %v823_v24, -1e+30 }
 0x338   : > { %v2673_v35 = vsel %vm370_vm6, %v820_v16, -1e+30  ;;  %v827_v39 = vsel %vm376_vm9, %v2669_v34, -inf }
 0x339   : > { %v826_v40 = vsel %vm374_vm8, %v2673_v35, -inf }
 0x33a   : > { %v1047_v38 = vpop.xlane.xlu1 %1046  ;;  %v828_v46 = vmax.f32 %v826_v40, %v827_v39 }
 0x33b   : > { %v1044_v21 = vpop.xlane.xlu0 %1043  ;;  %v2681_v44 = vsel %vm371_vm7, %v1047_v38, -1e+30 }
 0x33c   : > { %v2685_v45 = vsel %vm370_vm6, %v1044_v21, -1e+30  ;;  %v1051_v47 = vsel %vm376_vm9, %v2681_v44, -inf }
 0x38a   : > { %v2261_v52 = vpop.f32.mrb[10].mxu1  ;;  %v2273_v53 = vpop.f32.mrb[10].mxu0 }
 0x38b   : > { %v1257_v54 = vpop.f32.mrb[11].mxu1  ;;  %v1481_v55 = vpop.f32.mrb[11].mxu0  ;;  %v1493_v56 = vsel %vm366_vm4, %v2273_v53, 0.0  ;;  %v1269_v57 = vsel %vm366_vm4, %v2261_v52, 0.0  ;;  %v1050_v52 = vsel %vm374_vm8, %v2685_v45, -inf  ;;  %v381_v53 = vrot.slane %v380_v42, 2 }
 0x38c   : > { %1494 = vadd.xlane.f32.xlu1 %v1493_v56  ;;  %1270 = vadd.xlane.f32.xlu0 %v1269_v57  ;;  %v1266_v62 = vsel %vm362_vm5, %v1257_v54, 0.0  ;;  %v1490_v5 = vsel %vm362_vm5, %v1481_v55, 0.0  ;;  %v606_v54 = vmax.f32 %v604_v37, %v605_v43  ;;  %v829_v56 = vrot.slane %v828_v46, 4 }
 0x38e   : > { %v2278_v58 = vpop.f32.mrb[12].mxu1  ;;  %v2290_v59 = vpop.f32.mrb[12].mxu0 }
 0x38f   : > { %v1624_v60 = vpop.f32.mrb[13].mxu1  ;;  %v1848_v61 = vpop.f32.mrb[13].mxu0 }
 0x390   : > { %v2334_v63 = vpack.c.bf16 %v2278_v58, %v1624_v60  ;;  %v2340_v0 = vpack.c.bf16 %v2290_v59, %v1848_v61  ;;  %2283 = vmatprep.mubr.msk.f32.mxu1 %vm280_vm2, %v1624_v60  ;;  %1267 = vadd.xlane.f32.xlu0 %v1266_v62  ;;  %v382_v62 = vmax.f32 %v380_v42, %v381_v53 }
 0x391   : > { %2295 = vmatprep.mubr.msk.f32.mxu0 %vm280_vm2, %v1848_v61 }
 0x392   : > { %2336 = vmatprep.subr.msk.bf16.mxu1 %vm2485_vm3, %v2334_v63  ;;  %2342 = vmatprep.subr.msk.bf16.mxu0 %vm2485_vm3, %v2340_v0  ;;  %v383_v18 = vrot.slane %v382_v62, 1 }
 0x393   : > { %2339 = vmatpush3.bf16.xpose.msk.msra.mxu1 %vm2485_vm3, %v2334_v63  ;;  %2345 = vmatpush3.bf16.xpose.msk.msra.mxu0 %vm2485_vm3, %v2340_v0  ;;  %v607_v63 = vrot.slane %v606_v54, 2 }
 0x394   : > { %1491 = vadd.xlane.f32.xlu0 %v1490_v5  ;;  %v830_v5 = vmax.f32 %v828_v46, %v829_v56 }
 0x395   : > { %v608_v20 = vmax.f32 %v606_v54, %v607_v63 }
 0x396   : > { %v831_v21 = vrot.slane %v830_v5, 2 }
 0x397   : > { %v609_v29 = vrot.slane %v608_v20, 1 }
 0x398   : > { %v832_v36 = vmax.f32 %v830_v5, %v831_v21 }
 0x39a   : > { %2284 = vmatmul.mubr.msk.f32.vlgmr.msra.gmra.mrb[14].mxu1 %vm280_vm2, %v2278_v58  ;;  %2296 = vmatmul.mubr.msk.f32.vlgmr.msra.gmra.mrb[14].mxu0 %vm280_vm2, %v2290_v59  ;;  %v1052_v58 = vmax.f32 %v1050_v52, %v1051_v47  ;;  %v833_v43 = vrot.slane %v832_v36, 1 }
 0x39c   : > { %v1053_v7 = vrot.slane %v1052_v58, 4 }
 0x39e   : > { %v1054_v24 = vmax.f32 %v1052_v58, %v1053_v7  ;;  %v834_v58 = vmax.f32 %v832_v36, %v833_v43 }
 0x3a0   : > { %v1055_v37 = vrot.slane %v1054_v24, 2  ;;  %v836_v5 = vsub.f32 %v2669_v34, %v834_v58 }
 0x3a2   : > { %v1056_v46 = vmax.f32 %v1054_v24, %v1055_v37 }
 0x419   : > { %v1271_v28 = vpop.xlane.xlu0 %1270  ;;  %v1495_v60 = vpop.xlane.xlu1 %1494 }
 0x41a   : > { %v2697_v59 = vsel %vm371_vm7, %v1271_v28, -1e+30  ;;  %v2709_v8 = vsel %vm371_vm7, %v1495_v60, -1e+30  ;;  %v384_v28 = vmax.f32 %v382_v62, %v383_v18  ;;  %v1057_v60 = vrot.slane %v1056_v46, 1 }
 0x41b   : > { %v1275_v6 = vsel %vm376_vm9, %v2697_v59, -inf  ;;  %v1499_v23 = vsel %vm376_vm9, %v2709_v8, -inf }
 0x41c   : > { %v385_v40 = vsub.f32 %v2645_v17, %v384_v28  ;;  %v386_v42 = vsub.f32 %v2649_v19, %v384_v28  ;;  %v835_v19 = vsub.f32 %v2673_v35, %v834_v58 }
 0x41d   : > { %v1268_v41 = vpop.xlane.xlu0 %1267 }
 0x41e   : > { %v2693_v55 = vsel %vm370_vm6, %v1268_v41, -1e+30  ;;  %v610_v41 = vmax.f32 %v608_v20, %v609_v29  ;;  %v387_v53 = vmul.f32 1.442695, %v385_v40  ;;  %v389_v56 = vmul.f32 1.442695, %v386_v42 }
 0x41f   : > { %v1274_v61 = vsel %vm374_vm8, %v2693_v55, -inf }
 0x420   : > { %v1276_v10 = vmax.f32 %v1274_v61, %v1275_v6  ;;  %v611_v54 = vsub.f32 %v2655_v22, %v610_v41  ;;  %2357 = vpow2.f32 %v387_v53  ;;  %v1058_v6 = vmax.f32 %v1056_v46, %v1057_v60 }
 0x421   : > { %v1492_v57 = vpop.xlane.xlu0 %1491  ;;  %2359 = vpow2.f32 %v389_v56  ;;  %v837_v22 = vmul.f32 1.442695, %v835_v19 }
 0x422   : > { %v2703_v0 = vsel %vm370_vm6, %v1492_v57, -1e+30  ;;  %v1277_v26 = vrot.slane %v1276_v10, 4  ;;  %v612_v57 = vsub.f32 %v2661_v25, %v610_v41  ;;  %v613_v63 = vmul.f32 1.442695, %v611_v54 }
 0x423   : > { %v1498_v16 = vsel %vm374_vm8, %v2703_v0, -inf  ;;  %v1059_v25 = vsub.f32 %v2685_v45, %v1058_v6  ;;  %v1060_v21 = vsub.f32 %v2681_v44, %v1058_v6 }
 0x424   : > { %v1500_v27 = vmax.f32 %v1498_v16, %v1499_v23  ;;  %v1278_v38 = vmax.f32 %v1276_v10, %v1277_v26  ;;  %v615_v17 = vmul.f32 1.442695, %v612_v57  ;;  %2361 = vpow2.f32 %v613_v63 }
 0x425   : > { %v839_v16 = vmul.f32 1.442695, %v836_v5  ;;  %v1061_v24 = vmul.f32 1.442695, %v1059_v25 }
 0x426   : > { %v1501_v39 = vrot.slane %v1500_v27, 4  ;;  %v1279_v47 = vrot.slane %v1278_v38, 2  ;;  %2363 = vpow2.f32 %v615_v17 }
 0x427   : > { %2365 = vpow2.f32 %v837_v22 }
 0x428   : > { %v1502_v52 = vmax.f32 %v1500_v27, %v1501_v39  ;;  %v1280_v61 = vmax.f32 %v1278_v38, %v1279_v47  ;;  %2367 = vpow2.f32 %v839_v16  ;;  %v1063_v27 = vmul.f32 1.442695, %v1060_v21 }
 0x429   : > { %2369 = vpow2.f32 %v1061_v24 }
 0x42a   : > { %v1503_v62 = vrot.slane %v1502_v52, 2  ;;  %v1281_v7 = vrot.slane %v1280_v61, 1  ;;  %v2358_v23 = vpop.eup %2357  ;;  %2371 = vpow2.f32 %v1063_v27 }
 0x42b   : > { %v2360_v26 = vpop.eup %2359  ;;  %v2726_v29 = vmul.f32 %v2358_v23, %v2637_v9 }
 0x42c   : > { %v1504_v10 = vmax.f32 %v1502_v52, %v1503_v62  ;;  %v1282_v18 = vmax.f32 %v1280_v61, %v1281_v7  ;;  %v2730_v44 = vmul.f32 %v2360_v26, %v2639_v11 }
 0x42d   : > { %v393_v40 = vsel %vm374_vm8, %v2726_v29, 0.0 }
 0x42e   : > { %v1505_v20 = vrot.slane %v1504_v10, 1  ;;  %v1283_v35 = vsub.f32 %v2693_v55, %v1282_v18  ;;  %v1284_v28 = vsub.f32 %v2697_v59, %v1282_v18  ;;  %v2362_v36 = vpop.eup %2361  ;;  %v394_v41 = vsel %vm376_vm9, %v2730_v44, 0.0 }
 0x42f   : > { %v2738_v42 = vmul.f32 %v2362_v36, %v2637_v9  ;;  %v395_v52 = vadd.f32 %v394_v41, %v393_v40 }
 0x430   : > { %v1506_v34 = vmax.f32 %v1504_v10, %v1505_v20  ;;  %v1285_v45 = vmul.f32 1.442695, %v1283_v35  ;;  %v2364_v38 = vpop.eup %2363  ;;  %v1287_v39 = vmul.f32 1.442695, %v1284_v28 }
 0x431   : > { %v2741_v46 = vmul.f32 %v2364_v38, %v2639_v11  ;;  %v396_v60 = vrot.slane %v395_v52, 4 }
 0x432   : > { %v1507_v37 = vsub.f32 %v2703_v0, %v1506_v34  ;;  %v1508_v55 = vsub.f32 %v2709_v8, %v1506_v34  ;;  %2373 = vpow2.f32 %v1285_v45  ;;  %v2366_v0 = vpop.eup %2365  ;;  %v619_v8 = vsel %vm374_vm8, %v2738_v42, 0.0 }
 0x433   : > { %2375 = vpow2.f32 %v1287_v39  ;;  %v2368_v47 = vpop.eup %2367  ;;  %v620_v53 = vsel %vm376_vm9, %v2741_v46, 0.0  ;;  %v2748_v54 = vmul.f32 %v2366_v0, %v2637_v9  ;;  %v397_v7 = vadd.f32 %v396_v60, %v395_v52 }
 0x434   : > { %v1509_v59 = vmul.f32 1.442695, %v1507_v37  ;;  %v1511_v43 = vmul.f32 1.442695, %v1508_v55  ;;  %v2751_v56 = vmul.f32 %v2368_v47, %v2639_v11  ;;  %v2370_v57 = vpop.eup %2369  ;;  %v621_v61 = vadd.f32 %v620_v53, %v619_v8 }
 0x435   : > { %v2372_v58 = vpop.eup %2371  ;;  %v843_v62 = vsel %vm374_vm8, %v2748_v54, 0.0  ;;  %v2758_v19 = vmul.f32 %v2370_v57, %v2637_v9  ;;  %v398_v24 = vrot.slane %v397_v7, 2 }
 0x436   : > { %2377 = vpow2.f32 %v1509_v59  ;;  %v844_v63 = vsel %vm376_vm9, %v2751_v56, 0.0  ;;  %v2761_v5 = vmul.f32 %v2372_v58, %v2639_v11  ;;  %v622_v10 = vrot.slane %v621_v61, 4 }
 0x437   : > { %2379 = vpow2.f32 %v1511_v43  ;;  %v845_v22 = vadd.f32 %v844_v63, %v843_v62  ;;  %v1067_v25 = vsel %vm374_vm8, %v2758_v19, 0.0  ;;  %v399_v37 = vadd.f32 %v398_v24, %v397_v7 }
 0x438   : > { %v1068_v18 = vsel %vm376_vm9, %v2761_v5, 0.0  ;;  %v623_v35 = vadd.f32 %v622_v10, %v621_v61 }
 0x439   : > { %v846_v34 = vrot.slane %v845_v22, 4  ;;  %v1069_v26 = vadd.f32 %v1068_v18, %v1067_v25  ;;  %v400_v47 = vrot.slane %v399_v37, 1 }
 0x43a   : > { %v624_v38 = vrot.slane %v623_v35, 2 }
 0x43b   : > { %v847_v39 = vadd.f32 %v846_v34, %v845_v22  ;;  %v1070_v55 = vrot.slane %v1069_v26, 4 }
 0x43c   : > { %v2374_v17 = vpop.eup %2373  ;;  %v625_v57 = vadd.f32 %v624_v38, %v623_v35 }
 0x43d   : > { %v2376_v6 = vpop.eup %2375  ;;  %v2768_v20 = vmul.f32 %v2374_v17, %v2637_v9  ;;  %v848_v58 = vrot.slane %v847_v39, 2  ;;  %v1071_v61 = vadd.f32 %v1070_v55, %v1069_v26  ;;  %v401_v17 = vadd.f32 %v400_v47, %v399_v37 }
 0x43e   : > { %v2771_v21 = vmul.f32 %v2376_v6, %v2639_v11  ;;  %v626_v7 = vrot.slane %v625_v57, 1 }
 0x43f   : > { %v1291_v27 = vsel %vm374_vm8, %v2768_v20, 0.0  ;;  %v849_v10 = vadd.f32 %v848_v58, %v847_v39  ;;  %2381 = vrcp.f32 %v401_v17 }
 0x440   : > { %v2378_v16 = vpop.eup %2377  ;;  %v1292_v28 = vsel %vm376_vm9, %v2771_v21, 0.0 }
 0x441   : > { %v2380_v23 = vpop.eup %2379  ;;  %v2778_v36 = vmul.f32 %v2378_v16, %v2637_v9  ;;  %v1293_v40 = vadd.f32 %v1292_v28, %v1291_v27  ;;  %v1072_v16 = vrot.slane %v1071_v61, 2  ;;  %v850_v24 = vrot.slane %v849_v10, 1 }
 0x442   : > { %v2781_v45 = vmul.f32 %v2380_v23, %v2639_v11  ;;  %v627_v23 = vadd.f32 %v626_v7, %v625_v57 }
 0x443   : > { %v1515_v59 = vsel %vm374_vm8, %v2778_v36, 0.0  ;;  %v1294_v62 = vrot.slane %v1293_v40, 4  ;;  %v1073_v35 = vadd.f32 %v1072_v16, %v1071_v61  ;;  %v851_v27 = vadd.f32 %v850_v24, %v849_v10 }
 0x444   : > { %v1516_v41 = vsel %vm376_vm9, %v2781_v45, 0.0  ;;  %2383 = vrcp.f32 %v627_v23 }
 0x445   : > { %v1517_v63 = vadd.f32 %v1516_v41, %v1515_v59  ;;  %v1295_v25 = vadd.f32 %v1294_v62, %v1293_v40  ;;  %v1074_v28 = vrot.slane %v1073_v35, 1  ;;  %2385 = vrcp.f32 %v851_v27 }
 0x447   : > { %v1518_v18 = vrot.slane %v1517_v63, 4  ;;  %v1296_v34 = vrot.slane %v1295_v25, 2  ;;  %v1075_v39 = vadd.f32 %v1074_v28, %v1073_v35 }
 0x449   : > { %v1519_v26 = vadd.f32 %v1518_v18, %v1517_v63  ;;  %v1297_v37 = vadd.f32 %v1296_v34, %v1295_v25  ;;  %v2382_v55 = vpop.eup %2381  ;;  %2387 = vrcp.f32 %v1075_v39 }
 0x44a   : > { %v403_v40 = vmul.f32 %v2382_v55, %v2726_v29 }
 0x44b   : > { %v1520_v38 = vrot.slane %v1519_v26, 2  ;;  %v1298_v59 = vrot.slane %v1297_v37, 1 }
 0x44d   : > { %v1521_v41 = vadd.f32 %v1520_v38, %v1519_v26 }
 0x44e   : > { %v2384_v47 = vpop.eup %2383 }
 0x44f   : > { %v2386_v57 = vpop.eup %2385  ;;  %v630_v58 = vmul.f32 %v2384_v47, %v2741_v46 }
 0x450   : > { %v853_v29 = vmul.f32 %v2386_v57, %v2748_v54  ;;  %v854_v61 = vmul.f32 %v2386_v57, %v2751_v56 }
 0x46d   : > { %v2285_v0 = vpop.f32.mrb[14].mxu1  ;;  %v2297_v43 = vpop.f32.mrb[14].mxu0 }
 0x46e   : > { %v1705_v52 = vpop.f32.mrb[15].mxu1  ;;  %v1929_v8 = vpop.f32.mrb[15].mxu0  ;;  %v1717_v53 = vsel %vm366_vm4, %v2285_v0, 0.0  ;;  %v1941_v6 = vsel %vm366_vm4, %v2297_v43, 0.0  ;;  %v1299_v0 = vadd.f32 %v1298_v59, %v1297_v37  ;;  %v1522_v43 = vrot.slane %v1521_v41, 1 }
 0x46f   : > { %1718 = vadd.xlane.f32.xlu1 %v1717_v53  ;;  %v1714_v60 = vsel %vm362_vm5, %v1705_v52, 0.0  ;;  %v1938_v22 = vsel %vm362_vm5, %v1929_v8, 0.0  ;;  %v404_v52 = vmul.f32 %v2382_v55, %v2730_v44  ;;  %v629_v53 = vmul.f32 %v2384_v47, %v2738_v42 }
 0x470   : > { %1715 = vadd.xlane.f32.xlu0 %v1714_v60  ;;  %2389 = vrcp.f32 %v1299_v0  ;;  %v1523_v8 = vadd.f32 %v1522_v43, %v1521_v41  ;;  %v2388_v60 = vpop.eup %2387 }
 0x471   : > { %v1077_v44 = vmul.f32 %v2388_v60, %v2758_v19  ;;  %v1078_v63 = vmul.f32 %v2388_v60, %v2761_v5 }
 0x472   : > { %2391 = vrcp.f32 %v1523_v8 }
 0x473   : > { %1942 = vadd.xlane.f32.xlu1 %v1941_v6 }
 0x474   : > { %1939 = vadd.xlane.f32.xlu0 %v1938_v22 }
 0x47a   : > { %v2390_v62 = vpop.eup %2389 }
 0x47b   : > { %v1302_v42 = vmul.f32 %v2390_v62, %v2771_v21  ;;  %v1301_v46 = vmul.f32 %v2390_v62, %v2768_v20 }
 0x47c   : > { %v2392_v17 = vpop.eup %2391 }
 0x47d   : > { %v1526_v54 = vmul.f32 %v2392_v17, %v2781_v45  ;;  %v1525_v56 = vmul.f32 %v2392_v17, %v2778_v36 }
 0x484   : > { %407 = vperm.xlu1 %2356, %v403_v40  }
 0x488   : > { %412 = vperm.xlu1 %2356, %v404_v52  }
 0x48a   : > { %633 = vperm.xlu0 %2355, %v629_v53  }
 0x48c   : > { %638 = vperm.xlu1 %2356, %v630_v58  }
 0x48e   : > { %857 = vperm.xlu0 %2355, %v853_v29  }
 0x490   : > { %862 = vperm.xlu1 %2356, %v854_v61  }
 0x492   : > { %1081 = vperm.xlu0 %2355, %v1077_v44  }
 0x494   : > { %1086 = vperm.xlu1 %2356, %v1078_v63  }
 0x496   : > { %1310 = vperm.xlu0 %2355, %v1302_v42  }
 0x498   : > { %1305 = vperm.xlu1 %2356, %v1301_v46  }
 0x49a   : > { %1534 = vperm.xlu0 %2355, %v1526_v54  }
 0x49c   : > { %1529 = vperm.xlu1 %2356, %v1525_v56  }
 0x4fc   : > { %v1719_v6 = vpop.xlane.xlu1 %1718 }
 0x4fd   : > { %v1721_v19 = vsel %vm371_vm7, %v1719_v6, -1e+30  ;;  %v1716_v7 = vpop.xlane.xlu0 %1715 }
 0x4fe   : > { %v1723_v5 = vsel %vm376_vm9, %v1721_v19, -inf  ;;  %v1720_v21 = vsel %vm370_vm6, %v1716_v7, -1e+30 }
 0x4ff   : > { %v1722_v10 = vsel %vm374_vm8, %v1720_v21, -inf }
 0x500   : > { %v1724_v20 = vmax.f32 %v1722_v10, %v1723_v5  ;;  %v1943_v22 = vpop.xlane.xlu1 %1942 }
 0x501   : > { %v1945_v45 = vsel %vm371_vm7, %v1943_v22, -1e+30  ;;  %v1940_v16 = vpop.xlane.xlu0 %1939 }
 0x502   : > { %v1725_v36 = vrot.slane %v1724_v20, 4  ;;  %v1947_v25 = vsel %vm376_vm9, %v1945_v45, -inf  ;;  %v1944_v18 = vsel %vm370_vm6, %v1940_v16, -1e+30 }
 0x503   : > { %v1946_v23 = vsel %vm374_vm8, %v1944_v18, -inf }
 0x504   : > { %v1726_v24 = vmax.f32 %v1724_v20, %v1725_v36  ;;  %v1948_v35 = vmax.f32 %v1946_v23, %v1947_v25  ;;  %v408_v34 = vpop.permute.xlu1 %407 }
 0x505   : > { %v415_v28 = vmul.f32 %v408_v34, %v2464_v1 }
 0x506   : > { %v1727_v26 = vrot.slane %v1726_v24, 2  ;;  %v1949_v27 = vrot.slane %v1948_v35, 4 }
 0x507   : > { %v417_v0 = vsel %vm194_vm1, %v415_v28, 0.0 }
 0x508   : > { %v1728_v37 = vmax.f32 %v1726_v24, %v1727_v26  ;;  %v1950_v38 = vmax.f32 %v1948_v35, %v1949_v27  ;;  %v413_v55 = vpop.permute.xlu1 %412 }
 0x509   : > { %v416_v39 = vmul.f32 %v413_v55, %v2470_v3  ;;  %v634_v59 = vpop.permute.xlu0 %633 }
 0x50a   : > { %v1729_v41 = vrot.slane %v1728_v37, 1  ;;  %v1951_v40 = vrot.slane %v1950_v38, 2  ;;  %v641_v47 = vmul.f32 %v2467_v2, %v634_v59 }
 0x50b   : > { %v419_v43 = vsel %vm418_vm10, %v416_v39, 0.0 }
 0x50c   : > { %v1730_v52 = vmax.f32 %v1728_v37, %v1729_v41  ;;  %v1952_v8 = vmax.f32 %v1950_v38, %v1951_v40  ;;  %v420_v53 = vadd.f32 %v419_v43, %v417_v0  ;;  %v639_v57 = vpop.permute.xlu1 %638  ;;  %v643_v44 = vsel %vm194_vm1, %v641_v47, 0.0 }
 0x50d   : > { %v642_v1 = vmul.f32 %v2477_v4, %v639_v57  ;;  %v858_v58 = vpop.permute.xlu0 %857 }
 0x50e   : > { %v1731_v29 = vsub.f32 %v1720_v21, %v1730_v52  ;;  %v1732_v60 = vsub.f32 %v1721_v19, %v1730_v52  ;;  %v1953_v61 = vrot.slane %v1952_v8, 1  ;;  %v421_v3 = vrot.slane %v420_v53, 4 }
 0x50f   : > { %v644_v62 = vsel %vm418_vm10, %v642_v1, 0.0  ;;  %v865_v63 = vmul.f32 %v2504_v12, %v858_v58 }
 0x510   : > { %v1733_v42 = vmul.f32 1.442695, %v1731_v29  ;;  %v1735_v17 = vmul.f32 1.442695, %v1732_v60  ;;  %v1954_v2 = vmax.f32 %v1952_v8, %v1953_v61  ;;  %v422_v46 = vadd.f32 %v421_v3, %v420_v53  ;;  %v863_v54 = vpop.permute.xlu1 %862 }
 0x511   : > { %v645_v56 = vadd.f32 %v644_v62, %v643_v44  ;;  %v867_v4 = vsel %vm194_vm1, %v865_v63, 0.0  ;;  %v866_v6 = vmul.f32 %v2516_v14, %v863_v54  ;;  %v1082_v19 = vpop.permute.xlu0 %1081 }
 0x512   : > { %2393 = vpow2.f32 %v1733_v42  ;;  %v1955_v7 = vsub.f32 %v1944_v18, %v1954_v2  ;;  %v1956_v5 = vsub.f32 %v1945_v45, %v1954_v2  ;;  %v423_v21 = vrot.slane %v422_v46, 2 }
 0x513   : > { %2395 = vpow2.f32 %v1735_v17  ;;  %v646_v10 = vrot.slane %v645_v56, 4  ;;  %v868_v12 = vsel %vm418_vm10, %v866_v6, 0.0  ;;  %v1089_v20 = vmul.f32 %v2507_v13, %v1082_v19 }
 0x514   : > { %v1957_v22 = vmul.f32 1.442695, %v1955_v7  ;;  %v1959_v16 = vmul.f32 1.442695, %v1956_v5  ;;  %v424_v36 = vadd.f32 %v423_v21, %v422_v46  ;;  %v869_v25 = vadd.f32 %v868_v12, %v867_v4  ;;  %v1087_v23 = vpop.permute.xlu1 %1086 }
 0x515   : > { %v647_v24 = vadd.f32 %v646_v10, %v645_v56  ;;  %v1090_v14 = vmul.f32 %v2519_v15, %v1087_v23  ;;  %v1311_v35 = vpop.permute.xlu0 %1310  ;;  %v1091_v34 = vsel %vm194_vm1, %v1089_v20, 0.0 }
 0x516   : > { %2397 = vpow2.f32 %v1957_v22  ;;  %v425_v45 = vrot.slane %v424_v36, 1  ;;  %v870_v18 = vrot.slane %v869_v25, 4  ;;  %v1314_v27 = vmul.f32 %v2560_v32, %v1311_v35 }
 0x517   : > { %2399 = vpow2.f32 %v1959_v16  ;;  %v648_v13 = vrot.slane %v647_v24, 2  ;;  %v1092_v26 = vsel %vm418_vm10, %v1090_v14, 0.0 }
 0x518   : > { %v426_v28 = vadd.f32 %v425_v45, %v424_v36  ;;  %v871_v15 = vadd.f32 %v870_v18, %v869_v25  ;;  %v1093_v37 = vadd.f32 %v1092_v26, %v1091_v34  ;;  %v1306_v38 = vpop.permute.xlu1 %1305  ;;  %v1316_v43 = vsel %vm418_vm10, %v1314_v27, 0.0 }
 0x519   : > { %v649_v55 = vadd.f32 %v648_v13, %v647_v24  ;;  %v1313_v39 = vmul.f32 %v2548_v30, %v1306_v38  ;;  %v1535_v59 = vpop.permute.xlu0 %1534 }
 0x51a   : > { %428 = vst.msk [vmem:[%s2834_s27] sm:$0x1] %vm427_vm11, %v426_v28  ;;  %v872_v41 = vrot.slane %v871_v15, 2  ;;  %v1094_v40 = vrot.slane %v1093_v37, 4  ;;  %v1538_v32 = vmul.f32 %v2563_v33, %v1535_v59 }
 0x51b   : > { %v650_v0 = vrot.slane %v649_v55, 1  ;;  %v1315_v47 = vsel %vm194_vm1, %v1313_v39, 0.0 }
 0x51c   : > { %v2394_v52 = vpop.eup %2393  ;;  %v873_v8 = vadd.f32 %v872_v41, %v871_v15  ;;  %v1095_v53 = vadd.f32 %v1094_v40, %v1093_v37  ;;  %v1317_v57 = vadd.f32 %v1316_v43, %v1315_v47  ;;  %v1530_v1 = vpop.permute.xlu1 %1529  ;;  %v1540_v33 = vsel %vm418_vm10, %v1538_v32, 0.0 }
 0x51d   : > { %v2396_v58 = vpop.eup %2395  ;;  %v651_v30 = vadd.f32 %v650_v0, %v649_v55  ;;  %v1537_v29 = vmul.f32 %v2551_v31, %v1530_v1  ;;  %v1737_v60 = vmul.f32 %v2394_v52, %v2637_v9 }
 0x51e   : > { %v874_v61 = vrot.slane %v873_v8, 1  ;;  %v1096_v3 = vrot.slane %v1095_v53, 2  ;;  %v1318_v44 = vrot.slane %v1317_v57, 4  ;;  %v1738_v62 = vmul.f32 %v2396_v58, %v2639_v11 }
 0x51f   : > { %652 = vst.msk [vmem:[%s2834_s27 + $0x1] sm:$0x1] %vm427_vm11, %v651_v30  ;;  %v1539_v63 = vsel %vm194_vm1, %v1537_v29, 0.0  ;;  %v1739_v42 = vsel %vm374_vm8, %v1737_v60, 0.0 }
 0x520   : > { %v2398_v17 = vpop.eup %2397  ;;  %v875_v2 = vadd.f32 %v874_v61, %v873_v8  ;;  %v1097_v46 = vadd.f32 %v1096_v3, %v1095_v53  ;;  %v1319_v31 = vadd.f32 %v1318_v44, %v1317_v57  ;;  %v1541_v54 = vadd.f32 %v1540_v33, %v1539_v63 }
 0x521   : > { %v2400_v56 = vpop.eup %2399  ;;  %v1740_v4 = vsel %vm376_vm9, %v1738_v62, 0.0  ;;  %v1961_v6 = vmul.f32 %v2398_v17, %v2637_v9 }
 0x522   : > { %876 = vst.msk [vmem:[%s2834_s27 + $0x2] sm:$0x1] %vm427_vm11, %v875_v2  ;;  %v1098_v19 = vrot.slane %v1097_v46, 1  ;;  %v1320_v7 = vrot.slane %v1319_v31, 2  ;;  %v1542_v5 = vrot.slane %v1541_v54, 4  ;;  %v1741_v21 = vadd.f32 %v1740_v4, %v1739_v42 }
 0x523   : > { %v1962_v10 = vmul.f32 %v2400_v56, %v2639_v11  ;;  %v1963_v12 = vsel %vm374_vm8, %v1961_v6, 0.0 }
 0x524   : > { %v1099_v20 = vadd.f32 %v1098_v19, %v1097_v46  ;;  %v1321_v22 = vadd.f32 %v1320_v7, %v1319_v31  ;;  %v1543_v16 = vadd.f32 %v1542_v5, %v1541_v54  ;;  %v1742_v36 = vrot.slane %v1741_v21, 4 }
 0x525   : > { %v1964_v25 = vsel %vm376_vm9, %v1962_v10, 0.0 }
 0x526   : > { %1100 = vst.msk [vmem:[%s2834_s27 + $0x3] sm:$0x1] %vm427_vm11, %v1099_v20  ;;  %v1322_v9 = vrot.slane %v1321_v22, 1  ;;  %v1544_v23 = vrot.slane %v1543_v16, 2  ;;  %v1743_v24 = vadd.f32 %v1742_v36, %v1741_v21  ;;  %v1965_v14 = vadd.f32 %v1964_v25, %v1963_v12 }
 0x528   : > { %v1323_v35 = vadd.f32 %v1322_v9, %v1321_v22  ;;  %v1545_v45 = vadd.f32 %v1544_v23, %v1543_v16  ;;  %v1744_v18 = vrot.slane %v1743_v24, 2  ;;  %v1966_v11 = vrot.slane %v1965_v14, 4 }
 0x52a   : > { %1324 = vst.msk [vmem:[%s2834_s27 + $0x4] sm:$0x1] %vm427_vm11, %v1323_v35  ;;  %v1546_v34 = vrot.slane %v1545_v45, 1  ;;  %v1745_v13 = vadd.f32 %v1744_v18, %v1743_v24  ;;  %v1967_v26 = vadd.f32 %v1966_v11, %v1965_v14 }
 0x52c   : > { %v1547_v27 = vadd.f32 %v1546_v34, %v1545_v45  ;;  %v1746_v28 = vrot.slane %v1745_v13, 1  ;;  %v1968_v15 = vrot.slane %v1967_v26, 2 }
 0x52e   : > { %1548 = vst.msk [vmem:[%s2834_s27 + $0x5] sm:$0x1] %vm427_vm11, %v1547_v27  ;;  %v1747_v37 = vadd.f32 %v1746_v28, %v1745_v13  ;;  %v1969_v38 = vadd.f32 %v1968_v15, %v1967_v26 }
 0x530   : > { %2401 = vrcp.f32 %v1747_v37  ;;  %v1970_v55 = vrot.slane %v1969_v38, 1 }
 0x532   : > { %v1971_v39 = vadd.f32 %v1970_v55, %v1969_v38 }
 0x534   : > { %2403 = vrcp.f32 %v1971_v39 }
 0x53a   : > { %v2402_v59 = vpop.eup %2401 }
 0x53b   : > { %v1750_v41 = vmul.f32 %v2402_v59, %v1738_v62  ;;  %v1749_v40 = vmul.f32 %v2402_v59, %v1737_v60 }
 0x53d   : > { %1758 = vperm.xlu0 %2355, %v1750_v41   ;;  %1753 = vperm.xlu1 %2356, %v1749_v40  }
 0x53e   : > { %v2404_v0 = vpop.eup %2403 }
 0x53f   : > { %v1974_v43 = vmul.f32 %v2404_v0, %v1962_v10  ;;  %v1973_v47 = vmul.f32 %v2404_v0, %v1961_v6 }
 0x541   : > { %1982 = vperm.xlu0 %2355, %v1974_v43   ;;  %1977 = vperm.xlu1 %2356, %v1973_v47  }
 0x5bc   : > { %v1754_v32 = vpop.permute.xlu1 %1753  ;;  %v1759_v52 = vpop.permute.xlu0 %1758 }
 0x5bd   : > { %v1761_v8 = vmul.f32 %v2592_v48, %v1754_v32  ;;  %v1762_v53 = vmul.f32 %v2604_v50, %v1759_v52 }
 0x5bf   : > { %v1763_v57 = vsel %vm194_vm1, %v1761_v8, 0.0  ;;  %v1764_v1 = vsel %vm418_vm10, %v1762_v53, 0.0 }
 0x5c0   : > { %v1765_v58 = vadd.f32 %v1764_v1, %v1763_v57  ;;  %v1978_v30 = vpop.permute.xlu1 %1977  ;;  %v1983_v29 = vpop.permute.xlu0 %1982 }
 0x5c1   : > { %v1985_v60 = vmul.f32 %v2595_v49, %v1978_v30  ;;  %v1986_v61 = vmul.f32 %v2607_v51, %v1983_v29 }
 0x5c2   : > { %v1766_v3 = vrot.slane %v1765_v58, 4 }
 0x5c3   : > { %v1987_v44 = vsel %vm194_vm1, %v1985_v60, 0.0  ;;  %v1988_v48 = vsel %vm418_vm10, %v1986_v61, 0.0 }
 0x5c4   : > { %v1767_v62 = vadd.f32 %v1766_v3, %v1765_v58  ;;  %v1989_v50 = vadd.f32 %v1988_v48, %v1987_v44 }
 0x5c6   : > { %v1768_v33 = vrot.slane %v1767_v62, 2  ;;  %v1990_v63 = vrot.slane %v1989_v50, 4 }
 0x5c8   : > { %v1769_v42 = vadd.f32 %v1768_v33, %v1767_v62  ;;  %v1991_v17 = vadd.f32 %v1990_v63, %v1989_v50 }
 0x5ca   : > { %v1770_v2 = vrot.slane %v1769_v42, 1  ;;  %v1992_v46 = vrot.slane %v1991_v17, 2 }
 0x5cc   : > { %v1771_v31 = vadd.f32 %v1770_v2, %v1769_v42  ;;  %v1993_v54 = vadd.f32 %v1992_v46, %v1991_v17 }
 0x5ce   : > { %1772 = vst.msk [vmem:[%s2834_s27 + $0x6] sm:$0x1] %vm427_vm11, %v1771_v31  ;;  %v1994_v49 = vrot.slane %v1993_v54, 1 }
 0x5d0   : > { %v1995_v51 = vadd.f32 %v1994_v49, %v1993_v54 }
 0x5d2   : > { %1996 = vst.msk [vmem:[%s2834_s27 + $0x7] sm:$0x1] %vm427_vm11, %v1995_v51 }
 0x5d3 PF: > { %s13_s12 = sadd.s32 1, %s2411_s12  }
 0x5d4   : > { %p10_p4 = scmp.ge.s32.totalorder %s13_s12, 18  }
 0x5d6   :  { %12 = sbr.rel (!%p10_p4) target bundleno = 1 (0x1), region = 72 }

// kernel: emotion_attention_forward.15
= control target key start
LH: loop header
LB: loop body
LE: loop exit
PB: predicated region body
PF: predicated region fallthrough
CT: control target
= control target key end

     0   :  { %v20_v3 = vlaneseq  ;;  %vm169_vm2 = vcmask 1040384   ;;  %s387_s2 = inlined_call_operand.vmem [shape: f32[256,128], index: 2, kind: input, shape index: {}]   ;;  %s388_s0 = inlined_call_operand.vmem [shape: f32[8,256], index: 0, kind: input, shape index: {}]   ;;  %s389_s1 = inlined_call_operand.vmem [shape: f32[2,256], index: 1, kind: input, shape index: {}]   ;;  %s390_s3 = inlined_call_operand.vmem [shape: f32[8,128], index: 3, kind: output, shape index: {0}]   ;;  %s391_s4 = inlined_call_operand.vmem [shape: f32[1,2,128], index: 4, kind: output, shape index: {1}]  }
   0x1   :  { %v69_v0 = vld [vmem:[%s387_s2 + $0x80] sm:$0xff]  ;;  %v70_v1 = vld [vmem:[%s387_s2 + $0x88] sm:$0xff]  ;;  %v71_v6 = vld [vmem:[%s387_s2 + $0x90] sm:$0xff] }
   0x2   :  { %v53_v2 = vld [vmem:[%s387_s2] sm:$0xff]  ;;  %v216_v4 = vpack.c.bf16 %v70_v1, %v69_v0  ;;  %v54_v5 = vld [vmem:[%s387_s2 + $0x8] sm:$0xff]  ;;  %v72_v7 = vld [vmem:[%s387_s2 + $0x98] sm:$0xff]  ;;  %v21_v15 = vshrl.u32 %v20_v3, 7 }
   0x3   :  { %v218_v8 = vpack.c.bf16 %v54_v5, %v53_v2  ;;  %v220_v9 = vpack.c.bf16 %v72_v7, %v71_v6  ;;  %v55_v10 = vld [vmem:[%s387_s2 + $0x10] sm:$0xff]  ;;  %v56_v11 = vld [vmem:[%s387_s2 + $0x18] sm:$0xff]  ;;  %v73_v12 = vld [vmem:[%s387_s2 + $0xa0] sm:$0xff] }
   0x4   :  { %217 = vmatprep.subr.bf16.mxu0 %v216_v4  ;;  %v74_v13 = vld [vmem:[%s387_s2 + $0xa8] sm:$0xff]  ;;  %v222_v14 = vpack.c.bf16 %v56_v11, %v55_v10  ;;  %v57_v17 = vld [vmem:[%s387_s2 + $0x20] sm:$0xff]  ;;  %v75_v19 = vld [vmem:[%s387_s2 + $0xb0] sm:$0xff]  ;;  %v26_v22 = vsub.s32 1, %v21_v15  ;;  %v22_v34 = vsub.s32 0, %v21_v15 }
   0x5   :  { %219 = vmatpush3.bf16.msra.mxu0 %v218_v8  ;;  %v224_v16 = vpack.c.bf16 %v74_v13, %v73_v12  ;;  %v58_v18 = vld [vmem:[%s387_s2 + $0x28] sm:$0xff]  ;;  %v76_v20 = vld [vmem:[%s387_s2 + $0xb8] sm:$0xff]  ;;  %v59_v24 = vld [vmem:[%s387_s2 + $0x30] sm:$0xff] }
   0x6   :  { %221 = vmatprep.subr.bf16.mxu0 %v220_v9  ;;  %v226_v21 = vpack.c.bf16 %v58_v18, %v57_v17  ;;  %v228_v23 = vpack.c.bf16 %v76_v20, %v75_v19  ;;  %v60_v25 = vld [vmem:[%s387_s2 + $0x38] sm:$0xff]  ;;  %v77_v26 = vld [vmem:[%s387_s2 + $0xc0] sm:$0xff]  ;;  %v78_v27 = vld [vmem:[%s387_s2 + $0xc8] sm:$0xff] }
   0x7   :  { %v17_v28 = vld [vmem:[%s388_s0 + $0x8] sm:$0xff]  ;;  %v18_v29 = vld [vmem:[%s389_s1] ss:$2 sm:$0x3]  ;;  %v230_v31 = vpack.c.bf16 %v60_v25, %v59_v24  ;;  %v232_v35 = vpack.c.bf16 %v78_v27, %v77_v26  ;;  %v79_v38 = vld [vmem:[%s387_s2 + $0xd0] sm:$0xff] }
   0x8   :  { %v180_v30 = vld [vmem:[%s389_s1 + $0x1] ss:$2 sm:$0x3]  ;;  %v27_v32 = vrot.slane %v18_v29, %v26_v22  ;;  %v62_v37 = vld [vmem:[%s387_s2 + $0x48] sm:$0xff]  ;;  %v80_v39 = vld [vmem:[%s387_s2 + $0xd8] sm:$0xff]  ;;  %v23_v43 = vrot.slane %v18_v29, %v22_v34 }
   0x9   :  { %223 = vmatpush3.bf16.msra.mxu0 %v222_v14  ;;  %v42_v33 = vrot.slane %v180_v30, %v26_v22  ;;  %v61_v36 = vld [vmem:[%s387_s2 + $0x40] sm:$0xff]  ;;  %v236_v44 = vpack.c.bf16 %v80_v39, %v79_v38  ;;  %v63_v45 = vld [vmem:[%s387_s2 + $0x50] sm:$0xff]  ;;  %v64_v46 = vld [vmem:[%s387_s2 + $0x58] sm:$0xff]  ;;  %v38_v54 = vrot.slane %v180_v30, %v22_v34 }
   0xa   :  { %225 = vmatprep.subr.bf16.mxu0 %v224_v16  ;;  %v31_v40 = vmul.f32 %v27_v32, %v17_v28  ;;  %v234_v41 = vpack.c.bf16 %v62_v37, %v61_v36  ;;  %v16_v47 = vld [vmem:[%s388_s0] sm:$0xff]  ;;  %v82_v49 = vld [vmem:[%s387_s2 + $0xe8] sm:$0xff]  ;;  %v238_v51 = vpack.c.bf16 %v64_v46, %v63_v45  ;;  %v83_v58 = vld [vmem:[%s387_s2 + $0xf0] sm:$0xff] }
   0xb   :  { %v81_v48 = vld [vmem:[%s387_s2 + $0xe0] sm:$0xff]  ;;  %v30_v53 = vmul.f32 %v23_v43, %v16_v47  ;;  %v66_v57 = vld [vmem:[%s387_s2 + $0x68] sm:$0xff]  ;;  %v84_v59 = vld [vmem:[%s387_s2 + $0xf8] sm:$0xff] }
   0xc   :  { %v46_v42 = vadd.f32 %v42_v33, %v31_v40  ;;  %v240_v55 = vpack.c.bf16 %v82_v49, %v81_v48  ;;  %v65_v56 = vld [vmem:[%s387_s2 + $0x60] sm:$0xff]  ;;  %v244_v62 = vpack.c.bf16 %v84_v59, %v83_v58  ;;  %v67_v63 = vld [vmem:[%s387_s2 + $0x70] sm:$0xff]  ;;  %v68_v0 = vld [vmem:[%s387_s2 + $0x78] sm:$0xff] }
   0xd   :  { %227 = vmatpush3.bf16.msra.mxu0 %v226_v21  ;;  %v242_v60 = vpack.c.bf16 %v66_v57, %v65_v56  ;;  %v45_v61 = vadd.f32 %v38_v54, %v30_v53  ;;  %v246_v1 = vpack.c.bf16 %v68_v0, %v67_v63 }
   0xe   :  { %229 = vmatprep.subr.bf16.mxu0 %v228_v23  ;;  %vm48_vm0 = vcmp.ge.f32.partialorder %v46_v42, 0.0  ;;  %v50_v50 = vmul.f32 0.01, %v46_v42 }
   0xf   :  { %v49_v2 = vmul.f32 0.01, %v45_v61  ;;  %vm47_vm1 = vcmp.ge.f32.partialorder %v45_v61, 0.0 }
  0x10   :  { %v52_v52 = vsel %vm48_vm0, %v46_v42, %v50_v50 }
  0x11   :  { %231 = vmatpush3.bf16.msra.mxu0 %v230_v31  ;;  %149 = vmatprep.mubr.f32.mxu0 %v52_v52  ;;  %v51_v3 = vsel %vm47_vm1, %v45_v61, %v49_v2 }
  0x12   :  { %233 = vmatprep.subr.bf16.mxu0 %v232_v35 }
  0x15   :  { %235 = vmatpush3.bf16.msra.mxu0 %v234_v41 }
  0x16   :  { %237 = vmatprep.subr.bf16.mxu0 %v236_v44 }
  0x19   :  { %239 = vmatpush3.bf16.msra.mxu0 %v238_v51 }
  0x1a   :  { %241 = vmatprep.subr.bf16.mxu0 %v240_v55 }
  0x1d   :  { %243 = vmatpush3.bf16.msra.mxu0 %v242_v60 }
  0x1e   :  { %245 = vmatprep.subr.bf16.mxu0 %v244_v62 }
  0x21   :  { %247 = vmatpush3.bf16.msra.mxu0 %v246_v1 }
  0x24   :  { %150 = vmatmul.mubr.f32.vlgmr.msra.gmra.mrb[0].mxu0 %v51_v3 }
  0xf7   :  { %v213_v4 = vpop.f32.mrb[0].mxu0 }
  0xf8   :  { %v214_v5 = vpop.f32.mrb[1].mxu0 }
  0xf9   :  { %v215_v6 = vadd.f32 %v214_v5, %v213_v4 }
  0xfb   :  { %155 = vst [vmem:[%s390_s3] sm:$0xff] %v215_v6  ;;  %v156_v7 = vrot.slane %v215_v6, 4  ;;  %v162_v8 = vmul.f32 %v215_v6, %v215_v6 }
  0xfd   :  { %v157_v9 = vadd.f32 %v215_v6, %v156_v7  ;;  %v163_v10 = vrot.slane %v162_v8, 4 }
  0xff   :  { %v158_v11 = vrot.slane %v157_v9, 2  ;;  %v164_v12 = vadd.f32 %v163_v10, %v162_v8 }
 0x101   :  { %v159_v13 = vadd.f32 %v158_v11, %v157_v9  ;;  %v165_v14 = vrot.slane %v164_v12, 2 }
 0x103   :  { %v160_v15 = vrot.slane %v159_v13, 1  ;;  %v166_v16 = vadd.f32 %v165_v14, %v164_v12 }
 0x105   :  { %v167_v17 = vrot.slane %v166_v16, 1  ;;  %v161_v18 = vadd.f32 %v160_v15, %v159_v13 }
 0x107   :  { %v168_v19 = vadd.f32 %v167_v17, %v166_v16 }
 0x109   :  { %v170_v20 = vsel %vm169_vm2, %v161_v18, %v168_v19 }
 0x10a   :  { %171 = vst [vmem:[%s391_s4] sm:$0x3] %v170_v20 }

// kernel: emotion_attention_forward.16
= control target key start
LH: loop header
LB: loop body
LE: loop exit
PB: predicated region body
PF: predicated region fallthrough
CT: control target
= control target key end

     0   :  { %v228_v0 = vmov 0.0|0.0   ;;  %vm229_vm0 = vmmov 0   ;;  %v230_v4 = vmov 0.0   ;;  %vm118_vm2 = vcmask 523264   ;;  %s319_s2 = inlined_call_operand.vmem [shape: f32[128,64], index: 2, kind: input, shape index: {}]   ;;  %s320_s0 = inlined_call_operand.vmem [shape: f32[8,128], index: 0, kind: input, shape index: {}]   ;;  %s321_s1 = inlined_call_operand.vmem [shape: f32[2,128], index: 1, kind: input, shape index: {}]   ;;  %s322_s3 = inlined_call_operand.vmem [shape: f32[8,64], index: 3, kind: output, shape index: {0}]   ;;  %s323_s4 = inlined_call_operand.vmem [shape: f32[1,2,64], index: 4, kind: output, shape index: {1}]  }
   0x1   :  { %201 = vmatprep.subr.bf16.mxu0 %v228_v0  ;;  %v32_v1 = vld [vmem:[%s319_s2] sm:$0xff]  ;;  %v33_v2 = vld [vmem:[%s319_s2 + $0x8] sm:$0xff]  ;;  %v34_v3 = vld [vmem:[%s319_s2 + $0x10] sm:$0xff]  ;;  %198 = vmatprep.mubr.msk.f32.mxu0 %vm229_vm0, %v230_v4  ;;  %vm135_vm3 = vcmask 1040384   ;;  %vm137_vm4 = vcmask 517120  }
   0x2   :  { %v202_v5 = vpack.c.bf16 %v33_v2, %v32_v1  ;;  %v35_v6 = vld [vmem:[%s319_s2 + $0x18] sm:$0xff]  ;;  %v36_v8 = vld [vmem:[%s319_s2 + $0x20] sm:$0xff]  ;;  %v37_v9 = vld [vmem:[%s319_s2 + $0x28] sm:$0xff] }
   0x3   :  { %v205_v7 = vpack.c.bf16 %v35_v6, %v34_v3  ;;  %v208_v10 = vpack.c.bf16 %v37_v9, %v36_v8  ;;  %v38_v11 = vld [vmem:[%s319_s2 + $0x30] sm:$0xff]  ;;  %v39_v12 = vld [vmem:[%s319_s2 + $0x38] sm:$0xff]  ;;  %v40_v14 = vld [vmem:[%s319_s2 + $0x40] sm:$0xff] }
   0x4   :  { %203 = vmatpush3.bf16.msra.mxu0 %v202_v5  ;;  %v211_v13 = vpack.c.bf16 %v39_v12, %v38_v11  ;;  %v41_v15 = vld [vmem:[%s319_s2 + $0x48] sm:$0xff]  ;;  %v42_v17 = vld [vmem:[%s319_s2 + $0x50] sm:$0xff]  ;;  %v43_v18 = vld [vmem:[%s319_s2 + $0x58] sm:$0xff] }
   0x5   :  { %204 = vmatprep.subr.bf16.mxu0 %v228_v0  ;;  %v214_v16 = vpack.c.bf16 %v41_v15, %v40_v14  ;;  %v16_v19 = vld [vmem:[%s320_s0] sm:$0xff]  ;;  %v217_v21 = vpack.c.bf16 %v43_v18, %v42_v17  ;;  %v45_v24 = vld [vmem:[%s319_s2 + $0x68] sm:$0xff]  ;;  %v46_v28 = vld [vmem:[%s319_s2 + $0x70] sm:$0xff] }
   0x6   :  { %v147_v20 = vld [vmem:[%s321_s1] ss:$0 sm:$0xff]  ;;  %v148_v25 = vld [vmem:[%s321_s1 + $0x1] ss:$0 sm:$0xff]  ;;  %v47_v29 = vld [vmem:[%s319_s2 + $0x78] sm:$0xff] }
   0x7   :  { %v22_v22 = vmul.f32 %v147_v20, %v16_v19  ;;  %v44_v23 = vld [vmem:[%s319_s2 + $0x60] sm:$0xff]  ;;  %v223_v30 = vpack.c.bf16 %v47_v29, %v46_v28 }
   0x8   :  { %206 = vmatpush3.bf16.msra.mxu0 %v205_v7  ;;  %v220_v26 = vpack.c.bf16 %v45_v24, %v44_v23 }
   0x9   :  { %207 = vmatprep.subr.bf16.mxu0 %v228_v0  ;;  %v28_v27 = vadd.f32 %v148_v25, %v22_v22 }
   0xb   :  { %v30_v31 = vmul.f32 0.01, %v28_v27  ;;  %vm29_vm1 = vcmp.ge.f32.partialorder %v28_v27, 0.0 }
   0xc   :  { %209 = vmatpush3.bf16.msra.mxu0 %v208_v10 }
   0xd   :  { %210 = vmatprep.subr.bf16.mxu0 %v228_v0  ;;  %v31_v32 = vsel %vm29_vm1, %v28_v27, %v30_v31 }
  0x10   :  { %212 = vmatpush3.bf16.msra.mxu0 %v211_v13 }
  0x11   :  { %213 = vmatprep.subr.bf16.mxu0 %v228_v0 }
  0x14   :  { %215 = vmatpush3.bf16.msra.mxu0 %v214_v16 }
  0x15   :  { %216 = vmatprep.subr.bf16.mxu0 %v228_v0 }
  0x18   :  { %218 = vmatpush3.bf16.msra.mxu0 %v217_v21 }
  0x19   :  { %219 = vmatprep.subr.bf16.mxu0 %v228_v0 }
  0x1c   :  { %221 = vmatpush3.bf16.msra.mxu0 %v220_v26 }
  0x1d   :  { %222 = vmatprep.subr.bf16.mxu0 %v228_v0 }
  0x20   :  { %224 = vmatpush3.bf16.msra.mxu0 %v223_v30 }
  0x23   :  { %199 = vmatmul.mubr.f32.vlgmr.msra.gmra.mrb[0].mxu0 %v31_v32 }
  0xf6   :  { %v114_v33 = vpop.f32.mrb[0].mxu0 }
  0xf7   :  { %119 = vst.msk [vmem:[%s322_s3] sm:$0xff] %vm118_vm2, %v114_v33  ;;  %v120_v34 = vsel %vm118_vm2, %v114_v33, 0.0  ;;  %v127_v35 = vmul.f32 %v114_v33, %v114_v33  ;;  %v200_v36 = vpop.f32.mrb[1].mxu0 }
  0xf8   :  { %v121_v37 = vrot.slane %v120_v34, 4 }
  0xf9   :  { %v128_v38 = vsel %vm118_vm2, %v127_v35, 0.0 }
  0xfa   :  { %v122_v39 = vadd.f32 %v121_v37, %v120_v34  ;;  %v129_v40 = vrot.slane %v128_v38, 4 }
  0xfc   :  { %v123_v41 = vrot.slane %v122_v39, 2  ;;  %v130_v42 = vadd.f32 %v129_v40, %v128_v38 }
  0xfe   :  { %v124_v43 = vadd.f32 %v123_v41, %v122_v39  ;;  %v131_v44 = vrot.slane %v130_v42, 2 }
 0x100   :  { %v125_v45 = vrot.slane %v124_v43, 1  ;;  %v132_v46 = vadd.f32 %v131_v44, %v130_v42 }
 0x102   :  { %v133_v47 = vrot.slane %v132_v46, 1  ;;  %v126_v48 = vadd.f32 %v125_v45, %v124_v43 }
 0x104   :  { %v134_v49 = vadd.f32 %v133_v47, %v132_v46 }
 0x106   :  { %v136_v50 = vsel %vm135_vm3, %v126_v48, %v134_v49 }
 0x107   :  { %138 = vst.msk [vmem:[%s323_s4] sm:$0x3] %vm137_vm4, %v136_v50 }

// kernel: emotion_attention_forward.17
= control target key start
LH: loop header
LB: loop body
LE: loop exit
PB: predicated region body
PF: predicated region fallthrough
CT: control target
= control target key end

     0   :  { %s108_s0 = inlined_call_operand.vmem [shape: f32[8,64], index: 0, kind: input, shape index: {}]   ;;  %s109_s1 = inlined_call_operand.vmem [shape: f32[2,64], index: 1, kind: input, shape index: {}]   ;;  %s110_s2 = inlined_call_operand.hbm [shape: f32[8,64], index: 2, kind: output, shape index: {}]  }
   0x1   :  { %v12_v0 = vld [vmem:[%s108_s0] sm:$0xff] }
   0x2   :  { %v44_v1 = vld [vmem:[%s109_s1] ss:$0 sm:$0xff]  ;;  %v45_v2 = vld [vmem:[%s109_s1 + $0x1] ss:$0 sm:$0xff] }
   0x3   :  { %v18_v3 = vmul.f32 %v44_v1, %v12_v0 }
   0x4   :  { %7 = vsyncpa [#allocation3], 0  ;;  %s71_s15 = smov [#allocation2]   ;;  %vm28_vm1 = vcmask 523264  }
   0x5   :  { %v24_v4 = vadd.f32 %v45_v2, %v18_v3  ;;  %s36_s16 = sshll.u32 %s71_s15, 4  ;;  %s37_s16 = int_to_ptr.vmem [resolvable:$true] %s36_s16 }
   0x6   :  { %s47_s0 = scalar_lea.vmem %s37_s16, 128  ;;  %p52_p1 = scmp.lt.s32.totalorder %s37_s16, %s37_s16 }
   0x7   :  { %vm25_vm0 = vcmp.ge.f32.partialorder %v24_v4, 0.0  ;;  %v26_v5 = vmul.f32 0.01, %v24_v4  ;;  %p48_p0 = scmp.ne.s32.totalorder %s37_s16, %s47_s0  ;;  %p53_p2 = scmp.lt.s32.totalorder %s47_s0, %s47_s0 }
   0x9   :  { %v27_v6 = vsel %vm25_vm0, %v24_v4, %v26_v5  ;;  %p54_p3 = por %p53_p2, %p52_p1 }
   0xa   :  { %29 = vst.msk [vmem:[#allocation2] sm:$0xff] %vm28_vm1, %v27_v6 }
   0xb   :  { %p55_p4 = pnand %p54_p3, %p48_p0 }
   0xd   :  { %58 = shalt.err (!%p55_p4)
}
   0xe   :  { %s59_s18 = scalar_lea.hbm %s110_s2, 128 }
   0xf   :  { %p60_p5 = scmp.ne.s32.totalorder %s110_s2, %s59_s18  ;;  %p63_p6 = scmp.lt.u32.totalorder %s59_s18, %s110_s2 }
  0x11   :  { %p65_p7 = pnand %p63_p6, %p60_p5 }
  0x13   :  { %68 = shalt.err (!%p65_p7)
}
  0x14   :  { %39 = dma.vmem_to_hbm [thread:$0]  %s37_s16, 128, %s110_s2, [#allocation3]  }
  0x15   :  { %69 = dma.done.wait [#allocation3], 128  }
  0x16   :  { %70 = vsyncadd [#allocation3], 4294967168 }
  0x17   :  { %43 = vsyncpa [#allocation3], 1 }

// kernel: emotion_attention_forward.14
= control target key start
LH: loop header
LB: loop body
LE: loop exit
PB: predicated region body
PF: predicated region fallthrough
CT: control target
= control target key end

     0   :  { %vm203_vm0 = vcmask 777216   ;;  %vm207_vm1 = vcmask 1046528   ;;  %vm673_vm2 = vmmov 1   ;;  %vm455_vm4 = vcmask 1040384   ;;  %s1274_s1 = inlined_call_operand.vmem [shape: f32[735,256], index: 1, kind: input, shape index: {}]   ;;  %s1275_s0 = inlined_call_operand.vmem [shape: f32[8,735], index: 0, kind: input, shape index: {}]   ;;  %s1276_s2 = inlined_call_operand.vmem [shape: f32[8,256], index: 2, kind: output, shape index: {0}]   ;;  %s1277_s3 = inlined_call_operand.vmem [shape: f32[1,2,256], index: 3, kind: output, shape index: {1}]  }
   0x1   :  { %v84_v0 = vld [vmem:[%s1274_s1 + $0x208] sm:$0xff]  ;;  %v86_v1 = vld [vmem:[%s1274_s1 + $0x218] sm:$0xff]  ;;  %v83_v2 = vld [vmem:[%s1274_s1 + $0x200] sm:$0xff] }
   0x2   :  { %v546_v3 = vpack.c.bf16 %v86_v1, %v84_v0  ;;  %v85_v4 = vld [vmem:[%s1274_s1 + $0x210] sm:$0xff]  ;;  %v88_v5 = vld [vmem:[%s1274_s1 + $0x228] sm:$0xff]  ;;  %v90_v6 = vld [vmem:[%s1274_s1 + $0x238] sm:$0xff] }
   0x3   :  { %v548_v7 = vpack.c.bf16 %v85_v4, %v83_v2  ;;  %v550_v8 = vpack.c.bf16 %v90_v6, %v88_v5  ;;  %v87_v9 = vld [vmem:[%s1274_s1 + $0x220] sm:$0xff]  ;;  %v89_v10 = vld [vmem:[%s1274_s1 + $0x230] sm:$0xff]  ;;  %v92_v11 = vld [vmem:[%s1274_s1 + $0x248] sm:$0xff] }
   0x4   :  { %547 = vmatprep.subr.bf16.mxu0 %v546_v3  ;;  %v94_v12 = vld [vmem:[%s1274_s1 + $0x258] sm:$0xff]  ;;  %v552_v13 = vpack.c.bf16 %v89_v10, %v87_v9  ;;  %v91_v15 = vld [vmem:[%s1274_s1 + $0x240] sm:$0xff]  ;;  %v93_v16 = vld [vmem:[%s1274_s1 + $0x250] sm:$0xff] }
   0x5   :  { %549 = vmatpush1.bf16.msra.mxu0 %v548_v7  ;;  %v554_v14 = vpack.c.bf16 %v94_v12, %v92_v11  ;;  %v96_v17 = vld [vmem:[%s1274_s1 + $0x268] sm:$0xff]  ;;  %v98_v18 = vld [vmem:[%s1274_s1 + $0x278] sm:$0xff]  ;;  %v556_v19 = vpack.c.bf16 %v93_v16, %v91_v15  ;;  %v95_v21 = vld [vmem:[%s1274_s1 + $0x260] sm:$0xff] }
   0x6   :  { %551 = vmatprep.subr.bf16.mxu0 %v550_v8  ;;  %v558_v20 = vpack.c.bf16 %v98_v18, %v96_v17  ;;  %v97_v22 = vld [vmem:[%s1274_s1 + $0x270] sm:$0xff]  ;;  %v100_v23 = vld [vmem:[%s1274_s1 + $0x288] sm:$0xff]  ;;  %v102_v24 = vld [vmem:[%s1274_s1 + $0x298] sm:$0xff] }
   0x7   :  { %v560_v25 = vpack.c.bf16 %v97_v22, %v95_v21  ;;  %v562_v26 = vpack.c.bf16 %v102_v24, %v100_v23  ;;  %v99_v27 = vld [vmem:[%s1274_s1 + $0x280] sm:$0xff]  ;;  %v101_v28 = vld [vmem:[%s1274_s1 + $0x290] sm:$0xff]  ;;  %v104_v29 = vld [vmem:[%s1274_s1 + $0x2a8] sm:$0xff] }
   0x8   :  { %v106_v30 = vld [vmem:[%s1274_s1 + $0x2b8] sm:$0xff]  ;;  %v564_v31 = vpack.c.bf16 %v101_v28, %v99_v27  ;;  %v103_v33 = vld [vmem:[%s1274_s1 + $0x2a0] sm:$0xff]  ;;  %v105_v34 = vld [vmem:[%s1274_s1 + $0x2b0] sm:$0xff] }
   0x9   :  { %553 = vmatpush1.bf16.msra.mxu0 %v552_v13  ;;  %v566_v32 = vpack.c.bf16 %v106_v30, %v104_v29  ;;  %v108_v35 = vld [vmem:[%s1274_s1 + $0x2c8] sm:$0xff]  ;;  %v110_v36 = vld [vmem:[%s1274_s1 + $0x2d8] sm:$0xff]  ;;  %v19_v39 = vld [vmem:[%s1274_s1] sm:$0xff]  ;;  %v568_v41 = vpack.c.bf16 %v105_v34, %v103_v33 }
   0xa   :  { %555 = vmatprep.subr.bf16.mxu0 %v554_v14  ;;  %v20_v37 = vld [vmem:[%s1274_s1 + $0x8] sm:$0xff]  ;;  %v22_v38 = vld [vmem:[%s1274_s1 + $0x18] sm:$0xff]  ;;  %v21_v40 = vld [vmem:[%s1274_s1 + $0x10] sm:$0xff]  ;;  %v570_v46 = vpack.c.bf16 %v110_v36, %v108_v35 }
   0xb   :  { %v107_v42 = vld [vmem:[%s1274_s1 + $0x2c0] sm:$0xff]  ;;  %v109_v43 = vld [vmem:[%s1274_s1 + $0x2d0] sm:$0xff]  ;;  %v482_v44 = vpack.c.bf16 %v22_v38, %v20_v37  ;;  %v484_v45 = vpack.c.bf16 %v21_v40, %v19_v39  ;;  %v112_v47 = vld [vmem:[%s1274_s1 + $0x2e8] sm:$0xff] }
   0xc   :  { %v24_v48 = vld [vmem:[%s1274_s1 + $0x28] sm:$0xff]  ;;  %v26_v49 = vld [vmem:[%s1274_s1 + $0x38] sm:$0xff]  ;;  %v23_v52 = vld [vmem:[%s1274_s1 + $0x20] sm:$0xff]  ;;  %v572_v56 = vpack.c.bf16 %v109_v43, %v107_v42 }
   0xd   :  { %557 = vmatpush1.bf16.msra.mxu0 %v556_v19  ;;  %v114_v50 = vld [vmem:[%s1274_s1 + $0x2f8] sm:$0xff]  ;;  %483 = vmatprep.subr.bf16.mxu1 %v482_v44  ;;  %v486_v51 = vpack.c.bf16 %v26_v49, %v24_v48  ;;  %v25_v53 = vld [vmem:[%s1274_s1 + $0x30] sm:$0xff]  ;;  %v111_v54 = vld [vmem:[%s1274_s1 + $0x2e0] sm:$0xff] }
   0xe   :  { %559 = vmatprep.subr.bf16.mxu0 %v558_v20  ;;  %485 = vmatpush1.bf16.msra.mxu1 %v484_v45  ;;  %v488_v55 = vpack.c.bf16 %v25_v53, %v23_v52  ;;  %v28_v57 = vld [vmem:[%s1274_s1 + $0x48] sm:$0xff]  ;;  %v30_v58 = vld [vmem:[%s1274_s1 + $0x58] sm:$0xff]  ;;  %v27_v59 = vld [vmem:[%s1274_s1 + $0x40] sm:$0xff]  ;;  %v574_v60 = vpack.c.bf16 %v114_v50, %v112_v47 }
   0xf   :  { %487 = vmatprep.subr.bf16.mxu1 %v486_v51  ;;  %v113_v61 = vld [vmem:[%s1274_s1 + $0x2f0] sm:$0xff]  ;;  %v490_v62 = vpack.c.bf16 %v30_v58, %v28_v57  ;;  %v16_v0 = vld [vmem:[%s1275_s0 + $0x18] sm:$0xff]  ;;  %v116_v1 = vld [vmem:[%s1274_s1 + $0x308] sm:$0xff] }
  0x10   :  { %v29_v63 = vld [vmem:[%s1274_s1 + $0x50] sm:$0xff]  ;;  %v118_v2 = vld [vmem:[%s1274_s1 + $0x318] sm:$0xff]  ;;  %349 = vmatprep.mubr.f32.mxu0 %v16_v0  ;;  %v32_v4 = vld [vmem:[%s1274_s1 + $0x68] sm:$0xff]  ;;  %v576_v6 = vpack.c.bf16 %v113_v61, %v111_v54 }
  0x11   :  { %561 = vmatpush1.bf16.msra.mxu0 %v560_v25  ;;  %v492_v3 = vpack.c.bf16 %v29_v63, %v27_v59  ;;  %v34_v5 = vld [vmem:[%s1274_s1 + $0x78] sm:$0xff]  ;;  %v31_v8 = vld [vmem:[%s1274_s1 + $0x60] sm:$0xff]  ;;  %v33_v9 = vld [vmem:[%s1274_s1 + $0x70] sm:$0xff]  ;;  %v578_v10 = vpack.c.bf16 %v118_v2, %v116_v1 }
  0x12   :  { %563 = vmatprep.subr.bf16.mxu0 %v562_v26  ;;  %489 = vmatpush1.bf16.msra.mxu1 %v488_v55  ;;  %v494_v7 = vpack.c.bf16 %v34_v5, %v32_v4  ;;  %v115_v11 = vld [vmem:[%s1274_s1 + $0x300] sm:$0xff]  ;;  %v117_v12 = vld [vmem:[%s1274_s1 + $0x310] sm:$0xff]  ;;  %v120_v13 = vld [vmem:[%s1274_s1 + $0x328] sm:$0xff]  ;;  %v496_v17 = vpack.c.bf16 %v33_v9, %v31_v8 }
  0x13   :  { %491 = vmatprep.subr.bf16.mxu1 %v490_v62  ;;  %v122_v14 = vld [vmem:[%s1274_s1 + $0x338] sm:$0xff]  ;;  %v36_v15 = vld [vmem:[%s1274_s1 + $0x88] sm:$0xff]  ;;  %v580_v18 = vpack.c.bf16 %v117_v12, %v115_v11  ;;  %v119_v19 = vld [vmem:[%s1274_s1 + $0x320] sm:$0xff] }
  0x14   :  { %v38_v16 = vld [vmem:[%s1274_s1 + $0x98] sm:$0xff]  ;;  %v35_v21 = vld [vmem:[%s1274_s1 + $0x80] sm:$0xff]  ;;  %v37_v22 = vld [vmem:[%s1274_s1 + $0x90] sm:$0xff]  ;;  %v582_v23 = vpack.c.bf16 %v122_v14, %v120_v13 }
  0x15   :  { %565 = vmatpush1.bf16.msra.mxu0 %v564_v31  ;;  %v498_v20 = vpack.c.bf16 %v38_v16, %v36_v15  ;;  %v121_v24 = vld [vmem:[%s1274_s1 + $0x330] sm:$0xff]  ;;  %v40_v25 = vld [vmem:[%s1274_s1 + $0xa8] sm:$0xff]  ;;  %v42_v26 = vld [vmem:[%s1274_s1 + $0xb8] sm:$0xff]  ;;  %v500_v29 = vpack.c.bf16 %v37_v22, %v35_v21 }
  0x16   :  { %567 = vmatprep.subr.bf16.mxu0 %v566_v32  ;;  %493 = vmatpush1.bf16.msra.mxu1 %v492_v3  ;;  %v124_v27 = vld [vmem:[%s1274_s1 + $0x348] sm:$0xff]  ;;  %v126_v28 = vld [vmem:[%s1274_s1 + $0x358] sm:$0xff]  ;;  %v584_v30 = vpack.c.bf16 %v121_v24, %v119_v19  ;;  %v123_v31 = vld [vmem:[%s1274_s1 + $0x340] sm:$0xff]  ;;  %v502_v32 = vpack.c.bf16 %v42_v26, %v40_v25 }
  0x17   :  { %495 = vmatprep.subr.bf16.mxu1 %v494_v7  ;;  %v39_v33 = vld [vmem:[%s1274_s1 + $0xa0] sm:$0xff]  ;;  %v41_v34 = vld [vmem:[%s1274_s1 + $0xb0] sm:$0xff]  ;;  %v586_v35 = vpack.c.bf16 %v126_v28, %v124_v27  ;;  %v44_v37 = vld [vmem:[%s1274_s1 + $0xc8] sm:$0xff] }
  0x18   :  { %v125_v36 = vld [vmem:[%s1274_s1 + $0x350] sm:$0xff]  ;;  %v46_v38 = vld [vmem:[%s1274_s1 + $0xd8] sm:$0xff]  ;;  %v128_v39 = vld [vmem:[%s1274_s1 + $0x368] sm:$0xff] }
  0x19   :  { %569 = vmatpush1.bf16.msra.mxu0 %v568_v41  ;;  %v130_v40 = vld [vmem:[%s1274_s1 + $0x378] sm:$0xff]  ;;  %v504_v41 = vpack.c.bf16 %v41_v34, %v39_v33  ;;  %v588_v42 = vpack.c.bf16 %v125_v36, %v123_v31  ;;  %v127_v43 = vld [vmem:[%s1274_s1 + $0x360] sm:$0xff]  ;;  %v506_v44 = vpack.c.bf16 %v46_v38, %v44_v37  ;;  %v129_v48 = vld [vmem:[%s1274_s1 + $0x370] sm:$0xff] }
  0x1a   :  { %571 = vmatprep.subr.bf16.mxu0 %v570_v46  ;;  %497 = vmatpush1.bf16.msra.mxu1 %v496_v17  ;;  %v43_v45 = vld [vmem:[%s1274_s1 + $0xc0] sm:$0xff]  ;;  %v45_v46 = vld [vmem:[%s1274_s1 + $0xd0] sm:$0xff]  ;;  %v590_v47 = vpack.c.bf16 %v130_v40, %v128_v39  ;;  %v48_v49 = vld [vmem:[%s1274_s1 + $0xe8] sm:$0xff]  ;;  %v592_v54 = vpack.c.bf16 %v129_v48, %v127_v43 }
  0x1b   :  { %499 = vmatprep.subr.bf16.mxu1 %v498_v20  ;;  %v50_v50 = vld [vmem:[%s1274_s1 + $0xf8] sm:$0xff]  ;;  %v132_v51 = vld [vmem:[%s1274_s1 + $0x388] sm:$0xff]  ;;  %v508_v53 = vpack.c.bf16 %v45_v46, %v43_v45  ;;  %v131_v55 = vld [vmem:[%s1274_s1 + $0x380] sm:$0xff] }
  0x1c   :  { %v134_v52 = vld [vmem:[%s1274_s1 + $0x398] sm:$0xff]  ;;  %v47_v57 = vld [vmem:[%s1274_s1 + $0xe0] sm:$0xff]  ;;  %v49_v58 = vld [vmem:[%s1274_s1 + $0xf0] sm:$0xff] }
  0x1d   :  { %573 = vmatpush1.bf16.msra.mxu0 %v572_v56  ;;  %v510_v56 = vpack.c.bf16 %v50_v50, %v48_v49  ;;  %v594_v59 = vpack.c.bf16 %v134_v52, %v132_v51  ;;  %v52_v61 = vld [vmem:[%s1274_s1 + $0x108] sm:$0xff]  ;;  %v54_v62 = vld [vmem:[%s1274_s1 + $0x118] sm:$0xff]  ;;  %v512_v1 = vpack.c.bf16 %v49_v58, %v47_v57  ;;  %v135_v3 = vld [vmem:[%s1274_s1 + $0x3a0] sm:$0xff] }
  0x1e   :  { %575 = vmatprep.subr.bf16.mxu0 %v574_v60  ;;  %501 = vmatpush1.bf16.msra.mxu1 %v500_v29  ;;  %v133_v60 = vld [vmem:[%s1274_s1 + $0x390] sm:$0xff]  ;;  %v136_v63 = vld [vmem:[%s1274_s1 + $0x3a8] sm:$0xff]  ;;  %v138_v0 = vld [vmem:[%s1274_s1 + $0x3b8] sm:$0xff]  ;;  %v514_v4 = vpack.c.bf16 %v54_v62, %v52_v61 }
  0x1f   :  { %503 = vmatprep.subr.bf16.mxu1 %v502_v32  ;;  %v596_v2 = vpack.c.bf16 %v133_v60, %v131_v55  ;;  %v51_v5 = vld [vmem:[%s1274_s1 + $0x100] sm:$0xff]  ;;  %v598_v7 = vpack.c.bf16 %v138_v0, %v136_v63  ;;  %v137_v8 = vld [vmem:[%s1274_s1 + $0x3b0] sm:$0xff]  ;;  %v56_v9 = vld [vmem:[%s1274_s1 + $0x128] sm:$0xff] }
  0x20   :  { %v140_v11 = vld [vmem:[%s1274_s1 + $0x3c8] sm:$0xff]  ;;  %v142_v12 = vld [vmem:[%s1274_s1 + $0x3d8] sm:$0xff]  ;;  %v600_v14 = vpack.c.bf16 %v137_v8, %v135_v3  ;;  %v139_v15 = vld [vmem:[%s1274_s1 + $0x3c0] sm:$0xff] }
  0x21   :  { %577 = vmatpush1.bf16.msra.mxu0 %v576_v6  ;;  %v53_v6 = vld [vmem:[%s1274_s1 + $0x110] sm:$0xff]  ;;  %v55_v17 = vld [vmem:[%s1274_s1 + $0x120] sm:$0xff]  ;;  %v602_v19 = vpack.c.bf16 %v142_v12, %v140_v11  ;;  %v60_v21 = vld [vmem:[%s1274_s1 + $0x148] sm:$0xff] }
  0x22   :  { %579 = vmatprep.subr.bf16.mxu0 %v578_v10  ;;  %505 = vmatpush1.bf16.msra.mxu1 %v504_v41  ;;  %v58_v10 = vld [vmem:[%s1274_s1 + $0x138] sm:$0xff]  ;;  %v516_v13 = vpack.c.bf16 %v53_v6, %v51_v5  ;;  %v141_v20 = vld [vmem:[%s1274_s1 + $0x3d0] sm:$0xff]  ;;  %v143_v27 = vld [vmem:[%s1274_s1 + $0x3e0] sm:$0xff] }
  0x23   :  { %507 = vmatprep.subr.bf16.mxu1 %v506_v44  ;;  %v518_v16 = vpack.c.bf16 %v58_v10, %v56_v9  ;;  %v62_v22 = vld [vmem:[%s1274_s1 + $0x158] sm:$0xff]  ;;  %v604_v26 = vpack.c.bf16 %v141_v20, %v139_v15  ;;  %v59_v29 = vld [vmem:[%s1274_s1 + $0x140] sm:$0xff]  ;;  %v145_v32 = vld [vmem:[%s1274_s1 + $0x3f0] sm:$0xff] }
  0x24   :  { %v146_v24 = vld [vmem:[%s1274_s1 + $0x3f8] sm:$0xff]  ;;  %v522_v28 = vpack.c.bf16 %v62_v22, %v60_v21  ;;  %v64_v33 = vld [vmem:[%s1274_s1 + $0x168] sm:$0xff]  ;;  %v608_v38 = vpack.c.bf16 %v145_v32, %v143_v27  ;;  %v147_v39 = vld [vmem:[%s1274_s1 + $0x400] sm:$0xff] }
  0x25   :  { %581 = vmatpush1.bf16.msra.mxu0 %v580_v18  ;;  %v57_v18 = vld [vmem:[%s1274_s1 + $0x130] sm:$0xff]  ;;  %v66_v34 = vld [vmem:[%s1274_s1 + $0x178] sm:$0xff]  ;;  %v63_v41 = vld [vmem:[%s1274_s1 + $0x160] sm:$0xff] }
  0x26   :  { %583 = vmatprep.subr.bf16.mxu0 %v582_v23  ;;  %509 = vmatpush1.bf16.msra.mxu1 %v508_v53  ;;  %v144_v23 = vld [vmem:[%s1274_s1 + $0x3e8] sm:$0xff]  ;;  %v520_v25 = vpack.c.bf16 %v57_v18, %v55_v17  ;;  %v150_v36 = vld [vmem:[%s1274_s1 + $0x418] sm:$0xff]  ;;  %v526_v40 = vpack.c.bf16 %v66_v34, %v64_v33  ;;  %v149_v44 = vld [vmem:[%s1274_s1 + $0x410] sm:$0xff] }
  0x27   :  { %511 = vmatprep.subr.bf16.mxu1 %v510_v56  ;;  %v606_v31 = vpack.c.bf16 %v146_v24, %v144_v23  ;;  %v68_v45 = vld [vmem:[%s1274_s1 + $0x188] sm:$0xff]  ;;  %v70_v46 = vld [vmem:[%s1274_s1 + $0x198] sm:$0xff]  ;;  %v15_v50 = vld [vmem:[%s1275_s0 + $0x10] sm:$0xff]  ;;  %v612_v52 = vpack.c.bf16 %v149_v44, %v147_v39 }
  0x28   :  { %v154_v48 = vld [vmem:[%s1274_s1 + $0x438] sm:$0xff]  ;;  %v14_v49 = vld [vmem:[%s1275_s0 + $0x8] sm:$0xff]  ;;  %v151_v53 = vld [vmem:[%s1274_s1 + $0x420] sm:$0xff] }
  0x29   :  { %585 = vmatpush1.bf16.msra.mxu0 %v584_v30  ;;  %v61_v30 = vld [vmem:[%s1274_s1 + $0x150] sm:$0xff]  ;;  %278 = vmatprep.mubr.f32.mxu1 %v14_v49  ;;  %v67_v55 = vld [vmem:[%s1274_s1 + $0x180] sm:$0xff]  ;;  %v74_v60 = vld [vmem:[%s1274_s1 + $0x1b8] sm:$0xff] }
  0x2a   :  { %587 = vmatprep.subr.bf16.mxu0 %v586_v35  ;;  %513 = vmatpush1.bf16.msra.mxu1 %v512_v1  ;;  %v148_v35 = vld [vmem:[%s1274_s1 + $0x408] sm:$0xff]  ;;  %v524_v37 = vpack.c.bf16 %v61_v30, %v59_v29  ;;  %v69_v56 = vld [vmem:[%s1274_s1 + $0x190] sm:$0xff]  ;;  %v158_v62 = vld [vmem:[%s1274_s1 + $0x458] sm:$0xff] }
  0x2b   :  { %515 = vmatprep.subr.bf16.mxu1 %v514_v4  ;;  %v610_v43 = vpack.c.bf16 %v150_v36, %v148_v35  ;;  %v153_v58 = vld [vmem:[%s1274_s1 + $0x430] sm:$0xff]  ;;  %v156_v61 = vld [vmem:[%s1274_s1 + $0x448] sm:$0xff]  ;;  %v532_v0 = vpack.c.bf16 %v69_v56, %v67_v55  ;;  %v71_v4 = vld [vmem:[%s1274_s1 + $0x1a0] sm:$0xff] }
  0x2c   :  { %v18_v63 = vld [vmem:[%s1275_s0 + $0x28] sm:$0xff]  ;;  %v616_v1 = vpack.c.bf16 %v153_v58, %v151_v53  ;;  %v73_v5 = vld [vmem:[%s1274_s1 + $0x1b0] sm:$0xff]  ;;  %v618_v6 = vpack.c.bf16 %v158_v62, %v156_v61  ;;  %v78_v9 = vld [vmem:[%s1274_s1 + $0x1d8] sm:$0xff] }
  0x2d   :  { %589 = vmatpush1.bf16.msra.mxu0 %v588_v42  ;;  %v65_v42 = vld [vmem:[%s1274_s1 + $0x170] sm:$0xff]  ;;  %v76_v8 = vld [vmem:[%s1274_s1 + $0x1c8] sm:$0xff]  ;;  %v162_v11 = vld [vmem:[%s1274_s1 + $0x478] sm:$0xff]  ;;  %v536_v12 = vpack.c.bf16 %v73_v5, %v71_v4 }
  0x2e   :  { %591 = vmatprep.subr.bf16.mxu0 %v590_v47  ;;  %517 = vmatpush1.bf16.msra.mxu1 %v516_v13  ;;  %v152_v47 = vld [vmem:[%s1274_s1 + $0x428] sm:$0xff]  ;;  %v528_v51 = vpack.c.bf16 %v65_v42, %v63_v41  ;;  %v538_v15 = vpack.c.bf16 %v78_v9, %v76_v8  ;;  %v77_v17 = vld [vmem:[%s1274_s1 + $0x1d0] sm:$0xff]  ;;  %v82_v21 = vld [vmem:[%s1274_s1 + $0x1f8] sm:$0xff] }
  0x2f   :  { %519 = vmatprep.subr.bf16.mxu1 %v518_v16  ;;  %v614_v57 = vpack.c.bf16 %v154_v48, %v152_v47  ;;  %v160_v10 = vld [vmem:[%s1274_s1 + $0x468] sm:$0xff]  ;;  %v75_v16 = vld [vmem:[%s1274_s1 + $0x1c0] sm:$0xff]  ;;  %v166_v23 = vld [vmem:[%s1274_s1 + $0x498] sm:$0xff] }
  0x30   :  { %v622_v18 = vpack.c.bf16 %v162_v11, %v160_v10  ;;  %v80_v20 = vld [vmem:[%s1274_s1 + $0x1e8] sm:$0xff]  ;;  %v540_v24 = vpack.c.bf16 %v77_v17, %v75_v16  ;;  %v79_v27 = vld [vmem:[%s1274_s1 + $0x1e0] sm:$0xff]  ;;  %v170_v33 = vld [vmem:[%s1274_s1 + $0x4b8] sm:$0xff] }
  0x31   :  { %593 = vmatpush1.bf16.msra.mxu0 %v592_v54  ;;  %v530_v54 = vpack.c.bf16 %v70_v46, %v68_v45  ;;  %v164_v22 = vld [vmem:[%s1274_s1 + $0x488] sm:$0xff]  ;;  %v163_v30 = vld [vmem:[%s1274_s1 + $0x480] sm:$0xff]  ;;  %v173_v45 = vld [vmem:[%s1274_s1 + $0x4d0] sm:$0xff] }
  0x32   :  { %595 = vmatprep.subr.bf16.mxu0 %v594_v59  ;;  %521 = vmatpush1.bf16.msra.mxu1 %v520_v25  ;;  %v72_v59 = vld [vmem:[%s1274_s1 + $0x1a8] sm:$0xff]  ;;  %v626_v29 = vpack.c.bf16 %v166_v23, %v164_v22  ;;  %v13_v41 = vld [vmem:[%s1275_s0] sm:$0xff]  ;;  %v178_v47 = vld [vmem:[%s1274_s1 + $0x4f8] sm:$0xff] }
  0x33   :  { %523 = vmatprep.subr.bf16.mxu1 %v522_v28  ;;  %v534_v3 = vpack.c.bf16 %v74_v60, %v72_v59  ;;  %v81_v28 = vld [vmem:[%s1274_s1 + $0x1f0] sm:$0xff]  ;;  %v168_v32 = vld [vmem:[%s1274_s1 + $0x4a8] sm:$0xff]  ;;  %v171_v44 = vld [vmem:[%s1274_s1 + $0x4c0] sm:$0xff] }
  0x34   :  { %v544_v34 = vpack.c.bf16 %v81_v28, %v79_v27  ;;  %v630_v36 = vpack.c.bf16 %v170_v33, %v168_v32  ;;  %v172_v39 = vld [vmem:[%s1274_s1 + $0x4c8] sm:$0xff]  ;;  %v636_v48 = vpack.c.bf16 %v173_v45, %v171_v44  ;;  %v182_v53 = vld [vmem:[%s1274_s1 + $0x518] sm:$0xff]  ;;  %v179_v56 = vld [vmem:[%s1274_s1 + $0x500] sm:$0xff] }
  0x35   :  { %597 = vmatpush1.bf16.msra.mxu0 %v596_v2  ;;  %v155_v2 = vld [vmem:[%s1274_s1 + $0x440] sm:$0xff]  ;;  %v176_v46 = vld [vmem:[%s1274_s1 + $0x4e8] sm:$0xff]  ;;  %v186_v59 = vld [vmem:[%s1274_s1 + $0x538] sm:$0xff] }
  0x36   :  { %599 = vmatprep.subr.bf16.mxu0 %v598_v7  ;;  %525 = vmatpush1.bf16.msra.mxu1 %v524_v37  ;;  %v157_v7 = vld [vmem:[%s1274_s1 + $0x450] sm:$0xff]  ;;  %v167_v37 = vld [vmem:[%s1274_s1 + $0x4a0] sm:$0xff]  ;;  %v638_v49 = vpack.c.bf16 %v178_v47, %v176_v46  ;;  %v184_v58 = vld [vmem:[%s1274_s1 + $0x528] sm:$0xff] }
  0x37   :  { %527 = vmatprep.subr.bf16.mxu1 %v526_v40  ;;  %v620_v13 = vpack.c.bf16 %v157_v7, %v155_v2  ;;  %v174_v40 = vld [vmem:[%s1274_s1 + $0x4d8] sm:$0xff]  ;;  %v646_v61 = vpack.c.bf16 %v186_v59, %v184_v58  ;;  %v183_v62 = vld [vmem:[%s1274_s1 + $0x520] sm:$0xff]  ;;  %v189_v5 = vld [vmem:[%s1274_s1 + $0x550] sm:$0xff] }
  0x38   :  { %v187_v4 = vld [vmem:[%s1274_s1 + $0x540] sm:$0xff]  ;;  %v194_v7 = vld [vmem:[%s1274_s1 + $0x578] sm:$0xff]  ;;  %v193_v11 = vld [vmem:[%s1274_s1 + $0x570] sm:$0xff] }
  0x39   :  { %601 = vmatpush1.bf16.msra.mxu0 %v600_v14  ;;  %v159_v14 = vld [vmem:[%s1274_s1 + $0x460] sm:$0xff]  ;;  %v652_v8 = vpack.c.bf16 %v189_v5, %v187_v4  ;;  %v197_v17 = vld [vmem:[%s1274_s1 + $0x590] sm:$0xff]  ;;  %vm663_vm3 = vmpackc.low %vm207_vm1, %vm673_vm2 }
  0x3a   :  { %603 = vmatprep.subr.bf16.mxu0 %v602_v19  ;;  %529 = vmatpush1.bf16.msra.mxu1 %v528_v51  ;;  %v161_v19 = vld [vmem:[%s1274_s1 + $0x470] sm:$0xff]  ;;  %v191_v10 = vld [vmem:[%s1274_s1 + $0x560] sm:$0xff] }
  0x3b   :  { %531 = vmatprep.subr.bf16.mxu1 %v530_v54  ;;  %v624_v25 = vpack.c.bf16 %v161_v19, %v159_v14  ;;  %v177_v51 = vld [vmem:[%s1274_s1 + $0x4f0] sm:$0xff]  ;;  %v656_v14 = vpack.c.bf16 %v193_v11, %v191_v10  ;;  %v195_v16 = vld [vmem:[%s1274_s1 + $0x580] sm:$0xff]  ;;  %v202_v19 = vld [vmem:[%s1274_s1 + $0x5b8] sm:$0x7f] }
  0x3c   :  { %v199_v22 = vld [vmem:[%s1274_s1 + $0x5a0] sm:$0xff]  ;;  %v201_v23 = vld [vmem:[%s1274_s1 + $0x5b0] sm:$0x7f] }
  0x3d   :  { %605 = vmatpush1.bf16.msra.mxu0 %v604_v26  ;;  %v542_v26 = vpack.c.bf16 %v82_v21, %v80_v20  ;;  %v660_v20 = vpack.c.bf16 %v197_v17, %v195_v16 }
  0x3e   :  { %607 = vmatprep.subr.bf16.mxu0 %v606_v31  ;;  %533 = vmatpush1.bf16.msra.mxu1 %v532_v0  ;;  %v165_v31 = vld [vmem:[%s1274_s1 + $0x490] sm:$0xff]  ;;  %v188_v0 = vld [vmem:[%s1274_s1 + $0x548] sm:$0xff] }
  0x3f   :  { %535 = vmatprep.subr.bf16.mxu1 %v534_v3  ;;  %v628_v35 = vpack.c.bf16 %v165_v31, %v163_v30 }
  0x41   :  { %609 = vmatpush1.bf16.msra.mxu0 %v608_v38  ;;  %v169_v38 = vld [vmem:[%s1274_s1 + $0x4b0] sm:$0xff] }
  0x42   :  { %611 = vmatprep.subr.bf16.mxu0 %v610_v43  ;;  %537 = vmatpush1.bf16.msra.mxu1 %v536_v12  ;;  %v632_v42 = vpack.c.bf16 %v169_v38, %v167_v37  ;;  %v634_v43 = vpack.c.bf16 %v174_v40, %v172_v39  ;;  %v196_v12 = vld [vmem:[%s1274_s1 + $0x588] sm:$0xff] }
  0x43   :  { %539 = vmatprep.subr.bf16.mxu1 %v538_v15 }
  0x44   :  { %350 = vmatmul.mubr.f32.vlgmr.msra.gmra.mrb[0].mxu0 %v15_v50  ;;  %v175_v50 = vld [vmem:[%s1274_s1 + $0x4e0] sm:$0xff] }
  0x45   :  { %613 = vmatpush1.bf16.msra.mxu0 %v612_v52  ;;  %480 = vmatprep.mubr.msk.f32.mxu0 %vm203_vm0, %v18_v63  ;;  %v180_v52 = vld [vmem:[%s1274_s1 + $0x508] sm:$0xff]  ;;  %v640_v54 = vpack.c.bf16 %v177_v51, %v175_v50  ;;  %v185_v63 = vld [vmem:[%s1274_s1 + $0x530] sm:$0xff] }
  0x46   :  { %615 = vmatprep.subr.bf16.mxu0 %v614_v57  ;;  %541 = vmatpush1.bf16.msra.mxu1 %v540_v24  ;;  %v642_v55 = vpack.c.bf16 %v182_v53, %v180_v52  ;;  %v181_v57 = vld [vmem:[%s1274_s1 + $0x510] sm:$0xff]  ;;  %v648_v2 = vpack.c.bf16 %v185_v63, %v183_v62  ;;  %v665_v24 = vpack.c.bf16 %v201_v23, %v199_v22 }
  0x47   :  { %543 = vmatprep.subr.bf16.mxu1 %v542_v26  ;;  %v644_v60 = vpack.c.bf16 %v181_v57, %v179_v56 }
  0x49   :  { %617 = vmatpush1.bf16.msra.mxu0 %v616_v1  ;;  %v190_v1 = vld [vmem:[%s1274_s1 + $0x558] sm:$0xff] }
  0x4a   :  { %619 = vmatprep.subr.bf16.mxu0 %v618_v6  ;;  %545 = vmatpush1.bf16.msra.mxu1 %v544_v34  ;;  %v650_v3 = vpack.c.bf16 %v190_v1, %v188_v0  ;;  %v192_v6 = vld [vmem:[%s1274_s1 + $0x568] sm:$0xff] }
  0x4b   :  { %v654_v9 = vpack.c.bf16 %v194_v7, %v192_v6 }
  0x4d   :  { %621 = vmatpush1.bf16.msra.mxu0 %v620_v13  ;;  %279 = vmatmul.mubr.f32.vlgmr.msra.gmra.mrb[0].mxu1 %v13_v41  ;;  %v198_v13 = vld [vmem:[%s1274_s1 + $0x598] sm:$0xff] }
  0x4e   :  { %623 = vmatprep.subr.bf16.mxu0 %v622_v18  ;;  %v658_v15 = vpack.c.bf16 %v198_v13, %v196_v12  ;;  %v200_v18 = vld [vmem:[%s1274_s1 + $0x5a8] sm:$0xff] }
  0x4f   :  { %v662_v21 = vpack.c.bf16 %v202_v19, %v200_v18 }
  0x51   :  { %625 = vmatpush1.bf16.msra.mxu0 %v624_v25  ;;  %v17_v25 = vld [vmem:[%s1275_s0 + $0x20] sm:$0xff] }
  0x52   :  { %627 = vmatprep.subr.bf16.mxu0 %v626_v29 }
  0x55   :  { %629 = vmatpush1.bf16.msra.mxu0 %v628_v35 }
  0x56   :  { %631 = vmatprep.subr.bf16.mxu0 %v630_v36 }
  0x59   :  { %633 = vmatpush1.bf16.msra.mxu0 %v632_v42 }
  0x5a   :  { %635 = vmatprep.subr.bf16.mxu0 %v634_v43 }
  0x5d   :  { %637 = vmatpush1.bf16.msra.mxu0 %v636_v48 }
  0x5e   :  { %639 = vmatprep.subr.bf16.mxu0 %v638_v49 }
  0x61   :  { %641 = vmatpush1.bf16.msra.mxu0 %v640_v54 }
  0x62   :  { %643 = vmatprep.subr.bf16.mxu0 %v642_v55 }
  0x65   :  { %645 = vmatpush1.bf16.msra.mxu0 %v644_v60 }
  0x66   :  { %647 = vmatprep.subr.bf16.mxu0 %v646_v61 }
  0x69   :  { %649 = vmatpush1.bf16.msra.mxu0 %v648_v2 }
  0x6a   :  { %651 = vmatprep.subr.bf16.mxu0 %v650_v3 }
  0x6d   :  { %653 = vmatpush1.bf16.msra.mxu0 %v652_v8 }
  0x6e   :  { %655 = vmatprep.subr.bf16.mxu0 %v654_v9 }
  0x71   :  { %657 = vmatpush1.bf16.msra.mxu0 %v656_v14 }
  0x72   :  { %659 = vmatprep.subr.bf16.mxu0 %v658_v15 }
  0x75   :  { %661 = vmatpush1.bf16.msra.mxu0 %v660_v20 }
  0x76   :  { %664 = vmatprep.subr.msk.bf16.mxu0 %vm663_vm3, %v662_v21 }
  0x79   :  { %667 = vmatpush1.bf16.msk.msra.mxu0 %vm663_vm3, %v665_v24 }
  0x7c   :  { %421 = vmatmul.mubr.f32.vlgmr.msra.gmra.mrb[0].mxu0 %v17_v25 }
 0x120   :  { %v280_v26 = vpop.f32.mrb[0].mxu1 }
 0x121   :  { %v282_v27 = vpop.f32.mrb[1].mxu1 }
 0x14f   :  { %v422_v28 = vpop.f32.mrb[0].mxu0 }
 0x150   :  { %v668_v29 = vadd.f32 %v422_v28, %v280_v26  ;;  %v424_v30 = vpop.f32.mrb[1].mxu0 }
 0x151   :  { %v669_v31 = vadd.f32 %v424_v30, %v282_v27 }
 0x152   :  { %427 = vst [vmem:[%s1276_s2] sm:$0xff] %v668_v29  ;;  %v429_v32 = vrot.slane %v668_v29, 4  ;;  %v441_v33 = vmul.f32 %v668_v29, %v668_v29 }
 0x153   :  { %428 = vst [vmem:[%s1276_s2 + $0x8] sm:$0xff] %v669_v31  ;;  %v435_v34 = vrot.slane %v669_v31, 4  ;;  %v442_v35 = vmul.f32 %v669_v31, %v669_v31 }
 0x154   :  { %v430_v36 = vadd.f32 %v668_v29, %v429_v32  ;;  %v443_v37 = vrot.slane %v441_v33, 4 }
 0x155   :  { %v436_v38 = vadd.f32 %v669_v31, %v435_v34  ;;  %v449_v39 = vrot.slane %v442_v35, 4 }
 0x156   :  { %v431_v40 = vrot.slane %v430_v36, 2  ;;  %v444_v41 = vadd.f32 %v443_v37, %v441_v33 }
 0x157   :  { %v437_v42 = vrot.slane %v436_v38, 2  ;;  %v450_v43 = vadd.f32 %v449_v39, %v442_v35 }
 0x158   :  { %v432_v44 = vadd.f32 %v431_v40, %v430_v36  ;;  %v445_v45 = vrot.slane %v444_v41, 2 }
 0x159   :  { %v438_v46 = vadd.f32 %v437_v42, %v436_v38  ;;  %v451_v47 = vrot.slane %v450_v43, 2 }
 0x15a   :  { %v433_v48 = vrot.slane %v432_v44, 1  ;;  %v446_v49 = vadd.f32 %v445_v45, %v444_v41 }
 0x15b   :  { %v439_v50 = vrot.slane %v438_v46, 1  ;;  %v452_v51 = vadd.f32 %v451_v47, %v450_v43 }
 0x15c   :  { %v447_v52 = vrot.slane %v446_v49, 1  ;;  %v434_v54 = vadd.f32 %v433_v48, %v432_v44 }
 0x15d   :  { %v453_v53 = vrot.slane %v452_v51, 1  ;;  %v440_v56 = vadd.f32 %v439_v50, %v438_v46 }
 0x15e   :  { %v448_v55 = vadd.f32 %v447_v52, %v446_v49 }
 0x15f   :  { %v454_v57 = vadd.f32 %v453_v53, %v452_v51 }
 0x160   :  { %v456_v58 = vsel %vm455_vm4, %v434_v54, %v448_v55 }
 0x161   :  { %v457_v59 = vsel %vm455_vm4, %v440_v56, %v454_v57 }
 0x162   :  { %v460_v60 = vcombine.low %v456_v58, %v457_v59 }
 0x164   :  { %481 = vst.sshfl [vmem:[%s1277_s3] sm:$0x33 pattern:$0x76325410] %v460_v60 }

</bundles_post_ra>
